<compile_context>
chip_gen: v7x
topology: tpu7x:2x2x1
jax: 0.10.0
libtpu: 0.0.40
codegen_flags: <defaults>
</compile_context>

<pallas_src>
import jax
import jax.numpy as jnp
from jax import lax
from jax.experimental import pallas as pl
from jax.experimental.pallas import tpu as pltpu


# ---------------------------------------------------------------------------
# Fused CrossAttention kernel (LN -> cross-attn -> residual, twice).
# ---------------------------------------------------------------------------
def _layer_norm(x, gamma, beta, eps):
    mu = jnp.mean(x, axis=-1, keepdims=True)
    xc = x - mu
    var = jnp.mean(xc * xc, axis=-1, keepdims=True)
    return xc * lax.rsqrt(var + eps) * gamma + beta


def _make_fused_kernel(nhead, causal, mxu_dtype, eps=1e-5):
    def kernel(fl_ref, fr_ref, g1_ref, b1_ref, g2_ref, b2_ref,
               wq_ref, wk_ref, wv_ref, bq_ref, bk_ref, bv_ref,
               wout_ref, bout_ref,
               out_l_ref, out_r_ref, raw_ref):
        TN, W, C = fl_ref.shape
        dh = C // nhead

        fl = fl_ref[...]                                  # [TN, W, C] f32
        fr = fr_ref[...]
        g1, b1 = g1_ref[...], b1_ref[...]                 # [1, C] f32
        g2, b2 = g2_ref[...], b2_ref[...]
        # Weights arrive already transposed + cast to mxu_dtype; Q weight/bias
        # are already scaled by 1/sqrt(dh) in the wrapper.
        wq, wk, wv, wout = wq_ref[...], wk_ref[...], wv_ref[...], wout_ref[...]
        bq, bk, bv, bout = bq_ref[...], bk_ref[...], bv_ref[...], bout_ref[...]

        if causal:
            row = lax.broadcasted_iota(jnp.int32, (W, W), 0)
            col = lax.broadcasted_iota(jnp.int32, (W, W), 1)
            mask = jnp.where(col > row, -jnp.inf, 0.0).astype(jnp.float32)[None]
        else:
            mask = None

        def mha(q_in, kv_in, with_raw, use_mask):
            # q_in / kv_in: [TN, W, C], already cast to mxu_dtype (cast hoisted).
            qf = q_in.reshape(TN * W, C)
            kvf = kv_in.reshape(TN * W, C)
            # Full-width projections (K = C) keep the MXU dense; f32 accumulate.
            q = jnp.dot(qf, wq, preferred_element_type=jnp.float32) + bq
            k = jnp.dot(kvf, wk, preferred_element_type=jnp.float32) + bk
            v = jnp.dot(kvf, wv, preferred_element_type=jnp.float32) + bv
            q3 = q.reshape(TN, W, C).astype(mxu_dtype)
            k3 = k.reshape(TN, W, C).astype(mxu_dtype)
            v3 = v.reshape(TN, W, C).astype(mxu_dtype)

            raw = None
            o_heads = []
            # Per-head loop (single-leading-batch-dim einsums lower cleanly on
            # Mosaic); raw is accumulated additively -> no extra [W,W] buffers.
            for h in range(nhead):
                sl = slice(h * dh, (h + 1) * dh)
                s = jnp.einsum('nqd,nkd->nqk', q3[:, :, sl], k3[:, :, sl],
                               preferred_element_type=jnp.float32)   # [TN, W, W]
                if use_mask:
                    s = s + mask
                if with_raw:
                    raw = s if raw is None else raw + s
                m = jnp.max(s, axis=-1, keepdims=True)
                p = jnp.exp(s - m)
                inv = pl.reciprocal(jnp.sum(p, axis=-1, keepdims=True), approx=True)
                a = (p * inv).astype(mxu_dtype)
                o_heads.append(jnp.einsum('nqk,nkd->nqd', a, v3[:, :, sl],
                                          preferred_element_type=jnp.float32))
            # Assemble all heads, then ONE out-projection (K = C) + bias.
            o = jnp.concatenate(o_heads, axis=-1).reshape(TN * W, C).astype(mxu_dtype)
            y = jnp.dot(o, wout, preferred_element_type=jnp.float32) + bout
            return y.reshape(TN, W, C), raw

        # ---- stage 1: update right features (raw attn discarded -> never computed)
        fl_n1 = _layer_norm(fl, g1, b1, eps)
        fr_n1 = _layer_norm(fr, g1, b1, eps)
        fl_n1_m = fl_n1.astype(mxu_dtype)      # cast once; reused in both stages
        upd_r, _ = mha(fr_n1.astype(mxu_dtype), fl_n1_m,
                       with_raw=False, use_mask=False)
        fr_new = fr + upd_r
        out_r_ref[...] = fr_new

        # ---- stage 2: update left features (causal mask only on the last layer)
        fr_n2 = _layer_norm(fr_new, g2, b2, eps)
        upd_l, raw = mha(fl_n1_m, fr_n2.astype(mxu_dtype),
                         with_raw=True, use_mask=causal)
        out_l_ref[...] = fl + upd_l
        raw_ref[...] = raw.astype(raw_ref.dtype)

    return kernel


# ---------------------------------------------------------------------------
# Generation-aware block-size / VMEM-budget selection.
# ---------------------------------------------------------------------------
def _tpu_vmem_capacity_bytes():
    try:
        info = pltpu.get_tpu_info()
        cap = getattr(info, "vmem_capacity_bytes", None)
        if cap:
            return int(cap)
    except Exception:
        pass
    return 64 * 1024 * 1024          # conservative fallback (v7x-sized)


def _tensorcores_per_chip():
    try:
        kind = jax.devices()[0].device_kind.lower()
    except Exception:
        return 1
    return 2 if ("v7" in kind or "tpu7" in kind) else 1


def _estimate_step_bytes(tn, W, C, weight_bytes):
    # Pipelined input/output blocks (double-buffered by the Pallas runtime).
    io = 2 * (4 * tn * W * C + tn * W * W) * 4
    # In-kernel temporaries (counted as f32, conservative): token-sized
    # (norms, q/k/v for both stages, residuals, mxu casts) + score-sized
    # (s/p/a live per head + the raw accumulator).
    tok_tmp = 16 * tn * W * C * 4
    score_tmp = 5 * tn * W * W * 4
    return io + tok_tmp + score_tmp + weight_bytes


def _pick_block_n(N, W, C, weight_bytes, vmem_budget, prefer_even_steps):
    fitting = [d for d in range(1, N + 1)
               if N % d == 0
               and _estimate_step_bytes(d, W, C, weight_bytes) <= vmem_budget]
    if not fitting:
        return 1
    if prefer_even_steps:
        # 2 TensorCores per chip (v7x): keep the 'parallel' grid load-balanced.
        even = [d for d in fitting if (N // d) % 2 == 0]
        if even:
            return max(even)
    return max(fitting)


# ---------------------------------------------------------------------------
# Wrapper: one fused pallas_call over batch blocks.
# ---------------------------------------------------------------------------
def fused_cross_attention(fl_tok, fr_tok, params, nhead, last_layer,
                          mxu_dtype=jnp.bfloat16, raw_dtype=jnp.float32,
                          block_n=None):
    """fl_tok / fr_tok: [N, W, C] float32 tokens. Returns (fl_new, fr_new, raw [N,W,W])."""
    N, W, C = fl_tok.shape
    assert C % nhead == 0
    dh = C // nhead
    scale = float(dh) ** -0.5

    # Pre-split / pre-transpose / pre-scale / pre-cast the projection weights ONCE
    # in the wrapper so the kernel does plain x @ W with no per-step weight work.
    w_in = jnp.asarray(params["w_in"], jnp.float32)                 # [3C, C]
    b_in = jnp.asarray(params["b_in"], jnp.float32)                 # [3C]
    w_q_t = (w_in[:C].T * scale).astype(mxu_dtype)                  # [C, C], pre-scaled
    w_k_t = w_in[C:2 * C].T.astype(mxu_dtype)
    w_v_t = w_in[2 * C:].T.astype(mxu_dtype)
    w_out_t = jnp.asarray(params["w_out"], jnp.float32).T.astype(mxu_dtype)
    b_q = (b_in[:C] * scale).reshape(1, C)                          # f32 (adds to f32 acc)
    b_k = b_in[C:2 * C].reshape(1, C)
    b_v = b_in[2 * C:].reshape(1, C)
    b_out = jnp.asarray(params["b_out"], jnp.float32).reshape(1, C)
    g1 = jnp.asarray(params["ln1_g"], jnp.float32).reshape(1, C)
    b1 = jnp.asarray(params["ln1_b"], jnp.float32).reshape(1, C)
    g2 = jnp.asarray(params["ln2_g"], jnp.float32).reshape(1, C)
    b2 = jnp.asarray(params["ln2_b"], jnp.float32).reshape(1, C)

    vmem_cap = _tpu_vmem_capacity_bytes()
    cores = _tensorcores_per_chip()
    w_item = jnp.dtype(mxu_dtype).itemsize
    weight_bytes = 2 * (4 * C * C * w_item + 8 * C * 4)             # double-buffered
    if block_n is None:
        block_n = _pick_block_n(N, W, C, weight_bytes,
                                vmem_budget=int(vmem_cap * 0.70),
                                prefer_even_steps=(cores >= 2))
    grid = (N // block_n,)

    tok_spec = pl.BlockSpec((block_n, W, C), lambda i: (i, 0, 0))
    raw_spec = pl.BlockSpec((block_n, W, W), lambda i: (i, 0, 0))
    mat_spec = pl.BlockSpec((C, C), lambda i: (0, 0))
    vec_spec = pl.BlockSpec((1, C), lambda i: (0, 0))

    kernel = _make_fused_kernel(nhead=nhead, causal=last_layer, mxu_dtype=mxu_dtype)

    out_l, out_r, raw = pl.pallas_call(
        kernel,
        out_shape=(jax.ShapeDtypeStruct((N, W, C), jnp.float32),
                   jax.ShapeDtypeStruct((N, W, C), jnp.float32),
                   jax.ShapeDtypeStruct((N, W, W), raw_dtype)),
        grid=grid,
        in_specs=[
            tok_spec, tok_spec,
            vec_spec, vec_spec, vec_spec, vec_spec,
            mat_spec, mat_spec, mat_spec,
            vec_spec, vec_spec, vec_spec,
            mat_spec, vec_spec,
        ],
        out_specs=(tok_spec, tok_spec, raw_spec),
        compiler_params=pltpu.CompilerParams(
            dimension_semantics=("parallel",),
            vmem_limit_bytes=int(vmem_cap * 0.90)),
    )(fl_tok, fr_tok, g1, b1, g2, b2,
      w_q_t, w_k_t, w_v_t, b_q, b_k, b_v, w_out_t, b_out)
    return out_l, out_r, raw


# ---------------------------------------------------------------------------
# CrossAttention forward (layout glue in plain JAX, hot path in one Pallas call).
# ---------------------------------------------------------------------------
def cross_attention_forward(feat_left, feat_right, params, nhead,
                            last_layer=False, mxu_dtype=jnp.bfloat16,
                            raw_dtype=jnp.float32):
    bs, c, hn, w = feat_left.shape

    # TODO(synk): these NCHW <-> token relayouts are full HBM passes; keep the
    # surrounding model channel-last around this block at production sizes.
    def to_tokens(x):                # [bs,C,HN,W] -> [N, W, C], N = HN*bs (HN-major)
        x = jnp.transpose(x, (3, 2, 0, 1)).reshape(w, hn * bs, c)   # [W, N, C]
        return jnp.transpose(x, (1, 0, 2)).astype(jnp.float32)

    def to_nchw(x):                  # [N, W, C] -> [bs, C, HN, W]
        x = jnp.transpose(x, (1, 0, 2)).reshape(w, hn, bs, c)
        return jnp.transpose(x, (2, 3, 1, 0))

    fl_tok = to_tokens(feat_left)
    fr_tok = to_tokens(feat_right)

    fl_new, fr_new, raw = fused_cross_attention(
        fl_tok, fr_tok, params, nhead, last_layer,
        mxu_dtype=mxu_dtype, raw_dtype=raw_dtype)

    out_left = to_nchw(fl_new)
    out_right = to_nchw(fr_new)
    raw_attn = jnp.transpose(raw.reshape(hn, bs, w, w), (1, 0, 2, 3))   # [bs, HN, W, W]
    return out_left, out_right, raw_attn


# ---------------------------------------------------------------------------
# Pure-JAX reference (for correctness check).
# ---------------------------------------------------------------------------
def _ref_ln(x, g, b, eps=1e-5):
    mu = x.mean(-1, keepdims=True)
    var = ((x - mu) ** 2).mean(-1, keepdims=True)
    return (x - mu) / jnp.sqrt(var + eps) * g + b


def _ref_mha(xq, xk, xv, w_in, b_in, w_out, b_out, mask, nhead):
    N, W, C = xq.shape
    dh = C // nhead
    q = xq @ w_in[:C].T + b_in[:C]
    k = xk @ w_in[C:2 * C].T + b_in[C:2 * C]
    v = xv @ w_in[2 * C:].T + b_in[2 * C:]
    scale = float(dh) ** -0.5
    qh = (q * scale).reshape(N, W, nhead, dh)
    kh = k.reshape(N, W, nhead, dh)
    vh = v.reshape(N, W, nhead, dh)
    s = jnp.einsum('nwhd,nvhd->nhwv', qh, kh) + mask[None, None]
    raw = s.sum(1)
    a = jax.nn.softmax(s, axis=-1)
    o = jnp.einsum('nhwv,nvhd->nwhd', a, vh).reshape(N, W, C)
    return o @ w_out.T + b_out, raw


def _ref_forward(feat_left, feat_right, params, nhead, last_layer=False):
    bs, c, hn, w = feat_left.shape
    to_tok = lambda x: jnp.transpose(
        jnp.transpose(x, (3, 2, 0, 1)).reshape(w, hn * bs, c), (1, 0, 2))
    to_nchw = lambda x: jnp.transpose(
        jnp.transpose(x, (1, 0, 2)).reshape(w, hn, bs, c), (2, 3, 1, 0))
    fl, fr = to_tok(feat_left), to_tok(feat_right)
    fl2 = _ref_ln(fl, params["ln1_g"], params["ln1_b"])
    fr2 = _ref_ln(fr, params["ln1_g"], params["ln1_b"])
    zero = jnp.zeros((w, w), jnp.float32)
    fr2u, _ = _ref_mha(fr2, fl2, fl2, params["w_in"], params["b_in"],
                       params["w_out"], params["b_out"], zero, nhead)
    fr = fr + fr2u
    mask = zero
    if last_layer:
        tri = jnp.triu(jnp.ones((w, w), jnp.float32), k=1)
        mask = jnp.where(tri == 1, -jnp.inf, 0.0)
    fr2b = _ref_ln(fr, params["ln2_g"], params["ln2_b"])
    fl2u, raw = _ref_mha(fl2, fr2b, fr2b, params["w_in"], params["b_in"],
                         params["w_out"], params["b_out"], mask, nhead)
    fl = fl + fl2u
    return to_nchw(fl), to_nchw(fr), jnp.transpose(raw.reshape(hn, bs, w, w), (1, 0, 2, 3))


# ---------------------------------------------------------------------------
if __name__ == "__main__":
    bs, hidden_dim, hn, w, nhead = 2, 32, 4, 8, 4
    C = hidden_dim

    key = jax.random.PRNGKey(0)
    k1, k2, k3, k4, k5, k6, k7, k8, kx, ky = jax.random.split(key, 10)
    params = {
        "w_in":  (jax.random.normal(k1, (3 * C, C), jnp.float32) * 0.05),
        "b_in":  (jax.random.normal(k2, (3 * C,), jnp.float32) * 0.01),
        "w_out": (jax.random.normal(k3, (C, C), jnp.float32) * 0.05),
        "b_out": (jax.random.normal(k4, (C,), jnp.float32) * 0.01),
        "ln1_g": jnp.ones((C,), jnp.float32) + 0.1 * jax.random.normal(k5, (C,)),
        "ln1_b": 0.1 * jax.random.normal(k6, (C,), jnp.float32),
        "ln2_g": jnp.ones((C,), jnp.float32) + 0.1 * jax.random.normal(k7, (C,)),
        "ln2_b": 0.1 * jax.random.normal(k8, (C,), jnp.float32),
    }
    feat_left = jax.random.normal(kx, (bs, C, hn, w), jnp.float32)
    feat_right = jax.random.normal(ky, (bs, C, hn, w), jnp.float32)

    fwd = jax.jit(cross_attention_forward, static_argnames=("nhead", "last_layer"))

    for last_layer in (False, True):
        out_left, out_right, raw_attn = fwd(
            feat_left, feat_right, params, nhead=nhead, last_layer=last_layer)
        jax.block_until_ready((out_left, out_right, raw_attn))

        rl, rr, rraw = _ref_forward(feat_left, feat_right, params, nhead,
                                    last_layer=last_layer)
        assert out_left.shape == (bs, C, hn, w)
        assert out_right.shape == (bs, C, hn, w)
        assert raw_attn.shape == (bs, hn, w, w)
        # bf16 MXU operands with f32 accumulation -> slightly looser tolerance.
        assert jnp.allclose(out_left, rl, atol=2e-2, rtol=2e-2)
        assert jnp.allclose(out_right, rr, atol=2e-2, rtol=2e-2)
        finite = jnp.isfinite(rraw)
        assert bool(jnp.all(jnp.isfinite(raw_attn) == finite))
        assert jnp.allclose(jnp.where(finite, raw_attn, 0.0),
                            jnp.where(finite, rraw, 0.0), atol=2e-2, rtol=2e-2)

    print("KERNEL_OK")
</pallas_src>

<mosaic_0001>
module attributes {stable_mosaic.version = 11 : i64} {
  func.func @kernel(%arg0: i32, %arg1: memref<8x8x32xf32, #tpu.memory_space<vmem>>, %arg2: memref<8x8x32xf32, #tpu.memory_space<vmem>>, %arg3: memref<1x32xf32, #tpu.memory_space<vmem>>, %arg4: memref<1x32xf32, #tpu.memory_space<vmem>>, %arg5: memref<1x32xf32, #tpu.memory_space<vmem>>, %arg6: memref<1x32xf32, #tpu.memory_space<vmem>>, %arg7: memref<32x32xbf16, #tpu.memory_space<vmem>>, %arg8: memref<32x32xbf16, #tpu.memory_space<vmem>>, %arg9: memref<32x32xbf16, #tpu.memory_space<vmem>>, %arg10: memref<1x32xf32, #tpu.memory_space<vmem>>, %arg11: memref<1x32xf32, #tpu.memory_space<vmem>>, %arg12: memref<1x32xf32, #tpu.memory_space<vmem>>, %arg13: memref<32x32xbf16, #tpu.memory_space<vmem>>, %arg14: memref<1x32xf32, #tpu.memory_space<vmem>>, %arg15: memref<8x8x32xf32, #tpu.memory_space<vmem>>, %arg16: memref<8x8x32xf32, #tpu.memory_space<vmem>>, %arg17: memref<8x8x8xf32, #tpu.memory_space<vmem>>) attributes {dimension_semantics = [#tpu.dimension_semantics<parallel>], iteration_bounds = array<i64: 1>, scalar_prefetch = 0 : i64, scratch_operands = 0 : i64, tpu.core_type = #tpu.core_type<tc>, window_params = [{transform_indices = @transform_0, window_bounds = array<i64: 8, 8, 32>}, {transform_indices = @transform_1, window_bounds = array<i64: 8, 8, 32>}, {pipeline_mode = #tpu.pipeline_mode<synchronous>, transform_indices = @transform_2, window_bounds = array<i64: 1, 32>}, {pipeline_mode = #tpu.pipeline_mode<synchronous>, transform_indices = @transform_3, window_bounds = array<i64: 1, 32>}, {pipeline_mode = #tpu.pipeline_mode<synchronous>, transform_indices = @transform_4, window_bounds = array<i64: 1, 32>}, {pipeline_mode = #tpu.pipeline_mode<synchronous>, transform_indices = @transform_5, window_bounds = array<i64: 1, 32>}, {pipeline_mode = #tpu.pipeline_mode<synchronous>, transform_indices = @transform_6, window_bounds = array<i64: 32, 32>}, {pipeline_mode = #tpu.pipeline_mode<synchronous>, transform_indices = @transform_7, window_bounds = array<i64: 32, 32>}, {pipeline_mode = #tpu.pipeline_mode<synchronous>, transform_indices = @transform_8, window_bounds = array<i64: 32, 32>}, {pipeline_mode = #tpu.pipeline_mode<synchronous>, transform_indices = @transform_9, window_bounds = array<i64: 1, 32>}, {pipeline_mode = #tpu.pipeline_mode<synchronous>, transform_indices = @transform_10, window_bounds = array<i64: 1, 32>}, {pipeline_mode = #tpu.pipeline_mode<synchronous>, transform_indices = @transform_11, window_bounds = array<i64: 1, 32>}, {pipeline_mode = #tpu.pipeline_mode<synchronous>, transform_indices = @transform_12, window_bounds = array<i64: 32, 32>}, {pipeline_mode = #tpu.pipeline_mode<synchronous>, transform_indices = @transform_13, window_bounds = array<i64: 1, 32>}, {transform_indices = @transform_14, window_bounds = array<i64: 8, 8, 32>}, {transform_indices = @transform_15, window_bounds = array<i64: 8, 8, 32>}, {transform_indices = @transform_16, window_bounds = array<i64: 8, 8, 8>}]} {
    %c0 = arith.constant 0 : index
    %c0_0 = arith.constant 0 : index
    %c0_1 = arith.constant 0 : index
    %0 = vector.load %arg1[%c0, %c0_0, %c0_1] : memref<8x8x32xf32, #tpu.memory_space<vmem>>, vector<8x8x32xf32>
    %c0_2 = arith.constant 0 : index
    %c0_3 = arith.constant 0 : index
    %c0_4 = arith.constant 0 : index
    %1 = vector.load %arg2[%c0_2, %c0_3, %c0_4] : memref<8x8x32xf32, #tpu.memory_space<vmem>>, vector<8x8x32xf32>
    %c0_5 = arith.constant 0 : index
    %c0_6 = arith.constant 0 : index
    %2 = vector.load %arg3[%c0_5, %c0_6] : memref<1x32xf32, #tpu.memory_space<vmem>>, vector<1x32xf32>
    %c0_7 = arith.constant 0 : index
    %c0_8 = arith.constant 0 : index
    %3 = vector.load %arg4[%c0_7, %c0_8] : memref<1x32xf32, #tpu.memory_space<vmem>>, vector<1x32xf32>
    %c0_9 = arith.constant 0 : index
    %c0_10 = arith.constant 0 : index
    %4 = vector.load %arg5[%c0_9, %c0_10] : memref<1x32xf32, #tpu.memory_space<vmem>>, vector<1x32xf32>
    %c0_11 = arith.constant 0 : index
    %c0_12 = arith.constant 0 : index
    %5 = vector.load %arg6[%c0_11, %c0_12] : memref<1x32xf32, #tpu.memory_space<vmem>>, vector<1x32xf32>
    %c0_13 = arith.constant 0 : index
    %c0_14 = arith.constant 0 : index
    %6 = vector.load %arg7[%c0_13, %c0_14] : memref<32x32xbf16, #tpu.memory_space<vmem>>, vector<32x32xbf16>
    %c0_15 = arith.constant 0 : index
    %c0_16 = arith.constant 0 : index
    %7 = vector.load %arg8[%c0_15, %c0_16] : memref<32x32xbf16, #tpu.memory_space<vmem>>, vector<32x32xbf16>
    %c0_17 = arith.constant 0 : index
    %c0_18 = arith.constant 0 : index
    %8 = vector.load %arg9[%c0_17, %c0_18] : memref<32x32xbf16, #tpu.memory_space<vmem>>, vector<32x32xbf16>
    %c0_19 = arith.constant 0 : index
    %c0_20 = arith.constant 0 : index
    %9 = vector.load %arg13[%c0_19, %c0_20] : memref<32x32xbf16, #tpu.memory_space<vmem>>, vector<32x32xbf16>
    %c0_21 = arith.constant 0 : index
    %c0_22 = arith.constant 0 : index
    %10 = vector.load %arg10[%c0_21, %c0_22] : memref<1x32xf32, #tpu.memory_space<vmem>>, vector<1x32xf32>
    %c0_23 = arith.constant 0 : index
    %c0_24 = arith.constant 0 : index
    %11 = vector.load %arg11[%c0_23, %c0_24] : memref<1x32xf32, #tpu.memory_space<vmem>>, vector<1x32xf32>
    %c0_25 = arith.constant 0 : index
    %c0_26 = arith.constant 0 : index
    %12 = vector.load %arg12[%c0_25, %c0_26] : memref<1x32xf32, #tpu.memory_space<vmem>>, vector<1x32xf32>
    %c0_27 = arith.constant 0 : index
    %c0_28 = arith.constant 0 : index
    %13 = vector.load %arg14[%c0_27, %c0_28] : memref<1x32xf32, #tpu.memory_space<vmem>>, vector<1x32xf32>
    %cst = arith.constant dense<0.000000e+00> : vector<8x8xf32>
    %14 = vector.multi_reduction <add>, %0, %cst [2] : vector<8x8x32xf32> to vector<8x8xf32>
    %15 = vector.shape_cast %14 : vector<8x8xf32> to vector<8x8x1xf32>
    %cst_29 = arith.constant 3.200000e+01 : f32
    %16 = vector.broadcast %cst_29 : f32 to vector<8x8x1xf32>
    %17 = arith.divf %15, %16 : vector<8x8x1xf32>
    %18 = vector.broadcast %17 : vector<8x8x1xf32> to vector<8x8x32xf32>
    %19 = arith.subf %0, %18 : vector<8x8x32xf32>
    %20 = arith.mulf %19, %19 : vector<8x8x32xf32>
    %cst_30 = arith.constant dense<0.000000e+00> : vector<8x8xf32>
    %21 = vector.multi_reduction <add>, %20, %cst_30 [2] : vector<8x8x32xf32> to vector<8x8xf32>
    %22 = vector.shape_cast %21 : vector<8x8xf32> to vector<8x8x1xf32>
    %cst_31 = arith.constant 3.200000e+01 : f32
    %23 = vector.broadcast %cst_31 : f32 to vector<8x8x1xf32>
    %24 = arith.divf %22, %23 : vector<8x8x1xf32>
    %cst_32 = arith.constant 9.99999974E-6 : f32
    %25 = vector.broadcast %cst_32 : f32 to vector<8x8x1xf32>
    %26 = arith.addf %24, %25 : vector<8x8x1xf32>
    %27 = math.rsqrt %26 : vector<8x8x1xf32>
    %28 = vector.broadcast %27 : vector<8x8x1xf32> to vector<8x8x32xf32>
    %29 = arith.mulf %19, %28 : vector<8x8x32xf32>
    %30 = vector.shape_cast %2 : vector<1x32xf32> to vector<1x1x32xf32>
    %31 = vector.broadcast %30 : vector<1x1x32xf32> to vector<8x8x32xf32>
    %32 = arith.mulf %29, %31 : vector<8x8x32xf32>
    %33 = vector.shape_cast %3 : vector<1x32xf32> to vector<1x1x32xf32>
    %34 = vector.broadcast %33 : vector<1x1x32xf32> to vector<8x8x32xf32>
    %35 = arith.addf %32, %34 : vector<8x8x32xf32>
    %cst_33 = arith.constant dense<0.000000e+00> : vector<8x8xf32>
    %36 = vector.multi_reduction <add>, %1, %cst_33 [2] : vector<8x8x32xf32> to vector<8x8xf32>
    %37 = vector.shape_cast %36 : vector<8x8xf32> to vector<8x8x1xf32>
    %cst_34 = arith.constant 3.200000e+01 : f32
    %38 = vector.broadcast %cst_34 : f32 to vector<8x8x1xf32>
    %39 = arith.divf %37, %38 : vector<8x8x1xf32>
    %40 = vector.broadcast %39 : vector<8x8x1xf32> to vector<8x8x32xf32>
    %41 = arith.subf %1, %40 : vector<8x8x32xf32>
    %42 = arith.mulf %41, %41 : vector<8x8x32xf32>
    %cst_35 = arith.constant dense<0.000000e+00> : vector<8x8xf32>
    %43 = vector.multi_reduction <add>, %42, %cst_35 [2] : vector<8x8x32xf32> to vector<8x8xf32>
    %44 = vector.shape_cast %43 : vector<8x8xf32> to vector<8x8x1xf32>
    %cst_36 = arith.constant 3.200000e+01 : f32
    %45 = vector.broadcast %cst_36 : f32 to vector<8x8x1xf32>
    %46 = arith.divf %44, %45 : vector<8x8x1xf32>
    %cst_37 = arith.constant 9.99999974E-6 : f32
    %47 = vector.broadcast %cst_37 : f32 to vector<8x8x1xf32>
    %48 = arith.addf %46, %47 : vector<8x8x1xf32>
    %49 = math.rsqrt %48 : vector<8x8x1xf32>
    %50 = vector.broadcast %49 : vector<8x8x1xf32> to vector<8x8x32xf32>
    %51 = arith.mulf %41, %50 : vector<8x8x32xf32>
    %52 = vector.shape_cast %2 : vector<1x32xf32> to vector<1x1x32xf32>
    %53 = vector.broadcast %52 : vector<1x1x32xf32> to vector<8x8x32xf32>
    %54 = arith.mulf %51, %53 : vector<8x8x32xf32>
    %55 = vector.shape_cast %3 : vector<1x32xf32> to vector<1x1x32xf32>
    %56 = vector.broadcast %55 : vector<1x1x32xf32> to vector<8x8x32xf32>
    %57 = arith.addf %54, %56 : vector<8x8x32xf32>
    %58 = arith.truncf %35 : vector<8x8x32xf32> to vector<8x8x32xbf16>
    %59 = arith.truncf %57 : vector<8x8x32xf32> to vector<8x8x32xbf16>
    %60 = vector.shape_cast %59 : vector<8x8x32xbf16> to vector<64x32xbf16>
    %61 = vector.shape_cast %58 : vector<8x8x32xbf16> to vector<64x32xbf16>
    %cst_38 = arith.constant dense<0.000000e+00> : vector<64x32xf32>
    %62 = tpu.matmul %60, %6, %cst_38 {dimension_numbers = #tpu.dot_dimension_numbers<[1], [0], [0], [1], [0, 0, 1, 1], [], []>} : vector<64x32xbf16>, vector<32x32xbf16>, vector<64x32xf32> -> vector<64x32xf32>
    %63 = vector.broadcast %10 : vector<1x32xf32> to vector<64x32xf32>
    %64 = arith.addf %62, %63 : vector<64x32xf32>
    %cst_39 = arith.constant dense<0.000000e+00> : vector<64x32xf32>
    %65 = tpu.matmul %61, %7, %cst_39 {dimension_numbers = #tpu.dot_dimension_numbers<[1], [0], [0], [1], [0, 0, 1, 1], [], []>} : vector<64x32xbf16>, vector<32x32xbf16>, vector<64x32xf32> -> vector<64x32xf32>
    %66 = vector.broadcast %11 : vector<1x32xf32> to vector<64x32xf32>
    %67 = arith.addf %65, %66 : vector<64x32xf32>
    %cst_40 = arith.constant dense<0.000000e+00> : vector<64x32xf32>
    %68 = tpu.matmul %61, %8, %cst_40 {dimension_numbers = #tpu.dot_dimension_numbers<[1], [0], [0], [1], [0, 0, 1, 1], [], []>} : vector<64x32xbf16>, vector<32x32xbf16>, vector<64x32xf32> -> vector<64x32xf32>
    %69 = vector.broadcast %12 : vector<1x32xf32> to vector<64x32xf32>
    %70 = arith.addf %68, %69 : vector<64x32xf32>
    %71 = vector.shape_cast %64 : vector<64x32xf32> to vector<8x8x32xf32>
    %72 = arith.truncf %71 : vector<8x8x32xf32> to vector<8x8x32xbf16>
    %73 = vector.shape_cast %67 : vector<64x32xf32> to vector<8x8x32xf32>
    %74 = arith.truncf %73 : vector<8x8x32xf32> to vector<8x8x32xbf16>
    %75 = vector.shape_cast %70 : vector<64x32xf32> to vector<8x8x32xf32>
    %76 = arith.truncf %75 : vector<8x8x32xf32> to vector<8x8x32xbf16>
    %77 = vector.extract_strided_slice %72 {offsets = [0, 0, 0], sizes = [8, 8, 8], strides = [1, 1, 1]} : vector<8x8x32xbf16> to vector<8x8x8xbf16>
    %78 = vector.extract_strided_slice %74 {offsets = [0, 0, 0], sizes = [8, 8, 8], strides = [1, 1, 1]} : vector<8x8x32xbf16> to vector<8x8x8xbf16>
    "tpu.trace_start"() <{level = 10 : i32, message = "nqd,nkd->nqk"}> : () -> ()
    %cst_41 = arith.constant dense<0.000000e+00> : vector<8x8x8xf32>
    %79 = tpu.matmul %77, %78, %cst_41 {dimension_numbers = #tpu.dot_dimension_numbers<[2], [2], [1], [1], [0, 0, 0, 1, 1, 1], [0], [0]>} : vector<8x8x8xbf16>, vector<8x8x8xbf16>, vector<8x8x8xf32> -> vector<8x8x8xf32>
    "tpu.trace_stop"() : () -> ()
    %cst_42 = arith.constant dense<0xFF800000> : vector<8x8xf32>
    %80 = vector.multi_reduction <maximumf>, %79, %cst_42 [2] : vector<8x8x8xf32> to vector<8x8xf32>
    %81 = vector.shape_cast %80 : vector<8x8xf32> to vector<8x8x1xf32>
    %82 = vector.broadcast %81 : vector<8x8x1xf32> to vector<8x8x8xf32>
    %83 = arith.subf %79, %82 : vector<8x8x8xf32>
    %84 = math.exp %83 : vector<8x8x8xf32>
    %cst_43 = arith.constant dense<0.000000e+00> : vector<8x8xf32>
    %85 = vector.multi_reduction <add>, %84, %cst_43 [2] : vector<8x8x8xf32> to vector<8x8xf32>
    %86 = vector.shape_cast %85 : vector<8x8xf32> to vector<8x8x1xf32>
    %87 = tpu.reciprocal %86 {approx = true} : vector<8x8x1xf32> -> vector<8x8x1xf32>
    %88 = vector.broadcast %87 : vector<8x8x1xf32> to vector<8x8x8xf32>
    %89 = arith.mulf %84, %88 : vector<8x8x8xf32>
    %90 = arith.truncf %89 : vector<8x8x8xf32> to vector<8x8x8xbf16>
    %91 = vector.extract_strided_slice %76 {offsets = [0, 0, 0], sizes = [8, 8, 8], strides = [1, 1, 1]} : vector<8x8x32xbf16> to vector<8x8x8xbf16>
    "tpu.trace_start"() <{level = 10 : i32, message = "nqk,nkd->nqd"}> : () -> ()
    %cst_44 = arith.constant dense<0.000000e+00> : vector<8x8x8xf32>
    %92 = tpu.matmul %90, %91, %cst_44 {dimension_numbers = #tpu.dot_dimension_numbers<[2], [1], [1], [2], [0, 0, 0, 1, 1, 2], [0], [0]>} : vector<8x8x8xbf16>, vector<8x8x8xbf16>, vector<8x8x8xf32> -> vector<8x8x8xf32>
    "tpu.trace_stop"() : () -> ()
    %93 = vector.extract_strided_slice %72 {offsets = [0, 0, 8], sizes = [8, 8, 8], strides = [1, 1, 1]} : vector<8x8x32xbf16> to vector<8x8x8xbf16>
    %94 = vector.extract_strided_slice %74 {offsets = [0, 0, 8], sizes = [8, 8, 8], strides = [1, 1, 1]} : vector<8x8x32xbf16> to vector<8x8x8xbf16>
    "tpu.trace_start"() <{level = 10 : i32, message = "nqd,nkd->nqk"}> : () -> ()
    %cst_45 = arith.constant dense<0.000000e+00> : vector<8x8x8xf32>
    %95 = tpu.matmul %93, %94, %cst_45 {dimension_numbers = #tpu.dot_dimension_numbers<[2], [2], [1], [1], [0, 0, 0, 1, 1, 1], [0], [0]>} : vector<8x8x8xbf16>, vector<8x8x8xbf16>, vector<8x8x8xf32> -> vector<8x8x8xf32>
    "tpu.trace_stop"() : () -> ()
    %cst_46 = arith.constant dense<0xFF800000> : vector<8x8xf32>
    %96 = vector.multi_reduction <maximumf>, %95, %cst_46 [2] : vector<8x8x8xf32> to vector<8x8xf32>
    %97 = vector.shape_cast %96 : vector<8x8xf32> to vector<8x8x1xf32>
    %98 = vector.broadcast %97 : vector<8x8x1xf32> to vector<8x8x8xf32>
    %99 = arith.subf %95, %98 : vector<8x8x8xf32>
    %100 = math.exp %99 : vector<8x8x8xf32>
    %cst_47 = arith.constant dense<0.000000e+00> : vector<8x8xf32>
    %101 = vector.multi_reduction <add>, %100, %cst_47 [2] : vector<8x8x8xf32> to vector<8x8xf32>
    %102 = vector.shape_cast %101 : vector<8x8xf32> to vector<8x8x1xf32>
    %103 = tpu.reciprocal %102 {approx = true} : vector<8x8x1xf32> -> vector<8x8x1xf32>
    %104 = vector.broadcast %103 : vector<8x8x1xf32> to vector<8x8x8xf32>
    %105 = arith.mulf %100, %104 : vector<8x8x8xf32>
    %106 = arith.truncf %105 : vector<8x8x8xf32> to vector<8x8x8xbf16>
    %107 = vector.extract_strided_slice %76 {offsets = [0, 0, 8], sizes = [8, 8, 8], strides = [1, 1, 1]} : vector<8x8x32xbf16> to vector<8x8x8xbf16>
    "tpu.trace_start"() <{level = 10 : i32, message = "nqk,nkd->nqd"}> : () -> ()
    %cst_48 = arith.constant dense<0.000000e+00> : vector<8x8x8xf32>
    %108 = tpu.matmul %106, %107, %cst_48 {dimension_numbers = #tpu.dot_dimension_numbers<[2], [1], [1], [2], [0, 0, 0, 1, 1, 2], [0], [0]>} : vector<8x8x8xbf16>, vector<8x8x8xbf16>, vector<8x8x8xf32> -> vector<8x8x8xf32>
    "tpu.trace_stop"() : () -> ()
    %109 = vector.extract_strided_slice %72 {offsets = [0, 0, 16], sizes = [8, 8, 8], strides = [1, 1, 1]} : vector<8x8x32xbf16> to vector<8x8x8xbf16>
    %110 = vector.extract_strided_slice %74 {offsets = [0, 0, 16], sizes = [8, 8, 8], strides = [1, 1, 1]} : vector<8x8x32xbf16> to vector<8x8x8xbf16>
    "tpu.trace_start"() <{level = 10 : i32, message = "nqd,nkd->nqk"}> : () -> ()
    %cst_49 = arith.constant dense<0.000000e+00> : vector<8x8x8xf32>
    %111 = tpu.matmul %109, %110, %cst_49 {dimension_numbers = #tpu.dot_dimension_numbers<[2], [2], [1], [1], [0, 0, 0, 1, 1, 1], [0], [0]>} : vector<8x8x8xbf16>, vector<8x8x8xbf16>, vector<8x8x8xf32> -> vector<8x8x8xf32>
    "tpu.trace_stop"() : () -> ()
    %cst_50 = arith.constant dense<0xFF800000> : vector<8x8xf32>
    %112 = vector.multi_reduction <maximumf>, %111, %cst_50 [2] : vector<8x8x8xf32> to vector<8x8xf32>
    %113 = vector.shape_cast %112 : vector<8x8xf32> to vector<8x8x1xf32>
    %114 = vector.broadcast %113 : vector<8x8x1xf32> to vector<8x8x8xf32>
    %115 = arith.subf %111, %114 : vector<8x8x8xf32>
    %116 = math.exp %115 : vector<8x8x8xf32>
    %cst_51 = arith.constant dense<0.000000e+00> : vector<8x8xf32>
    %117 = vector.multi_reduction <add>, %116, %cst_51 [2] : vector<8x8x8xf32> to vector<8x8xf32>
    %118 = vector.shape_cast %117 : vector<8x8xf32> to vector<8x8x1xf32>
    %119 = tpu.reciprocal %118 {approx = true} : vector<8x8x1xf32> -> vector<8x8x1xf32>
    %120 = vector.broadcast %119 : vector<8x8x1xf32> to vector<8x8x8xf32>
    %121 = arith.mulf %116, %120 : vector<8x8x8xf32>
    %122 = arith.truncf %121 : vector<8x8x8xf32> to vector<8x8x8xbf16>
    %123 = vector.extract_strided_slice %76 {offsets = [0, 0, 16], sizes = [8, 8, 8], strides = [1, 1, 1]} : vector<8x8x32xbf16> to vector<8x8x8xbf16>
    "tpu.trace_start"() <{level = 10 : i32, message = "nqk,nkd->nqd"}> : () -> ()
    %cst_52 = arith.constant dense<0.000000e+00> : vector<8x8x8xf32>
    %124 = tpu.matmul %122, %123, %cst_52 {dimension_numbers = #tpu.dot_dimension_numbers<[2], [1], [1], [2], [0, 0, 0, 1, 1, 2], [0], [0]>} : vector<8x8x8xbf16>, vector<8x8x8xbf16>, vector<8x8x8xf32> -> vector<8x8x8xf32>
    "tpu.trace_stop"() : () -> ()
    %125 = vector.extract_strided_slice %72 {offsets = [0, 0, 24], sizes = [8, 8, 8], strides = [1, 1, 1]} : vector<8x8x32xbf16> to vector<8x8x8xbf16>
    %126 = vector.extract_strided_slice %74 {offsets = [0, 0, 24], sizes = [8, 8, 8], strides = [1, 1, 1]} : vector<8x8x32xbf16> to vector<8x8x8xbf16>
    "tpu.trace_start"() <{level = 10 : i32, message = "nqd,nkd->nqk"}> : () -> ()
    %cst_53 = arith.constant dense<0.000000e+00> : vector<8x8x8xf32>
    %127 = tpu.matmul %125, %126, %cst_53 {dimension_numbers = #tpu.dot_dimension_numbers<[2], [2], [1], [1], [0, 0, 0, 1, 1, 1], [0], [0]>} : vector<8x8x8xbf16>, vector<8x8x8xbf16>, vector<8x8x8xf32> -> vector<8x8x8xf32>
    "tpu.trace_stop"() : () -> ()
    %cst_54 = arith.constant dense<0xFF800000> : vector<8x8xf32>
    %128 = vector.multi_reduction <maximumf>, %127, %cst_54 [2] : vector<8x8x8xf32> to vector<8x8xf32>
    %129 = vector.shape_cast %128 : vector<8x8xf32> to vector<8x8x1xf32>
    %130 = vector.broadcast %129 : vector<8x8x1xf32> to vector<8x8x8xf32>
    %131 = arith.subf %127, %130 : vector<8x8x8xf32>
    %132 = math.exp %131 : vector<8x8x8xf32>
    %cst_55 = arith.constant dense<0.000000e+00> : vector<8x8xf32>
    %133 = vector.multi_reduction <add>, %132, %cst_55 [2] : vector<8x8x8xf32> to vector<8x8xf32>
    %134 = vector.shape_cast %133 : vector<8x8xf32> to vector<8x8x1xf32>
    %135 = tpu.reciprocal %134 {approx = true} : vector<8x8x1xf32> -> vector<8x8x1xf32>
    %136 = vector.broadcast %135 : vector<8x8x1xf32> to vector<8x8x8xf32>
    %137 = arith.mulf %132, %136 : vector<8x8x8xf32>
    %138 = arith.truncf %137 : vector<8x8x8xf32> to vector<8x8x8xbf16>
    %139 = vector.extract_strided_slice %76 {offsets = [0, 0, 24], sizes = [8, 8, 8], strides = [1, 1, 1]} : vector<8x8x32xbf16> to vector<8x8x8xbf16>
    "tpu.trace_start"() <{level = 10 : i32, message = "nqk,nkd->nqd"}> : () -> ()
    %cst_56 = arith.constant dense<0.000000e+00> : vector<8x8x8xf32>
    %140 = tpu.matmul %138, %139, %cst_56 {dimension_numbers = #tpu.dot_dimension_numbers<[2], [1], [1], [2], [0, 0, 0, 1, 1, 2], [0], [0]>} : vector<8x8x8xbf16>, vector<8x8x8xbf16>, vector<8x8x8xf32> -> vector<8x8x8xf32>
    "tpu.trace_stop"() : () -> ()
    %141 = tpu.concatenate %92, %108, %124, %140 in 2 : vector<8x8x8xf32>, vector<8x8x8xf32>, vector<8x8x8xf32>, vector<8x8x8xf32> -> vector<8x8x32xf32>
    %142 = vector.shape_cast %141 : vector<8x8x32xf32> to vector<64x32xf32>
    %143 = arith.truncf %142 : vector<64x32xf32> to vector<64x32xbf16>
    %cst_57 = arith.constant dense<0.000000e+00> : vector<64x32xf32>
    %144 = tpu.matmul %143, %9, %cst_57 {dimension_numbers = #tpu.dot_dimension_numbers<[1], [0], [0], [1], [0, 0, 1, 1], [], []>} : vector<64x32xbf16>, vector<32x32xbf16>, vector<64x32xf32> -> vector<64x32xf32>
    %145 = vector.broadcast %13 : vector<1x32xf32> to vector<64x32xf32>
    %146 = arith.addf %144, %145 : vector<64x32xf32>
    %147 = vector.shape_cast %146 : vector<64x32xf32> to vector<8x8x32xf32>
    %148 = arith.addf %1, %147 : vector<8x8x32xf32>
    %c0_58 = arith.constant 0 : index
    %c0_59 = arith.constant 0 : index
    %c0_60 = arith.constant 0 : index
    %149 = vector.load %arg16[%c0_58, %c0_59, %c0_60] : memref<8x8x32xf32, #tpu.memory_space<vmem>>, vector<8x8x32xf32>
    tpu.vector_store %arg16[%c0_58, %c0_59, %c0_60], %148 {strides = array<i32>} : memref<8x8x32xf32, #tpu.memory_space<vmem>>, vector<8x8x32xf32>,
    %cst_61 = arith.constant dense<0.000000e+00> : vector<8x8xf32>
    %150 = vector.multi_reduction <add>, %148, %cst_61 [2] : vector<8x8x32xf32> to vector<8x8xf32>
    %151 = vector.shape_cast %150 : vector<8x8xf32> to vector<8x8x1xf32>
    %cst_62 = arith.constant 3.200000e+01 : f32
    %152 = vector.broadcast %cst_62 : f32 to vector<8x8x1xf32>
    %153 = arith.divf %151, %152 : vector<8x8x1xf32>
    %154 = vector.broadcast %153 : vector<8x8x1xf32> to vector<8x8x32xf32>
    %155 = arith.subf %148, %154 : vector<8x8x32xf32>
    %156 = arith.mulf %155, %155 : vector<8x8x32xf32>
    %cst_63 = arith.constant dense<0.000000e+00> : vector<8x8xf32>
    %157 = vector.multi_reduction <add>, %156, %cst_63 [2] : vector<8x8x32xf32> to vector<8x8xf32>
    %158 = vector.shape_cast %157 : vector<8x8xf32> to vector<8x8x1xf32>
    %cst_64 = arith.constant 3.200000e+01 : f32
    %159 = vector.broadcast %cst_64 : f32 to vector<8x8x1xf32>
    %160 = arith.divf %158, %159 : vector<8x8x1xf32>
    %cst_65 = arith.constant 9.99999974E-6 : f32
    %161 = vector.broadcast %cst_65 : f32 to vector<8x8x1xf32>
    %162 = arith.addf %160, %161 : vector<8x8x1xf32>
    %163 = math.rsqrt %162 : vector<8x8x1xf32>
    %164 = vector.broadcast %163 : vector<8x8x1xf32> to vector<8x8x32xf32>
    %165 = arith.mulf %155, %164 : vector<8x8x32xf32>
    %166 = vector.shape_cast %4 : vector<1x32xf32> to vector<1x1x32xf32>
    %167 = vector.broadcast %166 : vector<1x1x32xf32> to vector<8x8x32xf32>
    %168 = arith.mulf %165, %167 : vector<8x8x32xf32>
    %169 = vector.shape_cast %5 : vector<1x32xf32> to vector<1x1x32xf32>
    %170 = vector.broadcast %169 : vector<1x1x32xf32> to vector<8x8x32xf32>
    %171 = arith.addf %168, %170 : vector<8x8x32xf32>
    %172 = arith.truncf %171 : vector<8x8x32xf32> to vector<8x8x32xbf16>
    %173 = vector.shape_cast %58 : vector<8x8x32xbf16> to vector<64x32xbf16>
    %174 = vector.shape_cast %172 : vector<8x8x32xbf16> to vector<64x32xbf16>
    %cst_66 = arith.constant dense<0.000000e+00> : vector<64x32xf32>
    %175 = tpu.matmul %173, %6, %cst_66 {dimension_numbers = #tpu.dot_dimension_numbers<[1], [0], [0], [1], [0, 0, 1, 1], [], []>} : vector<64x32xbf16>, vector<32x32xbf16>, vector<64x32xf32> -> vector<64x32xf32>
    %176 = vector.broadcast %10 : vector<1x32xf32> to vector<64x32xf32>
    %177 = arith.addf %175, %176 : vector<64x32xf32>
    %cst_67 = arith.constant dense<0.000000e+00> : vector<64x32xf32>
    %178 = tpu.matmul %174, %7, %cst_67 {dimension_numbers = #tpu.dot_dimension_numbers<[1], [0], [0], [1], [0, 0, 1, 1], [], []>} : vector<64x32xbf16>, vector<32x32xbf16>, vector<64x32xf32> -> vector<64x32xf32>
    %179 = vector.broadcast %11 : vector<1x32xf32> to vector<64x32xf32>
    %180 = arith.addf %178, %179 : vector<64x32xf32>
    %cst_68 = arith.constant dense<0.000000e+00> : vector<64x32xf32>
    %181 = tpu.matmul %174, %8, %cst_68 {dimension_numbers = #tpu.dot_dimension_numbers<[1], [0], [0], [1], [0, 0, 1, 1], [], []>} : vector<64x32xbf16>, vector<32x32xbf16>, vector<64x32xf32> -> vector<64x32xf32>
    %182 = vector.broadcast %12 : vector<1x32xf32> to vector<64x32xf32>
    %183 = arith.addf %181, %182 : vector<64x32xf32>
    %184 = vector.shape_cast %177 : vector<64x32xf32> to vector<8x8x32xf32>
    %185 = arith.truncf %184 : vector<8x8x32xf32> to vector<8x8x32xbf16>
    %186 = vector.shape_cast %180 : vector<64x32xf32> to vector<8x8x32xf32>
    %187 = arith.truncf %186 : vector<8x8x32xf32> to vector<8x8x32xbf16>
    %188 = vector.shape_cast %183 : vector<64x32xf32> to vector<8x8x32xf32>
    %189 = arith.truncf %188 : vector<8x8x32xf32> to vector<8x8x32xbf16>
    %190 = vector.extract_strided_slice %185 {offsets = [0, 0, 0], sizes = [8, 8, 8], strides = [1, 1, 1]} : vector<8x8x32xbf16> to vector<8x8x8xbf16>
    %191 = vector.extract_strided_slice %187 {offsets = [0, 0, 0], sizes = [8, 8, 8], strides = [1, 1, 1]} : vector<8x8x32xbf16> to vector<8x8x8xbf16>
    "tpu.trace_start"() <{level = 10 : i32, message = "nqd,nkd->nqk"}> : () -> ()
    %cst_69 = arith.constant dense<0.000000e+00> : vector<8x8x8xf32>
    %192 = tpu.matmul %190, %191, %cst_69 {dimension_numbers = #tpu.dot_dimension_numbers<[2], [2], [1], [1], [0, 0, 0, 1, 1, 1], [0], [0]>} : vector<8x8x8xbf16>, vector<8x8x8xbf16>, vector<8x8x8xf32> -> vector<8x8x8xf32>
    "tpu.trace_stop"() : () -> ()
    %cst_70 = arith.constant dense<0xFF800000> : vector<8x8xf32>
    %193 = vector.multi_reduction <maximumf>, %192, %cst_70 [2] : vector<8x8x8xf32> to vector<8x8xf32>
    %194 = vector.shape_cast %193 : vector<8x8xf32> to vector<8x8x1xf32>
    %195 = vector.broadcast %194 : vector<8x8x1xf32> to vector<8x8x8xf32>
    %196 = arith.subf %192, %195 : vector<8x8x8xf32>
    %197 = math.exp %196 : vector<8x8x8xf32>
    %cst_71 = arith.constant dense<0.000000e+00> : vector<8x8xf32>
    %198 = vector.multi_reduction <add>, %197, %cst_71 [2] : vector<8x8x8xf32> to vector<8x8xf32>
    %199 = vector.shape_cast %198 : vector<8x8xf32> to vector<8x8x1xf32>
    %200 = tpu.reciprocal %199 {approx = true} : vector<8x8x1xf32> -> vector<8x8x1xf32>
    %201 = vector.broadcast %200 : vector<8x8x1xf32> to vector<8x8x8xf32>
    %202 = arith.mulf %197, %201 : vector<8x8x8xf32>
    %203 = arith.truncf %202 : vector<8x8x8xf32> to vector<8x8x8xbf16>
    %204 = vector.extract_strided_slice %189 {offsets = [0, 0, 0], sizes = [8, 8, 8], strides = [1, 1, 1]} : vector<8x8x32xbf16> to vector<8x8x8xbf16>
    "tpu.trace_start"() <{level = 10 : i32, message = "nqk,nkd->nqd"}> : () -> ()
    %cst_72 = arith.constant dense<0.000000e+00> : vector<8x8x8xf32>
    %205 = tpu.matmul %203, %204, %cst_72 {dimension_numbers = #tpu.dot_dimension_numbers<[2], [1], [1], [2], [0, 0, 0, 1, 1, 2], [0], [0]>} : vector<8x8x8xbf16>, vector<8x8x8xbf16>, vector<8x8x8xf32> -> vector<8x8x8xf32>
    "tpu.trace_stop"() : () -> ()
    %206 = vector.extract_strided_slice %185 {offsets = [0, 0, 8], sizes = [8, 8, 8], strides = [1, 1, 1]} : vector<8x8x32xbf16> to vector<8x8x8xbf16>
    %207 = vector.extract_strided_slice %187 {offsets = [0, 0, 8], sizes = [8, 8, 8], strides = [1, 1, 1]} : vector<8x8x32xbf16> to vector<8x8x8xbf16>
    "tpu.trace_start"() <{level = 10 : i32, message = "nqd,nkd->nqk"}> : () -> ()
    %cst_73 = arith.constant dense<0.000000e+00> : vector<8x8x8xf32>
    %208 = tpu.matmul %206, %207, %cst_73 {dimension_numbers = #tpu.dot_dimension_numbers<[2], [2], [1], [1], [0, 0, 0, 1, 1, 1], [0], [0]>} : vector<8x8x8xbf16>, vector<8x8x8xbf16>, vector<8x8x8xf32> -> vector<8x8x8xf32>
    "tpu.trace_stop"() : () -> ()
    %209 = arith.addf %192, %208 : vector<8x8x8xf32>
    %cst_74 = arith.constant dense<0xFF800000> : vector<8x8xf32>
    %210 = vector.multi_reduction <maximumf>, %208, %cst_74 [2] : vector<8x8x8xf32> to vector<8x8xf32>
    %211 = vector.shape_cast %210 : vector<8x8xf32> to vector<8x8x1xf32>
    %212 = vector.broadcast %211 : vector<8x8x1xf32> to vector<8x8x8xf32>
    %213 = arith.subf %208, %212 : vector<8x8x8xf32>
    %214 = math.exp %213 : vector<8x8x8xf32>
    %cst_75 = arith.constant dense<0.000000e+00> : vector<8x8xf32>
    %215 = vector.multi_reduction <add>, %214, %cst_75 [2] : vector<8x8x8xf32> to vector<8x8xf32>
    %216 = vector.shape_cast %215 : vector<8x8xf32> to vector<8x8x1xf32>
    %217 = tpu.reciprocal %216 {approx = true} : vector<8x8x1xf32> -> vector<8x8x1xf32>
    %218 = vector.broadcast %217 : vector<8x8x1xf32> to vector<8x8x8xf32>
    %219 = arith.mulf %214, %218 : vector<8x8x8xf32>
    %220 = arith.truncf %219 : vector<8x8x8xf32> to vector<8x8x8xbf16>
    %221 = vector.extract_strided_slice %189 {offsets = [0, 0, 8], sizes = [8, 8, 8], strides = [1, 1, 1]} : vector<8x8x32xbf16> to vector<8x8x8xbf16>
    "tpu.trace_start"() <{level = 10 : i32, message = "nqk,nkd->nqd"}> : () -> ()
    %cst_76 = arith.constant dense<0.000000e+00> : vector<8x8x8xf32>
    %222 = tpu.matmul %220, %221, %cst_76 {dimension_numbers = #tpu.dot_dimension_numbers<[2], [1], [1], [2], [0, 0, 0, 1, 1, 2], [0], [0]>} : vector<8x8x8xbf16>, vector<8x8x8xbf16>, vector<8x8x8xf32> -> vector<8x8x8xf32>
    "tpu.trace_stop"() : () -> ()
    %223 = vector.extract_strided_slice %185 {offsets = [0, 0, 16], sizes = [8, 8, 8], strides = [1, 1, 1]} : vector<8x8x32xbf16> to vector<8x8x8xbf16>
    %224 = vector.extract_strided_slice %187 {offsets = [0, 0, 16], sizes = [8, 8, 8], strides = [1, 1, 1]} : vector<8x8x32xbf16> to vector<8x8x8xbf16>
    "tpu.trace_start"() <{level = 10 : i32, message = "nqd,nkd->nqk"}> : () -> ()
    %cst_77 = arith.constant dense<0.000000e+00> : vector<8x8x8xf32>
    %225 = tpu.matmul %223, %224, %cst_77 {dimension_numbers = #tpu.dot_dimension_numbers<[2], [2], [1], [1], [0, 0, 0, 1, 1, 1], [0], [0]>} : vector<8x8x8xbf16>, vector<8x8x8xbf16>, vector<8x8x8xf32> -> vector<8x8x8xf32>
    "tpu.trace_stop"() : () -> ()
    %226 = arith.addf %209, %225 : vector<8x8x8xf32>
    %cst_78 = arith.constant dense<0xFF800000> : vector<8x8xf32>
    %227 = vector.multi_reduction <maximumf>, %225, %cst_78 [2] : vector<8x8x8xf32> to vector<8x8xf32>
    %228 = vector.shape_cast %227 : vector<8x8xf32> to vector<8x8x1xf32>
    %229 = vector.broadcast %228 : vector<8x8x1xf32> to vector<8x8x8xf32>
    %230 = arith.subf %225, %229 : vector<8x8x8xf32>
    %231 = math.exp %230 : vector<8x8x8xf32>
    %cst_79 = arith.constant dense<0.000000e+00> : vector<8x8xf32>
    %232 = vector.multi_reduction <add>, %231, %cst_79 [2] : vector<8x8x8xf32> to vector<8x8xf32>
    %233 = vector.shape_cast %232 : vector<8x8xf32> to vector<8x8x1xf32>
    %234 = tpu.reciprocal %233 {approx = true} : vector<8x8x1xf32> -> vector<8x8x1xf32>
    %235 = vector.broadcast %234 : vector<8x8x1xf32> to vector<8x8x8xf32>
    %236 = arith.mulf %231, %235 : vector<8x8x8xf32>
    %237 = arith.truncf %236 : vector<8x8x8xf32> to vector<8x8x8xbf16>
    %238 = vector.extract_strided_slice %189 {offsets = [0, 0, 16], sizes = [8, 8, 8], strides = [1, 1, 1]} : vector<8x8x32xbf16> to vector<8x8x8xbf16>
    "tpu.trace_start"() <{level = 10 : i32, message = "nqk,nkd->nqd"}> : () -> ()
    %cst_80 = arith.constant dense<0.000000e+00> : vector<8x8x8xf32>
    %239 = tpu.matmul %237, %238, %cst_80 {dimension_numbers = #tpu.dot_dimension_numbers<[2], [1], [1], [2], [0, 0, 0, 1, 1, 2], [0], [0]>} : vector<8x8x8xbf16>, vector<8x8x8xbf16>, vector<8x8x8xf32> -> vector<8x8x8xf32>
    "tpu.trace_stop"() : () -> ()
    %240 = vector.extract_strided_slice %185 {offsets = [0, 0, 24], sizes = [8, 8, 8], strides = [1, 1, 1]} : vector<8x8x32xbf16> to vector<8x8x8xbf16>
    %241 = vector.extract_strided_slice %187 {offsets = [0, 0, 24], sizes = [8, 8, 8], strides = [1, 1, 1]} : vector<8x8x32xbf16> to vector<8x8x8xbf16>
    "tpu.trace_start"() <{level = 10 : i32, message = "nqd,nkd->nqk"}> : () -> ()
    %cst_81 = arith.constant dense<0.000000e+00> : vector<8x8x8xf32>
    %242 = tpu.matmul %240, %241, %cst_81 {dimension_numbers = #tpu.dot_dimension_numbers<[2], [2], [1], [1], [0, 0, 0, 1, 1, 1], [0], [0]>} : vector<8x8x8xbf16>, vector<8x8x8xbf16>, vector<8x8x8xf32> -> vector<8x8x8xf32>
    "tpu.trace_stop"() : () -> ()
    %243 = arith.addf %226, %242 : vector<8x8x8xf32>
    %cst_82 = arith.constant dense<0xFF800000> : vector<8x8xf32>
    %244 = vector.multi_reduction <maximumf>, %242, %cst_82 [2] : vector<8x8x8xf32> to vector<8x8xf32>
    %245 = vector.shape_cast %244 : vector<8x8xf32> to vector<8x8x1xf32>
    %246 = vector.broadcast %245 : vector<8x8x1xf32> to vector<8x8x8xf32>
    %247 = arith.subf %242, %246 : vector<8x8x8xf32>
    %248 = math.exp %247 : vector<8x8x8xf32>
    %cst_83 = arith.constant dense<0.000000e+00> : vector<8x8xf32>
    %249 = vector.multi_reduction <add>, %248, %cst_83 [2] : vector<8x8x8xf32> to vector<8x8xf32>
    %250 = vector.shape_cast %249 : vector<8x8xf32> to vector<8x8x1xf32>
    %251 = tpu.reciprocal %250 {approx = true} : vector<8x8x1xf32> -> vector<8x8x1xf32>
    %252 = vector.broadcast %251 : vector<8x8x1xf32> to vector<8x8x8xf32>
    %253 = arith.mulf %248, %252 : vector<8x8x8xf32>
    %254 = arith.truncf %253 : vector<8x8x8xf32> to vector<8x8x8xbf16>
    %255 = vector.extract_strided_slice %189 {offsets = [0, 0, 24], sizes = [8, 8, 8], strides = [1, 1, 1]} : vector<8x8x32xbf16> to vector<8x8x8xbf16>
    "tpu.trace_start"() <{level = 10 : i32, message = "nqk,nkd->nqd"}> : () -> ()
    %cst_84 = arith.constant dense<0.000000e+00> : vector<8x8x8xf32>
    %256 = tpu.matmul %254, %255, %cst_84 {dimension_numbers = #tpu.dot_dimension_numbers<[2], [1], [1], [2], [0, 0, 0, 1, 1, 2], [0], [0]>} : vector<8x8x8xbf16>, vector<8x8x8xbf16>, vector<8x8x8xf32> -> vector<8x8x8xf32>
    "tpu.trace_stop"() : () -> ()
    %257 = tpu.concatenate %205, %222, %239, %256 in 2 : vector<8x8x8xf32>, vector<8x8x8xf32>, vector<8x8x8xf32>, vector<8x8x8xf32> -> vector<8x8x32xf32>
    %258 = vector.shape_cast %257 : vector<8x8x32xf32> to vector<64x32xf32>
    %259 = arith.truncf %258 : vector<64x32xf32> to vector<64x32xbf16>
    %cst_85 = arith.constant dense<0.000000e+00> : vector<64x32xf32>
    %260 = tpu.matmul %259, %9, %cst_85 {dimension_numbers = #tpu.dot_dimension_numbers<[1], [0], [0], [1], [0, 0, 1, 1], [], []>} : vector<64x32xbf16>, vector<32x32xbf16>, vector<64x32xf32> -> vector<64x32xf32>
    %261 = vector.broadcast %13 : vector<1x32xf32> to vector<64x32xf32>
    %262 = arith.addf %260, %261 : vector<64x32xf32>
    %263 = vector.shape_cast %262 : vector<64x32xf32> to vector<8x8x32xf32>
    %264 = arith.addf %0, %263 : vector<8x8x32xf32>
    %c0_86 = arith.constant 0 : index
    %c0_87 = arith.constant 0 : index
    %c0_88 = arith.constant 0 : index
    %265 = vector.load %arg15[%c0_86, %c0_87, %c0_88] : memref<8x8x32xf32, #tpu.memory_space<vmem>>, vector<8x8x32xf32>
    tpu.vector_store %arg15[%c0_86, %c0_87, %c0_88], %264 {strides = array<i32>} : memref<8x8x32xf32, #tpu.memory_space<vmem>>, vector<8x8x32xf32>,
    %c0_89 = arith.constant 0 : index
    %c0_90 = arith.constant 0 : index
    %c0_91 = arith.constant 0 : index
    %266 = vector.load %arg17[%c0_89, %c0_90, %c0_91] : memref<8x8x8xf32, #tpu.memory_space<vmem>>, vector<8x8x8xf32>
    tpu.vector_store %arg17[%c0_89, %c0_90, %c0_91], %243 {strides = array<i32>} : memref<8x8x8xf32, #tpu.memory_space<vmem>>, vector<8x8x8xf32>,
    return
  }
  func.func @transform_0(%arg0: i32) -> (i32, i32, i32) {
    %c0_i32 = arith.constant 0 : i32
    %c0_i32_0 = arith.constant 0 : i32
    %c0_i32_1 = arith.constant 0 : i32
    return %arg0, %c0_i32, %c0_i32_0 : i32, i32, i32
  }
  func.func @transform_1(%arg0: i32) -> (i32, i32, i32) {
    %c0_i32 = arith.constant 0 : i32
    %c0_i32_0 = arith.constant 0 : i32
    %c0_i32_1 = arith.constant 0 : i32
    return %arg0, %c0_i32, %c0_i32_0 : i32, i32, i32
  }
  func.func @transform_2(%arg0: i32) -> (i32, i32) {
    %c0_i32 = arith.constant 0 : i32
    %c0_i32_0 = arith.constant 0 : i32
    %c0_i32_1 = arith.constant 0 : i32
    return %c0_i32, %c0_i32_0 : i32, i32
  }
  func.func @transform_3(%arg0: i32) -> (i32, i32) {
    %c0_i32 = arith.constant 0 : i32
    %c0_i32_0 = arith.constant 0 : i32
    %c0_i32_1 = arith.constant 0 : i32
    return %c0_i32, %c0_i32_0 : i32, i32
  }
  func.func @transform_4(%arg0: i32) -> (i32, i32) {
    %c0_i32 = arith.constant 0 : i32
    %c0_i32_0 = arith.constant 0 : i32
    %c0_i32_1 = arith.constant 0 : i32
    return %c0_i32, %c0_i32_0 : i32, i32
  }
  func.func @transform_5(%arg0: i32) -> (i32, i32) {
    %c0_i32 = arith.constant 0 : i32
    %c0_i32_0 = arith.constant 0 : i32
    %c0_i32_1 = arith.constant 0 : i32
    return %c0_i32, %c0_i32_0 : i32, i32
  }
  func.func @transform_6(%arg0: i32) -> (i32, i32) {
    %c0_i32 = arith.constant 0 : i32
    %c0_i32_0 = arith.constant 0 : i32
    %c0_i32_1 = arith.constant 0 : i32
    return %c0_i32, %c0_i32_0 : i32, i32
  }
  func.func @transform_7(%arg0: i32) -> (i32, i32) {
    %c0_i32 = arith.constant 0 : i32
    %c0_i32_0 = arith.constant 0 : i32
    %c0_i32_1 = arith.constant 0 : i32
    return %c0_i32, %c0_i32_0 : i32, i32
  }
  func.func @transform_8(%arg0: i32) -> (i32, i32) {
    %c0_i32 = arith.constant 0 : i32
    %c0_i32_0 = arith.constant 0 : i32
    %c0_i32_1 = arith.constant 0 : i32
    return %c0_i32, %c0_i32_0 : i32, i32
  }
  func.func @transform_9(%arg0: i32) -> (i32, i32) {
    %c0_i32 = arith.constant 0 : i32
    %c0_i32_0 = arith.constant 0 : i32
    %c0_i32_1 = arith.constant 0 : i32
    return %c0_i32, %c0_i32_0 : i32, i32
  }
  func.func @transform_10(%arg0: i32) -> (i32, i32) {
    %c0_i32 = arith.constant 0 : i32
    %c0_i32_0 = arith.constant 0 : i32
    %c0_i32_1 = arith.constant 0 : i32
    return %c0_i32, %c0_i32_0 : i32, i32
  }
  func.func @transform_11(%arg0: i32) -> (i32, i32) {
    %c0_i32 = arith.constant 0 : i32
    %c0_i32_0 = arith.constant 0 : i32
    %c0_i32_1 = arith.constant 0 : i32
    return %c0_i32, %c0_i32_0 : i32, i32
  }
  func.func @transform_12(%arg0: i32) -> (i32, i32) {
    %c0_i32 = arith.constant 0 : i32
    %c0_i32_0 = arith.constant 0 : i32
    %c0_i32_1 = arith.constant 0 : i32
    return %c0_i32, %c0_i32_0 : i32, i32
  }
  func.func @transform_13(%arg0: i32) -> (i32, i32) {
    %c0_i32 = arith.constant 0 : i32
    %c0_i32_0 = arith.constant 0 : i32
    %c0_i32_1 = arith.constant 0 : i32
    return %c0_i32, %c0_i32_0 : i32, i32
  }
  func.func @transform_14(%arg0: i32) -> (i32, i32, i32) {
    %c0_i32 = arith.constant 0 : i32
    %c0_i32_0 = arith.constant 0 : i32
    %c0_i32_1 = arith.constant 0 : i32
    return %arg0, %c0_i32, %c0_i32_0 : i32, i32, i32
  }
  func.func @transform_15(%arg0: i32) -> (i32, i32, i32) {
    %c0_i32 = arith.constant 0 : i32
    %c0_i32_0 = arith.constant 0 : i32
    %c0_i32_1 = arith.constant 0 : i32
    return %arg0, %c0_i32, %c0_i32_0 : i32, i32, i32
  }
  func.func @transform_16(%arg0: i32) -> (i32, i32, i32) {
    %c0_i32 = arith.constant 0 : i32
    %c0_i32_0 = arith.constant 0 : i32
    %c0_i32_1 = arith.constant 0 : i32
    return %arg0, %c0_i32, %c0_i32_0 : i32, i32, i32
  }
}

</mosaic_0001>

<bundles_post_ra>
// kernel: cross_attention_forward.1
= control target key start
LH: loop header
LB: loop body
LE: loop exit
PB: predicated region body
PF: predicated region fallthrough
CT: control target
= control target key end

     0   :  { %vm91_vm0 = vcmask 261120   ;;  %vm10422_vm1 = vmmov 0   ;;  %vm698_vm2 = vcmask 64512   ;;  %vm1166_vm3 = vcmask 1043456   ;;  %s10423_s17 = smov 120   ;;  %s10424_s18 = smov 112   ;;  %s13157_s1 = inlined_call_operand.vmem [shape: f32[8,8,32], index: 1, kind: input, shape index: {}]   ;;  %s13158_s0 = inlined_call_operand.vmem [shape: f32[8,8,32], index: 0, kind: input, shape index: {}]   ;;  %s13159_s6 = inlined_call_operand.vmem [shape: bf16[32,32], index: 6, kind: input, shape index: {}]   ;;  %s13160_s7 = inlined_call_operand.vmem [shape: bf16[32,32], index: 7, kind: input, shape index: {}]   ;;  %s13161_s8 = inlined_call_operand.vmem [shape: bf16[32,32], index: 8, kind: input, shape index: {}]   ;;  %s13162_s2 = inlined_call_operand.vmem [shape: f32[1,32], index: 2, kind: input, shape index: {}]   ;;  %s13163_s3 = inlined_call_operand.vmem [shape: f32[1,32], index: 3, kind: input, shape index: {}]   ;;  %s13164_s10 = inlined_call_operand.vmem [shape: f32[1,32], index: 10, kind: input, shape index: {}]   ;;  %s13165_s9 = inlined_call_operand.vmem [shape: f32[1,32], index: 9, kind: input, shape index: {}]   ;;  %s13166_s11 = inlined_call_operand.vmem [shape: f32[1,32], index: 11, kind: input, shape index: {}]   ;;  %s13167_s12 = inlined_call_operand.vmem [shape: bf16[32,32], index: 12, kind: input, shape index: {}]   ;;  %s13168_s13 = inlined_call_operand.vmem [shape: f32[1,32], index: 13, kind: input, shape index: {}]   ;;  %s13169_s15 = inlined_call_operand.vmem [shape: f32[8,8,32], index: 15, kind: output, shape index: {1}]   ;;  %s13170_s4 = inlined_call_operand.vmem [shape: f32[1,32], index: 4, kind: input, shape index: {}]   ;;  %s13171_s5 = inlined_call_operand.vmem [shape: f32[1,32], index: 5, kind: input, shape index: {}]   ;;  %s13172_s16 = inlined_call_operand.vmem [shape: f32[8,8,8], index: 16, kind: output, shape index: {2}]   ;;  %s13173_s14 = inlined_call_operand.vmem [shape: f32[8,8,32], index: 14, kind: output, shape index: {0}]  }
   0x1   :  { %13177 = sst [smem:[#allocation9_spill]] %s13157_s1  ;;  %v51_v8 = vld [vmem:[%s13158_s0] sm:$0xff]  ;;  %v52_v9 = vld [vmem:[%s13158_s0 + $0x8] sm:$0xff]  ;;  %v10541_v12 = vld [vmem:[%s13158_s0 + $0x10] sm:$0xff]  ;;  %s10425_s19 = smov 104   ;;  %vm4300_vm4 = vcmask 130048  }
   0x2   :  { %s13178_s23 = sld [smem:[#allocation9_spill]]  ;;  %v92_v10 = vsel %vm91_vm0, %v51_v8, 0.0  ;;  %v95_v11 = vsel %vm91_vm0, %v52_v9, 0.0  ;;  %v10546_v13 = vld [vmem:[%s13158_s0 + $0x18] sm:$0xff]  ;;  %v98_v14 = vsel %vm91_vm0, %v10541_v12, 0.0  ;;  %v10583_v24 = vld [vmem:[%s13158_s0 + $0x20] sm:$0xff] }
   0x3   :  { %v101_v15 = vsel %vm91_vm0, %v10546_v13, 0.0  ;;  %v10588_v25 = vld [vmem:[%s13158_s0 + $0x28] sm:$0xff]  ;;  %v104_v26 = vsel %vm91_vm0, %v10583_v24, 0.0  ;;  %v10597_v28 = vld [vmem:[%s13158_s0 + $0x30] sm:$0xff]  ;;  %v10602_v29 = vld [vmem:[%s13158_s0 + $0x38] sm:$0xff]  ;;  %s10426_s20 = smov 8  }
   0x4   :  { %v107_v27 = vsel %vm91_vm0, %v10588_v25, 0.0  ;;  %v110_v30 = vsel %vm91_vm0, %v10597_v28, 0.0  ;;  %v113_v31 = vsel %vm91_vm0, %v10602_v29, 0.0  ;;  %s10427_s21 = smov 16   ;;  %s10428_s29 = smov 24   ;;  %vm4309_vm5 = vcmask 195584  }
   0x8   :  { %v63_v0 = vld [vmem:[%s13178_s23 + $0x20] sm:$0xff]  ;;  %v65_v1 = vld [vmem:[%s13178_s23 + $0x30] sm:$0xff]  ;;  %v64_v2 = vld [vmem:[%s13178_s23 + $0x28] sm:$0xff] }
   0x9   :  { %v237_v3 = vsel %vm91_vm0, %v63_v0, 0.0  ;;  %v243_v4 = vsel %vm91_vm0, %v65_v1, 0.0  ;;  %v66_v5 = vld [vmem:[%s13178_s23 + $0x38] sm:$0xff]  ;;  %v240_v6 = vsel %vm91_vm0, %v64_v2, 0.0  ;;  %v10555_v16 = vld [vmem:[%s13178_s23] sm:$0xff]  ;;  %v10560_v17 = vld [vmem:[%s13178_s23 + $0x8] sm:$0xff] }
   0xa   :  { %238 = vadd.xlane.f32.xlu0 %v237_v3  ;;  %244 = vadd.xlane.f32.xlu1 %v243_v4  ;;  %v246_v7 = vsel %vm91_vm0, %v66_v5, 0.0  ;;  %v225_v18 = vsel %vm91_vm0, %v10555_v16, 0.0  ;;  %v228_v19 = vsel %vm91_vm0, %v10560_v17, 0.0  ;;  %v10569_v20 = vld [vmem:[%s13178_s23 + $0x10] sm:$0xff]  ;;  %v10574_v21 = vld [vmem:[%s13178_s23 + $0x18] sm:$0xff] }
   0xb   :  { %v231_v22 = vsel %vm91_vm0, %v10569_v20, 0.0  ;;  %v234_v23 = vsel %vm91_vm0, %v10574_v21, 0.0 }
   0xe   :  { %241 = vadd.xlane.f32.xlu0 %v240_v6  ;;  %247 = vadd.xlane.f32.xlu1 %v246_v7 }
  0x12   :  { %93 = vadd.xlane.f32.xlu0 %v92_v10  ;;  %96 = vadd.xlane.f32.xlu1 %v95_v11 }
  0x16   :  { %99 = vadd.xlane.f32.xlu0 %v98_v14  ;;  %102 = vadd.xlane.f32.xlu1 %v101_v15 }
  0x1a   :  { %226 = vadd.xlane.f32.xlu0 %v225_v18  ;;  %229 = vadd.xlane.f32.xlu1 %v228_v19 }
  0x1e   :  { %232 = vadd.xlane.f32.xlu0 %v231_v22  ;;  %235 = vadd.xlane.f32.xlu1 %v234_v23 }
  0x22   :  { %105 = vadd.xlane.f32.xlu0 %v104_v26  ;;  %108 = vadd.xlane.f32.xlu1 %v107_v27 }
  0x26   :  { %111 = vadd.xlane.f32.xlu0 %v110_v30  ;;  %114 = vadd.xlane.f32.xlu1 %v113_v31 }
  0x97   :  { %v239_v32 = vpop.xlane.xlu0 %238  ;;  %v245_v33 = vpop.xlane.xlu1 %244 }
  0x98   :  { %v253_v34 = vmul.f32 0.03125, %v239_v32  ;;  %v255_v35 = vmul.f32 0.03125, %v245_v33 }
  0x9a   :  { %v10608_v36 = vsub.f32 %v63_v0, %v253_v34  ;;  %v10610_v37 = vsub.f32 %v65_v1, %v255_v35 }
  0x9b   :  { %v242_v38 = vpop.xlane.xlu0 %241  ;;  %v248_v39 = vpop.xlane.xlu1 %247 }
  0x9c   :  { %v254_v40 = vmul.f32 0.03125, %v242_v38  ;;  %v256_v41 = vmul.f32 0.03125, %v248_v39  ;;  %v269_v42 = vmul.f32 %v10608_v36, %v10608_v36  ;;  %v271_v43 = vmul.f32 %v10610_v37, %v10610_v37 }
  0x9e   :  { %v10616_v44 = vsub.f32 %v64_v2, %v254_v40  ;;  %v10618_v45 = vsub.f32 %v66_v5, %v256_v41  ;;  %v285_v46 = vsel %vm91_vm0, %v269_v42, 0.0  ;;  %v291_v49 = vsel %vm91_vm0, %v271_v43, 0.0 }
  0x9f   :  { %286 = vadd.xlane.f32.xlu0 %v285_v46  ;;  %v94_v47 = vpop.xlane.xlu0 %93  ;;  %v97_v48 = vpop.xlane.xlu1 %96 }
  0xa0   :  { %v117_v50 = vmul.f32 0.03125, %v94_v47  ;;  %v270_v51 = vmul.f32 %v10616_v44, %v10616_v44  ;;  %v118_v52 = vmul.f32 0.03125, %v97_v48  ;;  %v272_v53 = vmul.f32 %v10618_v45, %v10618_v45 }
  0xa2   :  { %v10626_v54 = vsub.f32 %v51_v8, %v117_v50  ;;  %v288_v55 = vsel %vm91_vm0, %v270_v51, 0.0  ;;  %v10629_v56 = vsub.f32 %v52_v9, %v118_v52  ;;  %v294_v58 = vsel %vm91_vm0, %v272_v53, 0.0  ;;  %v10082_v53 = vld [vmem:[%s13159_s6 + $0x8] sm:$0xff]  }
  0xa3   :  { %289 = vadd.xlane.f32.xlu1 %v288_v55  ;;  %292 = vadd.xlane.f32.xlu0 %v291_v49  ;;  %v100_v57 = vpop.xlane.xlu0 %99  ;;  %v103_v59 = vpop.xlane.xlu1 %102  ;;  %v10707_v55 = vld [vmem:[%s13160_s7] sm:$0xff]  }
  0xa4   :  { %v119_v60 = vmul.f32 0.03125, %v100_v57  ;;  %v120_v61 = vmul.f32 0.03125, %v103_v59  ;;  %v133_v62 = vmul.f32 %v10626_v54, %v10626_v54  ;;  %v134_v63 = vmul.f32 %v10629_v56, %v10629_v56  ;;  %v10713_v57 = vld [vmem:[%s13161_s8] sm:$0xff]  }
  0xa6   :  { %v10637_v0 = vsub.f32 %v10541_v12, %v119_v60  ;;  %v10640_v1 = vsub.f32 %v10546_v13, %v120_v61  ;;  %v141_v2 = vsel %vm91_vm0, %v133_v62, 0.0  ;;  %v144_v4 = vsel %vm91_vm0, %v134_v63, 0.0 }
  0xa7   :  { %295 = vadd.xlane.f32.xlu1 %v294_v58  ;;  %142 = vadd.xlane.f32.xlu0 %v141_v2  ;;  %v227_v3 = vpop.xlane.xlu0 %226  ;;  %v230_v5 = vpop.xlane.xlu1 %229 }
  0xa8   :  { %v249_v6 = vmul.f32 0.03125, %v227_v3  ;;  %v250_v7 = vmul.f32 0.03125, %v230_v5  ;;  %v135_v8 = vmul.f32 %v10637_v0, %v10637_v0  ;;  %v136_v9 = vmul.f32 %v10640_v1, %v10640_v1 }
  0xaa   :  { %v10649_v10 = vsub.f32 %v10555_v16, %v249_v6  ;;  %v10652_v11 = vsub.f32 %v10560_v17, %v250_v7  ;;  %v147_v12 = vsel %vm91_vm0, %v135_v8, 0.0  ;;  %v150_v14 = vsel %vm91_vm0, %v136_v9, 0.0 }
  0xab   :  { %145 = vadd.xlane.f32.xlu1 %v144_v4  ;;  %148 = vadd.xlane.f32.xlu0 %v147_v12  ;;  %v233_v13 = vpop.xlane.xlu0 %232  ;;  %v236_v15 = vpop.xlane.xlu1 %235 }
  0xac   :  { %v251_v18 = vmul.f32 0.03125, %v233_v13  ;;  %v252_v19 = vmul.f32 0.03125, %v236_v15  ;;  %v265_v22 = vmul.f32 %v10649_v10, %v10649_v10  ;;  %v266_v16 = vmul.f32 %v10652_v11, %v10652_v11 }
  0xae   :  { %v10661_v23 = vsub.f32 %v10569_v20, %v251_v18  ;;  %v10664_v17 = vsub.f32 %v10574_v21, %v252_v19  ;;  %v273_v26 = vsel %vm91_vm0, %v265_v22, 0.0  ;;  %v276_v30 = vsel %vm91_vm0, %v266_v16, 0.0 }
  0xaf   :  { %151 = vadd.xlane.f32.xlu1 %v150_v14  ;;  %274 = vadd.xlane.f32.xlu0 %v273_v26  ;;  %v106_v27 = vpop.xlane.xlu0 %105  ;;  %v109_v31 = vpop.xlane.xlu1 %108 }
  0xb0   :  { %v121_v32 = vmul.f32 0.03125, %v106_v27  ;;  %v122_v33 = vmul.f32 0.03125, %v109_v31  ;;  %v267_v34 = vmul.f32 %v10661_v23, %v10661_v23  ;;  %v268_v20 = vmul.f32 %v10664_v17, %v10664_v17  ;;  %v10720_v31 = vld [vmem:[%s13162_s2] ss:$0 sm:$0xff] }
  0xb2   :  { %v10673_v35 = vsub.f32 %v10583_v24, %v121_v32  ;;  %v10676_v21 = vsub.f32 %v10588_v25, %v122_v33  ;;  %v279_v38 = vsel %vm91_vm0, %v267_v34, 0.0  ;;  %v282_v40 = vsel %vm91_vm0, %v268_v20, 0.0 }
  0xb3   :  { %277 = vadd.xlane.f32.xlu1 %v276_v30  ;;  %280 = vadd.xlane.f32.xlu0 %v279_v38  ;;  %v112_v39 = vpop.xlane.xlu0 %111  ;;  %v115_v41 = vpop.xlane.xlu1 %114 }
  0xb4   :  { %v123_v42 = vmul.f32 0.03125, %v112_v39  ;;  %v124_v43 = vmul.f32 0.03125, %v115_v41  ;;  %v137_v46 = vmul.f32 %v10673_v35, %v10673_v35  ;;  %v138_v24 = vmul.f32 %v10676_v21, %v10676_v21 }
  0xb6   :  { %v10685_v47 = vsub.f32 %v10597_v28, %v123_v42  ;;  %v10688_v25 = vsub.f32 %v10602_v29, %v124_v43  ;;  %v153_v48 = vsel %vm91_vm0, %v137_v46, 0.0  ;;  %v156_v49 = vsel %vm91_vm0, %v138_v24, 0.0  ;;  %v10081_v29 = vld [vmem:[%s13159_s6] sm:$0xff]  }
  0xb7   :  { %283 = vadd.xlane.f32.xlu1 %v282_v40  ;;  %154 = vadd.xlane.f32.xlu0 %v153_v48  ;;  %v10727_v24 = vld [vmem:[%s13163_s3] ss:$0 sm:$0xff] }
  0xb8   :  { %v139_v50 = vmul.f32 %v10685_v47, %v10685_v47  ;;  %v140_v51 = vmul.f32 %v10688_v25, %v10688_v25  ;;  %9949 = vmatprep.subr.bf16.mxu1 %v10081_v29  ;;  %9085 = vmatprep.subr.bf16.mxu0 %v10081_v29 }
  0xb9   :  { %9951 = vmatpush3.bf16.msra.mxu1 %v10081_v29  ;;  %9086 = vmatpush3.bf16.msra.mxu0 %v10081_v29 }
  0xba   :  { %v159_v52 = vsel %vm91_vm0, %v139_v50, 0.0  ;;  %v162_v28 = vsel %vm91_vm0, %v140_v51, 0.0  ;;  %9950 = vmatprep.subr.bf16.mxu1 %v10082_v53  ;;  %9087 = vmatprep.subr.bf16.mxu0 %v10082_v53 }
  0xbb   :  { %157 = vadd.xlane.f32.xlu1 %v156_v49  ;;  %160 = vadd.xlane.f32.xlu0 %v159_v52 }
  0xbd   :  { %9952 = vmatpush3.bf16.msra.mxu1 %v10082_v53  ;;  %9088 = vmatpush3.bf16.msra.mxu0 %v10082_v53 }
  0xbe   :  { %9097 = vmatprep.subr.bf16.mxu1 %v10707_v55  ;;  %9109 = vmatprep.subr.bf16.mxu0 %v10713_v57 }
  0xbf   :  { %163 = vadd.xlane.f32.xlu1 %v162_v28 }
 0x12c   :  { %v287_v58 = vpop.xlane.xlu0 %286 }
 0x12d   :  { %v301_v59 = vmul.f32 0.03125, %v287_v58 }
 0x12f   :  { %v309_v60 = vadd.f32 1e-05, %v301_v59 }
 0x130   :  { %v290_v61 = vpop.xlane.xlu1 %289  ;;  %v293_v62 = vpop.xlane.xlu0 %292 }
 0x131   :  { %10089 = vrsqrt.f32 %v309_v60  ;;  %v302_v63 = vmul.f32 0.03125, %v290_v61  ;;  %v303_v2 = vmul.f32 0.03125, %v293_v62 }
 0x133   :  { %v310_v3 = vadd.f32 1e-05, %v302_v63  ;;  %v311_v4 = vadd.f32 1e-05, %v303_v2 }
 0x134   :  { %v296_v5 = vpop.xlane.xlu1 %295  ;;  %v143_v6 = vpop.xlane.xlu0 %142 }
 0x135   :  { %10091 = vrsqrt.f32 %v310_v3  ;;  %v304_v7 = vmul.f32 0.03125, %v296_v5  ;;  %v165_v8 = vmul.f32 0.03125, %v143_v6 }
 0x136   :  { %10093 = vrsqrt.f32 %v311_v4 }
 0x137   :  { %v312_v9 = vadd.f32 1e-05, %v304_v7  ;;  %v173_v12 = vadd.f32 1e-05, %v165_v8 }
 0x138   :  { %v146_v13 = vpop.xlane.xlu1 %145  ;;  %v149_v14 = vpop.xlane.xlu0 %148 }
 0x139   :  { %10095 = vrsqrt.f32 %v312_v9  ;;  %v166_v15 = vmul.f32 0.03125, %v146_v13  ;;  %v167_v18 = vmul.f32 0.03125, %v149_v14 }
 0x13a   :  { %10097 = vrsqrt.f32 %v173_v12 }
 0x13b   :  { %v10090_v19 = vpop.eup %10089  ;;  %v174_v22 = vadd.f32 1e-05, %v166_v15  ;;  %v175_v16 = vadd.f32 1e-05, %v167_v18 }
 0x13c   :  { %v152_v26 = vpop.xlane.xlu1 %151  ;;  %v275_v27 = vpop.xlane.xlu0 %274  ;;  %v325_v30 = vmul.f32 %v10090_v19, %v10608_v36  ;;  %v10084_v19 = vld [vmem:[%s13160_s7 + $0x8] sm:$0xff]  }
 0x13d   :  { %10099 = vrsqrt.f32 %v174_v22  ;;  %v168_v32 = vmul.f32 0.03125, %v152_v26  ;;  %v297_v33 = vmul.f32 0.03125, %v275_v27 }
 0x13e   :  { %10101 = vrsqrt.f32 %v175_v16  ;;  %v333_v43 = vmul.f32 %v10720_v31, %v325_v30 }
 0x13f   :  { %v10092_v34 = vpop.eup %10091  ;;  %v176_v20 = vadd.f32 1e-05, %v168_v32  ;;  %v305_v38 = vadd.f32 1e-05, %v297_v33 }
 0x140   :  { %v10094_v39 = vpop.eup %10093  ;;  %v278_v40 = vpop.xlane.xlu1 %277  ;;  %v326_v42 = vmul.f32 %v10092_v34, %v10616_v44  ;;  %v341_v53 = vadd.f32 %v10727_v24, %v333_v43 }
 0x141   :  { %v281_v41 = vpop.xlane.xlu0 %280  ;;  %10103 = vrsqrt.f32 %v176_v20  ;;  %v298_v36 = vmul.f32 0.03125, %v278_v40  ;;  %v327_v48 = vmul.f32 %v10094_v39, %v10610_v37 }
 0x142   :  { %v299_v46 = vmul.f32 0.03125, %v281_v41  ;;  %10105 = vrsqrt.f32 %v305_v38  ;;  %v334_v49 = vmul.f32 %v10720_v31, %v326_v42 }
 0x143   :  { %v10096_v50 = vpop.eup %10095  ;;  %v306_v51 = vadd.f32 1e-05, %v298_v36  ;;  %v335_v60 = vmul.f32 %v10720_v31, %v327_v48 }
 0x144   :  { %v307_v52 = vadd.f32 1e-05, %v299_v46  ;;  %v10098_v28 = vpop.eup %10097  ;;  %v284_v44 = vpop.xlane.xlu1 %283  ;;  %v342_v58 = vadd.f32 %v10727_v24, %v334_v49  ;;  %v328_v59 = vmul.f32 %v10096_v50, %v10618_v45 }
 0x145   :  { %v155_v29 = vpop.xlane.xlu0 %154  ;;  %10107 = vrsqrt.f32 %v306_v51  ;;  %v300_v61 = vmul.f32 0.03125, %v284_v44  ;;  %v189_v2 = vmul.f32 %v10098_v28, %v10626_v54  ;;  %v343_v45 = vadd.f32 %v10727_v24, %v335_v60 }
 0x146   :  { %v169_v37 = vmul.f32 0.03125, %v155_v29  ;;  %10109 = vrsqrt.f32 %v307_v52  ;;  %v8771_v62 = vpack.c.bf16 %v342_v58, %v341_v53  ;;  %v336_v63 = vmul.f32 %v10720_v31, %v328_v59 }
 0x147   :  { %v10100_v3 = vpop.eup %10099  ;;  %v308_v4 = vadd.f32 1e-05, %v300_v61  ;;  %v203_v13 = vmul.f32 %v10720_v31, %v189_v2  ;;  %v10086_v2 = vld [vmem:[%s13161_s8 + $0x8] sm:$0xff]  }
 0x148   :  { %v177_v5 = vadd.f32 1e-05, %v169_v37  ;;  %v10102_v6 = vpop.eup %10101  ;;  %v158_v7 = vpop.xlane.xlu1 %157  ;;  %9093 = vmatprep.mubr.msk.bf16.mxu1 %vm91_vm0, %v8771_v62  ;;  %v344_v9 = vadd.f32 %v10727_v24, %v336_v63  ;;  %v190_v12 = vmul.f32 %v10100_v3, %v10629_v56 }
 0x149   :  { %v161_v8 = vpop.xlane.xlu0 %160  ;;  %v191_v14 = vmul.f32 %v10102_v6, %v10637_v0  ;;  %10111 = vrsqrt.f32 %v308_v4  ;;  %v170_v54 = vmul.f32 0.03125, %v158_v7  ;;  %v217_v33 = vadd.f32 %v10727_v24, %v203_v13  ;;  %v10825_v13 = vld [vmem:[%s13164_s10] ss:$0 sm:$0xff] }
 0x14a   :  { %v171_v15 = vmul.f32 0.03125, %v161_v8  ;;  %10113 = vrsqrt.f32 %v177_v5  ;;  %v8772_v18 = vpack.c.bf16 %v344_v9, %v343_v45  ;;  %v204_v22 = vmul.f32 %v10720_v31, %v190_v12 }
 0x14b   :  { %v10104_v16 = vpop.eup %10103  ;;  %v178_v26 = vadd.f32 1e-05, %v170_v54  ;;  %v205_v56 = vmul.f32 %v10720_v31, %v191_v14 }
 0x14c   :  { %v179_v27 = vadd.f32 1e-05, %v171_v15  ;;  %v10106_v30 = vpop.eup %10105  ;;  %v192_v32 = vmul.f32 %v10104_v16, %v10640_v1  ;;  %v164_v0 = vpop.xlane.xlu1 %163  ;;  %9094 = vmatmul.mubr.msk.bf16.vlgmr.msra.gmra.mrb[0].mxu1 %vm91_vm0, %v8772_v18  ;;  %v218_v34 = vadd.f32 %v10727_v24, %v204_v22 }
 0x14d   :  { %10115 = vrsqrt.f32 %v178_v26  ;;  %v172_v20 = vmul.f32 0.03125, %v164_v0  ;;  %9098 = vmatpush3.bf16.msra.mxu1 %v10707_v55  ;;  %v321_v38 = vmul.f32 %v10106_v30, %v10649_v10  ;;  %v219_v43 = vadd.f32 %v10727_v24, %v205_v56 }
 0x14e   :  { %v206_v39 = vmul.f32 %v10720_v31, %v192_v32  ;;  %10117 = vrsqrt.f32 %v179_v27  ;;  %9099 = vmatprep.subr.bf16.mxu1 %v10084_v19  ;;  %v10755_v40 = vpack.c.bf16 %v218_v34, %v217_v33  ;;  %v10842_v32 = vld [vmem:[%s13165_s9] ss:$0 sm:$0xff] }
 0x14f   :  { %v10108_v1 = vpop.eup %10107  ;;  %v180_v41 = vadd.f32 1e-05, %v172_v20  ;;  %v329_v10 = vmul.f32 %v10720_v31, %v321_v38 }
 0x150   :  { %v10110_v42 = vpop.eup %10109  ;;  %9101 = vmatprep.mubr.msk.bf16.mxu1 %vm91_vm0, %v10755_v40  ;;  %v220_v36 = vadd.f32 %v10727_v24, %v206_v39  ;;  %v322_v55 = vmul.f32 %v10108_v1, %v10652_v11 }
 0x151   :  { %10119 = vrsqrt.f32 %v180_v41  ;;  %9100 = vmatpush3.bf16.msra.mxu1 %v10084_v19  ;;  %v323_v46 = vmul.f32 %v10110_v42, %v10661_v23  ;;  %v337_v52 = vadd.f32 %v10727_v24, %v329_v10 }
 0x152   :  { %v10764_v48 = vpack.c.bf16 %v220_v36, %v219_v43  ;;  %v330_v49 = vmul.f32 %v10720_v31, %v322_v55 }
 0x153   :  { %v10112_v50 = vpop.eup %10111  ;;  %v331_v44 = vmul.f32 %v10720_v31, %v323_v46 }
 0x154   :  { %v10114_v51 = vpop.eup %10113  ;;  %9102 = vmatmul.mubr.msk.bf16.vlgmr.msra.gmra.mrb[4].mxu1 %vm91_vm0, %v10764_v48  ;;  %v338_v28 = vadd.f32 %v10727_v24, %v330_v49  ;;  %v324_v11 = vmul.f32 %v10112_v50, %v10664_v17 }
 0x155   :  { %v193_v29 = vmul.f32 %v10114_v51, %v10673_v35  ;;  %v339_v60 = vadd.f32 %v10727_v24, %v331_v44 }
 0x156   :  { %v8769_v23 = vpack.c.bf16 %v338_v28, %v337_v52  ;;  %v332_v53 = vmul.f32 %v10720_v31, %v324_v11 }
 0x157   :  { %v10116_v58 = vpop.eup %10115  ;;  %v207_v62 = vmul.f32 %v10720_v31, %v193_v29 }
 0x158   :  { %v10118_v59 = vpop.eup %10117  ;;  %9089 = vmatprep.mubr.msk.bf16.mxu0 %vm91_vm0, %v8769_v23  ;;  %v340_v61 = vadd.f32 %v10727_v24, %v332_v53  ;;  %v194_v37 = vmul.f32 %v10116_v58, %v10676_v21 }
 0x159   :  { %v195_v17 = vmul.f32 %v10118_v59, %v10685_v47  ;;  %v221_v4 = vadd.f32 %v10727_v24, %v207_v62 }
 0x15a   :  { %v8770_v63 = vpack.c.bf16 %v340_v61, %v339_v60  ;;  %v208_v35 = vmul.f32 %v10720_v31, %v194_v37 }
 0x15b   :  { %v10120_v3 = vpop.eup %10119  ;;  %v209_v6 = vmul.f32 %v10720_v31, %v195_v17 }
 0x15c   :  { %9090 = vmatmul.mubr.msk.bf16.vlgmr.msra.gmra.mrb[0].mxu0 %vm91_vm0, %v8770_v63  ;;  %v222_v5 = vadd.f32 %v10727_v24, %v208_v35  ;;  %v196_v21 = vmul.f32 %v10120_v3, %v10688_v25 }
 0x15d   :  { %9110 = vmatpush3.bf16.msra.mxu0 %v10713_v57  ;;  %9113 = vmatprep.mubr.msk.bf16.mxu0 %vm91_vm0, %v10755_v40  ;;  %v223_v8 = vadd.f32 %v10727_v24, %v209_v6  ;;  %v13175_v57 = vmov 0.0  }
 0x15e   :  { %v10793_v47 = vpack.c.bf16 %v222_v5, %v221_v4  ;;  %9111 = vmatprep.subr.bf16.mxu0 %v10086_v2  ;;  %v210_v7 = vmul.f32 %v10720_v31, %v196_v21  ;;  %9121 = vmatprep.subr.bf16.mxu1 %v13175_v57  ;;  %v10904_v4 = vld [vmem:[%s13166_s11] ss:$0 sm:$0xff] }
 0x160   :  { %9105 = vmatprep.mubr.msk.bf16.mxu1 %vm91_vm0, %v10793_v47  ;;  %v224_v45 = vadd.f32 %v10727_v24, %v210_v7 }
 0x161   :  { %9112 = vmatpush3.bf16.msra.mxu0 %v10086_v2 }
 0x162   :  { %v10800_v25 = vpack.c.bf16 %v224_v45, %v223_v8  ;;  %9133 = vmatprep.subr.bf16.mxu0 %v13175_v57 }
 0x164   :  { %9106 = vmatmul.mubr.msk.bf16.gmra.mrb[8].mxu1 %vm91_vm0, %v10800_v25  ;;  %9114 = vmatmul.mubr.msk.bf16.vlgmr.msra.gmra.mrb[4].mxu0 %vm91_vm0, %v10764_v48 }
 0x165   :  { %9117 = vmatprep.mubr.msk.bf16.mxu0 %vm91_vm0, %v10793_v47  ;;  %9123 = vmatprep.mubr.msk.bf16.mxu1 %vm10422_vm1, %v13175_v57 }
 0x16c   :  { %9118 = vmatmul.mubr.msk.bf16.gmra.mrb[8].mxu0 %vm91_vm0, %v10800_v25 }
 0x16d   :  { %9135 = vmatprep.mubr.msk.bf16.mxu0 %vm10422_vm1, %v13175_v57 }
 0x21f   :  { %v10816_v31 = vpop.f32.mrb[0].mxu1 }
 0x220   :  { %v461_v24 = vpop.f32.mrb[1].mxu1 }
 0x221   :  { %v10818_v9 = vpop.f32.mrb[2].mxu1  ;;  %v462_v37 = vadd.f32 %v10842_v32, %v461_v24 }
 0x222   :  { %v10820_v12 = vpop.f32.mrb[3].mxu1 }
 0x223   :  { %v10908_v21 = vpack.c.bf16 %v462_v37, %v462_v37 }
 0x227   :  { %v9103_v14 = vpop.f32.mrb[4].mxu1 }
 0x228   :  { %v569_v54 = vadd.f32 %v9103_v14, %v10825_v13  ;;  %v560_v15 = vpop.f32.mrb[5].mxu1  ;;  %v470_v14 = vadd.f32 %v10816_v31, %v10842_v32 }
 0x229   :  { %v561_v18 = vadd.f32 %v10825_v13, %v560_v15  ;;  %v9104_v19 = vpop.f32.mrb[6].mxu1 }
 0x22a   :  { %v10829_v22 = vpack.c.bf16 %v569_v54, %v569_v54  ;;  %v563_v16 = vpop.f32.mrb[7].mxu1  ;;  %v572_v43 = vadd.f32 %v9104_v19, %v10825_v13 }
 0x22b   :  { %v10831_v26 = vpack.c.bf16 %v561_v18, %v561_v18  ;;  %v564_v30 = vadd.f32 %v10825_v13, %v563_v16  ;;  %v10936_v18 = vpack.c.bf16 %v470_v14, %v470_v14 }
 0x22c   :  { %v795_v27 = vsel %vm698_vm2, %v10829_v22, 0  ;;  %v10868_v51 = vpack.c.bf16 %v572_v43, %v572_v43 }
 0x22d   :  { %9134 = vmatpush3.bf16.xpose.msra.mxu0 %v795_v27  ;;  %v703_v56 = vsel %vm698_vm2, %v10831_v26, 0  ;;  %v10846_v20 = vpack.c.bf16 %v564_v30, %v564_v30  ;;  %v473_v27 = vadd.f32 %v10818_v9, %v10842_v32 }
 0x22e   :  { %9122 = vmatpush3.bf16.xpose.msra.mxu1 %v703_v56  ;;  %9145 = vmatprep.subr.bf16.mxu0 %v13175_v57  ;;  %v841_v60 = vsel %vm698_vm2, %v10868_v51, 0 }
 0x22f   :  { %v9091_v0 = vpop.f32.mrb[0].mxu0  ;;  %9127 = vmatprep.subr.bf16.mxu1 %v13175_v57  ;;  %v749_v36 = vsel %vm698_vm2, %v10846_v20, 0  ;;  %v10959_v56 = vpack.c.bf16 %v473_v27, %v473_v27 }
 0x230   :  { %v454_v33 = vadd.f32 %v9091_v0, %v10842_v32  ;;  %v445_v34 = vpop.f32.mrb[1].mxu0 }
 0x231   :  { %v446_v38 = vadd.f32 %v10842_v32, %v445_v34  ;;  %v9092_v39 = vpop.f32.mrb[2].mxu0 }
 0x232   :  { %v10849_v1 = vpack.c.bf16 %v454_v33, %v454_v33  ;;  %v448_v41 = vpop.f32.mrb[3].mxu0  ;;  %v457_v62 = vadd.f32 %v9092_v39, %v10842_v32 }
 0x233   :  { %v10851_v42 = vpack.c.bf16 %v446_v38, %v446_v38  ;;  %v449_v55 = vadd.f32 %v10842_v32, %v448_v41 }
 0x234   :  { %9136 = vmatmul.mubr.msk.bf16.vlgmr.msra.gmra.mrb[12].mxu0 %vm698_vm2, %v10849_v1  ;;  %v10910_v6 = vpack.c.bf16 %v457_v62, %v457_v62 }
 0x235   :  { %9124 = vmatmul.mubr.msk.bf16.vlgmr.msra.gmra.mrb[12].mxu1 %vm698_vm2, %v10851_v42  ;;  %9147 = vmatprep.mubr.msk.bf16.mxu0 %vm10422_vm1, %v13175_v57  ;;  %v10873_v23 = vpack.c.bf16 %v449_v55, %v449_v55 }
 0x236   :  { %9128 = vmatpush3.bf16.xpose.msra.mxu1 %v749_v36  ;;  %9129 = vmatprep.mubr.msk.bf16.mxu1 %vm10422_vm1, %v13175_v57 }
 0x237   :  { %v9107_v10 = vpop.f32.mrb[8].mxu1  ;;  %v10865_v46 = vpop.f32.mrb[4].mxu0  ;;  %9139 = vmatprep.subr.bf16.mxu1 %v13175_v57 }
 0x238   :  { %v576_v49 = vpop.f32.mrb[9].mxu1  ;;  %v643_v50 = vpop.f32.mrb[5].mxu0  ;;  %v585_v58 = vadd.f32 %v9107_v10, %v10825_v13 }
 0x239   :  { %v577_v52 = vadd.f32 %v10825_v13, %v576_v49  ;;  %v9108_v28 = vpop.f32.mrb[10].mxu1  ;;  %v10871_v11 = vpop.f32.mrb[6].mxu0  ;;  %v644_v7 = vadd.f32 %v10904_v4, %v643_v50 }
 0x23a   :  { %v579_v44 = vpop.f32.mrb[11].mxu1  ;;  %v646_v29 = vpop.f32.mrb[7].mxu0  ;;  %v10895_v35 = vpack.c.bf16 %v585_v58, %v585_v58  ;;  %v588_v8 = vadd.f32 %v9108_v28, %v10825_v13 }
 0x23b   :  { %v10875_v53 = vpack.c.bf16 %v577_v52, %v577_v52  ;;  %v580_v59 = vadd.f32 %v10825_v13, %v579_v44  ;;  %v465_v13 = vadd.f32 %v10842_v32, %v10820_v12  ;;  %v10932_v54 = vpack.c.bf16 %v644_v7, %v644_v7 }
 0x23c   :  { %v979_v24 = vsel %vm698_vm2, %v10895_v35, 0  ;;  %v10934_v15 = vpack.c.bf16 %v588_v8, %v588_v8  ;;  %v647_v12 = vadd.f32 %v10904_v4, %v646_v29 }
 0x23d   :  { %9130 = vmatmul.mubr.msk.bf16.vlgmr.msra.gmra.mrb[16].mxu1 %vm698_vm2, %v10873_v23  ;;  %v887_v61 = vsel %vm698_vm2, %v10875_v53, 0  ;;  %v10897_v2 = vpack.c.bf16 %v580_v59, %v580_v59  ;;  %v10938_v31 = vpack.c.bf16 %v465_v13, %v465_v13  ;;  %v1168_v16 = vsel %vm1166_vm3, %v10932_v54, 0 }
 0x23e   :  { %9140 = vmatpush3.bf16.xpose.msra.mxu1 %v841_v60  ;;  %9146 = vmatpush3.bf16.xpose.msra.mxu0 %v887_v61  ;;  %v1025_v19 = vsel %vm698_vm2, %v10934_v15, 0  ;;  %v10957_v30 = vpack.c.bf16 %v647_v12, %v647_v12 }
 0x23f   :  { %v10887_v17 = vpop.f32.mrb[8].mxu0  ;;  %9141 = vmatprep.mubr.msk.bf16.mxu1 %vm10422_vm1, %v13175_v57  ;;  %9151 = vmatprep.subr.bf16.mxu1 %v13175_v57  ;;  %v933_v45 = vsel %vm698_vm2, %v10897_v2, 0 }
 0x240   :  { %v10892_v63 = vpop.f32.mrb[9].mxu0  ;;  %9157 = vmatprep.subr.bf16.mxu0 %v13175_v57  ;;  %v1214_v9 = vsel %vm1166_vm3, %v10957_v30, 0 }
 0x241   :  { %v10899_v3 = vpop.f32.mrb[10].mxu0 }
 0x242   :  { %v10906_v5 = vpop.f32.mrb[11].mxu0 }
 0x245   :  { %9142 = vmatmul.mubr.msk.bf16.vlgmr.msra.gmra.mrb[20].mxu1 %vm698_vm2, %v10910_v6  ;;  %9148 = vmatmul.mubr.msk.bf16.vlgmr.msra.gmra.mrb[16].mxu0 %vm698_vm2, %v10908_v21 }
 0x246   :  { %9152 = vmatpush3.bf16.xpose.msra.mxu1 %v933_v45  ;;  %9158 = vmatpush3.bf16.xpose.msra.mxu0 %v979_v24 }
 0x247   :  { %9153 = vmatprep.mubr.msk.bf16.mxu1 %vm10422_vm1, %v13175_v57  ;;  %9159 = vmatprep.mubr.msk.bf16.mxu0 %vm10422_vm1, %v13175_v57 }
 0x248   :  { %9163 = vmatprep.subr.bf16.mxu1 %v13175_v57  ;;  %9169 = vmatprep.subr.bf16.mxu0 %v13175_v57 }
 0x24d   :  { %9154 = vmatmul.mubr.msk.bf16.vlgmr.msra.gmra.mrb[24].mxu1 %vm698_vm2, %v10938_v31  ;;  %9160 = vmatmul.mubr.msk.bf16.vlgmr.msra.gmra.mrb[20].mxu0 %vm698_vm2, %v10936_v18 }
 0x24e   :  { %9164 = vmatpush3.bf16.xpose.msra.mxu1 %v1025_v19  ;;  %9170 = vmatpush3.bf16.msra.mxu0 %v1168_v16 }
 0x24f   :  { %9165 = vmatprep.mubr.msk.bf16.mxu1 %vm10422_vm1, %v13175_v57  ;;  %9175 = vmatprep.subr.bf16.mxu1 %v13175_v57 }
 0x250   :  { %9171 = vmatprep.mubr.msk.bf16.mxu0 %vm10422_vm1, %v13175_v57  ;;  %9181 = vmatprep.subr.bf16.mxu0 %v13175_v57 }
 0x255   :  { %9166 = vmatmul.mubr.msk.bf16.vlgmr.msra.gmra.mrb[28].mxu1 %vm698_vm2, %v10959_v56 }
 0x256   :  { %9176 = vmatpush3.bf16.msra.mxu1 %v1214_v9  ;;  %9177 = vmatprep.mubr.msk.bf16.mxu1 %vm10422_vm1, %v13175_v57 }
 0x257   :  { %9187 = vmatprep.subr.bf16.mxu1 %v13175_v57 }
 0x307   :  { %v831_v32 = vpop.f32.mrb[12].mxu0 }
 0x308   :  { %v739_v0 = vpop.f32.mrb[12].mxu1  ;;  %v9137_v33 = vpop.f32.mrb[13].mxu0  ;;  %v1073_v55 = vsel %vm698_vm2, %v831_v32, -inf }
 0x309   :  { %v9125_v34 = vpop.f32.mrb[13].mxu1  ;;  %v834_v38 = vpop.f32.mrb[14].mxu0  ;;  %v1067_v39 = vsel %vm698_vm2, %v739_v0, -inf }
 0x30a   :  { %v9138_v41 = vpop.f32.mrb[15].mxu0  ;;  %1068 = vmax.xlane.f32.xlu0 %v1067_v39  ;;  %v742_v43 = vpop.f32.mrb[14].mxu1 }
 0x30b   :  { %v9126_v36 = vpop.f32.mrb[15].mxu1 }
 0x30e   :  { %1074 = vmax.xlane.f32.xlu0 %v1073_v55 }
 0x310   :  { %v785_v10 = vpop.f32.mrb[16].mxu1 }
 0x311   :  { %v9131_v49 = vpop.f32.mrb[17].mxu1  ;;  %v1070_v50 = vsel %vm698_vm2, %v785_v10, -inf }
 0x312   :  { %1071 = vmax.xlane.f32.xlu1 %v1070_v50  ;;  %v788_v52 = vpop.f32.mrb[18].mxu1 }
 0x313   :  { %v9132_v28 = vpop.f32.mrb[19].mxu1 }
 0x318   :  { %v877_v44 = vpop.f32.mrb[20].mxu1  ;;  %v923_v29 = vpop.f32.mrb[16].mxu0 }
 0x319   :  { %v9143_v58 = vpop.f32.mrb[21].mxu1  ;;  %v9149_v59 = vpop.f32.mrb[17].mxu0  ;;  %v1076_v60 = vsel %vm698_vm2, %v877_v44, -inf  ;;  %v1079_v61 = vsel %vm698_vm2, %v923_v29, -inf }
 0x31a   :  { %1077 = vmax.xlane.f32.xlu1 %v1076_v60  ;;  %v880_v37 = vpop.f32.mrb[22].mxu1  ;;  %1080 = vmax.xlane.f32.xlu0 %v1079_v61  ;;  %v926_v62 = vpop.f32.mrb[18].mxu0 }
 0x31b   :  { %v9144_v7 = vpop.f32.mrb[23].mxu1  ;;  %v9150_v8 = vpop.f32.mrb[19].mxu0 }
 0x320   :  { %v10973_v45 = vpop.f32.mrb[24].mxu1  ;;  %v1015_v24 = vpop.f32.mrb[20].mxu0 }
 0x321   :  { %v9155_v14 = vpop.f32.mrb[25].mxu1  ;;  %v9161_v13 = vpop.f32.mrb[21].mxu0  ;;  %v1082_v12 = vsel %vm698_vm2, %v10973_v45, -inf  ;;  %v1085_v19 = vsel %vm698_vm2, %v1015_v24, -inf }
 0x322   :  { %1083 = vmax.xlane.f32.xlu1 %v1082_v12  ;;  %v972_v16 = vpop.f32.mrb[26].mxu1  ;;  %1086 = vmax.xlane.f32.xlu0 %v1085_v19  ;;  %v1018_v27 = vpop.f32.mrb[22].mxu0 }
 0x323   :  { %v9156_v9 = vpop.f32.mrb[27].mxu1  ;;  %v9162_v33 = vpop.f32.mrb[23].mxu0 }
 0x328   :  { %v10978_v34 = vpop.f32.mrb[28].mxu1 }
 0x329   :  { %v9167_v38 = vpop.f32.mrb[29].mxu1  ;;  %v1088_v39 = vsel %vm698_vm2, %v10978_v34, -inf }
 0x32a   :  { %1089 = vmax.xlane.f32.xlu1 %v1088_v39  ;;  %v1064_v41 = vpop.f32.mrb[30].mxu1 }
 0x32b   :  { %v9168_v43 = vpop.f32.mrb[31].mxu1 }
 0x397   :  { %v1069_v36 = vpop.xlane.xlu0 %1068 }
 0x398   :  { %v1091_v55 = vsub.f32 %v739_v0, %v1069_v36 }
 0x39a   :  { %v1099_v49 = vmul.f32 1.442695, %v1091_v55 }
 0x39b   :  { %v1075_v50 = vpop.xlane.xlu0 %1074 }
 0x39c   :  { %10121 = vpow2.f32 %v1099_v49  ;;  %v1093_v52 = vsub.f32 %v831_v32, %v1075_v50 }
 0x39e   :  { %v1103_v28 = vmul.f32 1.442695, %v1093_v52 }
 0x39f   :  { %v1072_v58 = vpop.xlane.xlu1 %1071 }
 0x3a0   :  { %10123 = vpow2.f32 %v1103_v28  ;;  %v1092_v59 = vsub.f32 %v785_v10, %v1072_v58 }
 0x3a2   :  { %v1101_v60 = vmul.f32 1.442695, %v1092_v59 }
 0x3a4   :  { %10125 = vpow2.f32 %v1101_v60 }
 0x3a6   :  { %v10982_v61 = vpop.eup %10121 }
 0x3a7   :  { %v1078_v37 = vpop.xlane.xlu1 %1077  ;;  %v1081_v62 = vpop.xlane.xlu0 %1080  ;;  %v1115_v7 = vsel %vm698_vm2, %v10982_v61, 0.0 }
 0x3a8   :  { %v1094_v8 = vsub.f32 %v877_v44, %v1078_v37  ;;  %v1095_v14 = vsub.f32 %v923_v29, %v1081_v62  ;;  %1116 = vadd.xlane.f32.xlu0 %v1115_v7 }
 0x3aa   :  { %v10986_v0 = vpop.eup %10123  ;;  %v1105_v13 = vmul.f32 1.442695, %v1094_v8  ;;  %v1107_v32 = vmul.f32 1.442695, %v1095_v14 }
 0x3ab   :  { %v1121_v12 = vsel %vm698_vm2, %v10986_v0, 0.0 }
 0x3ac   :  { %10127 = vpow2.f32 %v1105_v13  ;;  %1122 = vadd.xlane.f32.xlu0 %v1121_v12 }
 0x3ad   :  { %10129 = vpow2.f32 %v1107_v32  ;;  %v655_v32 = vadd.f32 %v10871_v11, %v10904_v4 }
 0x3ae   :  { %v10990_v10 = vpop.eup %10125 }
 0x3af   :  { %v1087_v19 = vpop.xlane.xlu0 %1086  ;;  %v1118_v16 = vsel %vm698_vm2, %v10990_v10, 0.0  ;;  %v1084_v41 = vpop.xlane.xlu1 %1083 }
 0x3b0   :  { %v1097_v27 = vsub.f32 %v1015_v24, %v1087_v19  ;;  %1119 = vadd.xlane.f32.xlu1 %v1118_v16  ;;  %v1096_v43 = vsub.f32 %v10973_v45, %v1084_v41  ;;  %v11064_v16 = vpack.c.bf16 %v655_v32, %v655_v32 }
 0x3b2   :  { %v1111_v44 = vmul.f32 1.442695, %v1097_v27  ;;  %v1109_v36 = vmul.f32 1.442695, %v1096_v43 }
 0x3b4   :  { %10131 = vpow2.f32 %v1111_v44 }
 0x3b5   :  { %10133 = vpow2.f32 %v1109_v36 }
 0x3b6   :  { %v10994_v29 = vpop.eup %10127 }
 0x3b7   :  { %v10996_v9 = vpop.eup %10129  ;;  %v1124_v33 = vsel %vm698_vm2, %v10994_v29, 0.0  ;;  %v1090_v49 = vpop.xlane.xlu1 %1089 }
 0x3b8   :  { %1125 = vadd.xlane.f32.xlu1 %v1124_v33  ;;  %v1127_v38 = vsel %vm698_vm2, %v10996_v9, 0.0  ;;  %v1098_v50 = vsub.f32 %v10978_v34, %v1090_v49  ;;  %v652_v34 = vadd.f32 %v10865_v46, %v10904_v4  ;;  %v660_v46 = vadd.f32 %v10904_v4, %v10892_v63 }
 0x3b9   :  { %1128 = vadd.xlane.f32.xlu0 %v1127_v38 }
 0x3ba   :  { %v1113_v52 = vmul.f32 1.442695, %v1098_v50  ;;  %v11046_v7 = vpack.c.bf16 %v652_v34, %v652_v34  ;;  %v11066_v27 = vpack.c.bf16 %v660_v46, %v660_v46 }
 0x3bc   :  { %10135 = vpow2.f32 %v1113_v52  ;;  %v1260_v19 = vsel %vm1166_vm3, %v11046_v7, 0  ;;  %v1352_v41 = vsel %vm1166_vm3, %v11066_v27, 0 }
 0x3be   :  { %v11002_v39 = vpop.eup %10131 }
 0x3bf   :  { %v1133_v24 = vsel %vm698_vm2, %v11002_v39, 0.0  ;;  %v11019_v55 = vpop.eup %10133 }
 0x3c0   :  { %1134 = vadd.xlane.f32.xlu0 %v1133_v24  ;;  %v1130_v45 = vsel %vm698_vm2, %v11019_v55, 0.0  ;;  %v663_v24 = vadd.f32 %v10904_v4, %v10906_v5 }
 0x3c6   :  { %v11032_v28 = vpop.eup %10135 }
 0x3c7   :  { %v1136_v58 = vsel %vm698_vm2, %v11032_v28, 0.0 }
 0x3c9   :  { %1588 = vrot.lane.b32.xlu1 %v10846_v20, %s10423_s17 }
 0x3d6   :  { %1536 = vrot.lane.b32.xlu0 %v10831_v26, %s10423_s17 }
 0x3da   :  { %1640 = vrot.lane.b32.xlu0 %v10829_v22, %s10423_s17 }
 0x3de   :  { %1637 = vrot.lane.b32.xlu0 %v10849_v1, %s10423_s17 }
 0x3e2   :  { %1744 = vrot.lane.b32.xlu0 %v10875_v53, %s10423_s17 }
 0x3e6   :  { %1741 = vrot.lane.b32.xlu0 %v10908_v21, %s10423_s17 }
 0x3ea   :  { %1848 = vrot.lane.b32.xlu0 %v10895_v35, %s10423_s17 }
 0x3ed   :  { %1131 = vadd.xlane.f32.xlu1 %v1130_v45  ;;  %v11088_v45 = vpack.c.bf16 %v663_v24, %v663_v24 }
 0x3ee   :  { %1845 = vrot.lane.b32.xlu0 %v10936_v18, %s10423_s17 }
 0x3f2   :  { %2045 = vrot.lane.b32.xlu0 %v10932_v54, %s10423_s17 }
 0x3fe   :  { %1533 = vrot.lane.b32.xlu1 %v10851_v42, %s10423_s17 }
 0x422   :  { %1137 = vadd.xlane.f32.xlu1 %v1136_v58 }
 0x433   :  { %1585 = vrot.lane.b32.xlu1 %v10873_v23, %s10423_s17 }
 0x435   :  { %v1117_v59 = vpop.xlane.xlu0 %1116 }
 0x436   :  { %10137 = vrcp.f32 %v1117_v59  ;;  %v1398_v59 = vsel %vm1166_vm3, %v11088_v45, 0 }
 0x437   :  { %1692 = vrot.lane.b32.xlu1 %v10868_v51, %s10423_s17 }
 0x439   :  { %v1123_v60 = vpop.xlane.xlu0 %1122 }
 0x43a   :  { %10139 = vrcp.f32 %v1123_v60 }
 0x43b   :  { %1689 = vrot.lane.b32.xlu1 %v10910_v6, %s10423_s17 }
 0x43d   :  { %v1120_v37 = vpop.xlane.xlu1 %1119 }
 0x43e   :  { %10141 = vrcp.f32 %v1120_v37 }
 0x43f   :  { %1796 = vrot.lane.b32.xlu1 %v10897_v2, %s10423_s17 }
 0x440   :  { %v10138_v62 = vpop.eup %10137 }
 0x441   :  { %v1147_v8 = vmul.f32 %v10138_v62, %v10982_v61 }
 0x443   :  { %1793 = vrot.lane.b32.xlu1 %v10938_v31, %s10423_s17  ;;  %v1155_v14 = vpack.c.bf16 %v1147_v8, %v1147_v8 }
 0x444   :  { %v10140_v13 = vpop.eup %10139 }
 0x445   :  { %v1126_v12 = vpop.xlane.xlu1 %1125  ;;  %9172 = vmatmul.mubr.msk.bf16.vlgmr.msra.gmra.mrb[24].mxu0 %vm698_vm2, %v1155_v14  ;;  %v1149_v11 = vmul.f32 %v10140_v13, %v10986_v0  ;;  %v1306_v0 = vsel %vm1166_vm3, %v11064_v16, 0 }
 0x446   :  { %10143 = vrcp.f32 %v1126_v12  ;;  %9182 = vmatpush3.bf16.msra.mxu0 %v1260_v19  ;;  %v1129_v61 = vpop.xlane.xlu0 %1128  ;;  %9183 = vmatprep.mubr.msk.bf16.mxu0 %vm10422_vm1, %v13175_v57  ;;  %v671_v19 = vadd.f32 %v10899_v3, %v10904_v4 }
 0x447   :  { %10145 = vrcp.f32 %v1129_v61  ;;  %1900 = vrot.lane.b32.xlu1 %v10934_v15, %s10423_s17  ;;  %9193 = vmatprep.subr.bf16.mxu0 %v13175_v57  ;;  %v1157_v38 = vpack.c.bf16 %v1149_v11, %v1149_v11 }
 0x448   :  { %v10142_v63 = vpop.eup %10141 }
 0x449   :  { %v1148_v44 = vmul.f32 %v10142_v63, %v10990_v10  ;;  %v668_v10 = vadd.f32 %v10887_v17, %v10904_v4  ;;  %v1589_v14 = vpop.permute.xlu1 %1588  ;;  %v11124_v63 = vpack.c.bf16 %v671_v19, %v671_v19 }
 0x44b   :  { %1897 = vrot.lane.b32.xlu1 %v10959_v56, %s10423_s17  ;;  %v1156_v33 = vpack.c.bf16 %v1148_v44, %v1148_v44  ;;  %v11092_v49 = vpack.c.bf16 %v668_v10, %v668_v10  ;;  %v1490_v3 = vsel %vm1166_vm3, %v11124_v63, 0 }
 0x44d   :  { %9178 = vmatmul.mubr.msk.bf16.vlgmr.msra.gmra.mrb[32].mxu1 %vm698_vm2, %v1156_v33  ;;  %9184 = vmatmul.mubr.msk.bf16.vlgmr.msra.gmra.mrb[28].mxu0 %vm698_vm2, %v1157_v38  ;;  %v1135_v43 = vpop.xlane.xlu0 %1134 }
 0x44e   :  { %9188 = vmatpush3.bf16.msra.mxu1 %v1306_v0  ;;  %9194 = vmatpush3.bf16.msra.mxu0 %v1352_v41  ;;  %10147 = vrcp.f32 %v1135_v43 }
 0x44f   :  { %2094 = vrot.lane.b32.xlu1 %v10957_v30, %s10423_s17  ;;  %9189 = vmatprep.mubr.msk.bf16.mxu1 %vm10422_vm1, %v13175_v57 }
 0x450   :  { %v10144_v5 = vpop.eup %10143  ;;  %9195 = vmatprep.mubr.msk.bf16.mxu0 %vm10422_vm1, %v13175_v57  ;;  %9199 = vmatprep.subr.bf16.mxu1 %v13175_v57 }
 0x451   :  { %v10146_v36 = vpop.eup %10145  ;;  %9205 = vmatprep.subr.bf16.mxu0 %v13175_v57  ;;  %v1150_v17 = vmul.f32 %v10144_v5, %v10994_v29  ;;  %v1444_v29 = vsel %vm1166_vm3, %v11092_v49, 0  ;;  %v1537_v34 = vpop.permute.xlu0 %1536 }
 0x452   :  { %v1151_v50 = vmul.f32 %v10146_v36, %v10996_v9  ;;  %v1542_v62 = vsel %vm698_vm2, %v1537_v34, 0 }
 0x453   :  { %2143 = vrot.lane.b32.xlu1 %v11046_v7, %s10423_s17  ;;  %v1158_v52 = vpack.c.bf16 %v1150_v17, %v1150_v17 }
 0x454   :  { %v1159_v58 = vpack.c.bf16 %v1151_v50, %v1151_v50 }
 0x455   :  { %9190 = vmatmul.mubr.msk.bf16.vlgmr.msra.gmra.mrb[36].mxu1 %vm698_vm2, %v1158_v52  ;;  %v1641_v8 = vpop.permute.xlu0 %1640 }
 0x456   :  { %9196 = vmatmul.mubr.msk.bf16.vlgmr.msra.gmra.mrb[32].mxu0 %vm698_vm2, %v1159_v58  ;;  %9200 = vmatpush3.bf16.msra.mxu1 %v1398_v59  ;;  %v1594_v58 = vsel %vm698_vm2, %v1589_v14, 0 }
 0x457   :  { %9206 = vmatpush3.bf16.msra.mxu0 %v1444_v29  ;;  %2192 = vrot.lane.b32.xlu1 %v11064_v16, %s10423_s17 }
 0x458   :  { %9207 = vmatprep.mubr.msk.bf16.mxu0 %vm10422_vm1, %v13175_v57  ;;  %9217 = vmatprep.subr.bf16.mxu0 %v13175_v57  ;;  %v10148_v9 = vpop.eup %10147 }
 0x459   :  { %9201 = vmatprep.mubr.msk.bf16.mxu1 %vm10422_vm1, %v13175_v57  ;;  %9211 = vmatprep.subr.bf16.mxu1 %v13175_v57  ;;  %v1153_v60 = vmul.f32 %v10148_v9, %v11002_v39  ;;  %v1638_v13 = vpop.permute.xlu0 %1637  ;;  %v1646_v39 = vsel %vm698_vm2, %v1641_v8, 0 }
 0x45b   :  { %v1161_v37 = vpack.c.bf16 %v1153_v60, %v1153_v60 }
 0x45d   :  { %v1745_v46 = vpop.permute.xlu0 %1744 }
 0x45e   :  { %9208 = vmatmul.mubr.msk.bf16.vlgmr.msra.gmra.mrb[36].mxu0 %vm698_vm2, %v1161_v37  ;;  %v1750_v33 = vsel %vm698_vm2, %v1745_v46, 0 }
 0x45f   :  { %9219 = vmatprep.mubr.msk.bf16.mxu0 %vm10422_vm1, %v13175_v57 }
 0x460   :  { %9218 = vmatpush3.bf16.xpose.msra.mxu0 %v1542_v62 }
 0x461   :  { %9229 = vmatprep.subr.bf16.mxu0 %v13175_v57  ;;  %v1742_v61 = vpop.permute.xlu0 %1741 }
 0x465   :  { %v1849_v38 = vpop.permute.xlu0 %1848 }
 0x469   :  { %v1846_v4 = vpop.permute.xlu0 %1845 }
 0x46d   :  { %v2046_v0 = vpop.permute.xlu0 %2045 }
 0x46e   :  { %v2051_v41 = vsel %vm1166_vm3, %v2046_v0, 0 }
 0x47a   :  { %v1132_v32 = vpop.xlane.xlu1 %1131 }
 0x47b   :  { %10149 = vrcp.f32 %v1132_v32 }
 0x47e   :  { %v1534_v12 = vpop.permute.xlu1 %1533 }
 0x47f   :  { %9220 = vmatmul.mubr.msk.bf16.vlgmr.msra.gmra.mrb[40].mxu0 %vm698_vm2, %v1534_v12 }
 0x480   :  { %9230 = vmatpush3.bf16.xpose.msra.mxu0 %v1646_v39  ;;  %9231 = vmatprep.mubr.msk.bf16.mxu0 %vm10422_vm1, %v13175_v57 }
 0x481   :  { %9241 = vmatprep.subr.bf16.mxu0 %v13175_v57 }
 0x485   :  { %v10150_v11 = vpop.eup %10149 }
 0x486   :  { %v1152_v44 = vmul.f32 %v10150_v11, %v11019_v55  ;;  %v1854_v55 = vsel %vm698_vm2, %v1849_v38, 0 }
 0x487   :  { %9232 = vmatmul.mubr.msk.bf16.vlgmr.msra.gmra.mrb[44].mxu0 %vm698_vm2, %v1638_v13 }
 0x488   :  { %9242 = vmatpush3.bf16.xpose.msra.mxu0 %v1750_v33  ;;  %v1160_v24 = vpack.c.bf16 %v1152_v44, %v1152_v44  ;;  %9243 = vmatprep.mubr.msk.bf16.mxu0 %vm10422_vm1, %v13175_v57 }
 0x489   :  { %9253 = vmatprep.subr.bf16.mxu0 %v13175_v57 }
 0x48a   :  { %9202 = vmatmul.mubr.msk.bf16.vlgmr.msra.gmra.mrb[40].mxu1 %vm698_vm2, %v1160_v24 }
 0x48b   :  { %9212 = vmatpush3.bf16.msra.mxu1 %v1490_v3  ;;  %9213 = vmatprep.mubr.msk.bf16.mxu1 %vm10422_vm1, %v13175_v57 }
 0x48c   :  { %9223 = vmatprep.subr.bf16.mxu1 %v13175_v57 }
 0x48f   :  { %9244 = vmatmul.mubr.msk.bf16.vlgmr.msra.gmra.mrb[48].mxu0 %vm698_vm2, %v1742_v61 }
 0x490   :  { %9254 = vmatpush3.bf16.xpose.msra.mxu0 %v1854_v55  ;;  %9255 = vmatprep.mubr.msk.bf16.mxu0 %vm10422_vm1, %v13175_v57 }
 0x491   :  { %9265 = vmatprep.subr.bf16.mxu0 %v13175_v57 }
 0x497   :  { %9256 = vmatmul.mubr.msk.bf16.vlgmr.msra.gmra.mrb[52].mxu0 %vm698_vm2, %v1846_v4 }
 0x498   :  { %9266 = vmatpush3.bf16.msra.mxu0 %v2051_v41  ;;  %9267 = vmatprep.mubr.msk.bf16.mxu0 %vm10422_vm1, %v13175_v57 }
 0x499   :  { %9277 = vmatprep.subr.bf16.mxu0 %v13175_v57 }
 0x4af   :  { %v1138_v10 = vpop.xlane.xlu1 %1137 }
 0x4b0   :  { %10151 = vrcp.f32 %v1138_v10 }
 0x4b3   :  { %v1586_v43 = vpop.permute.xlu1 %1585 }
 0x4b7   :  { %v1693_v5 = vpop.permute.xlu1 %1692 }
 0x4b8   :  { %v1698_v29 = vsel %vm698_vm2, %v1693_v5, 0 }
 0x4ba   :  { %v10152_v36 = vpop.eup %10151 }
 0x4bb   :  { %v1154_v17 = vmul.f32 %v10152_v36, %v11032_v28  ;;  %v1690_v52 = vpop.permute.xlu1 %1689 }
 0x4bd   :  { %v1162_v50 = vpack.c.bf16 %v1154_v17, %v1154_v17 }
 0x4bf   :  { %9214 = vmatmul.mubr.msk.bf16.vlgmr.msra.gmra.mrb[44].mxu1 %vm698_vm2, %v1162_v50  ;;  %v1797_v59 = vpop.permute.xlu1 %1796 }
 0x4c0   :  { %9224 = vmatpush3.bf16.xpose.msra.mxu1 %v1594_v58  ;;  %9225 = vmatprep.mubr.msk.bf16.mxu1 %vm10422_vm1, %v13175_v57  ;;  %v1802_v9 = vsel %vm698_vm2, %v1797_v59, 0 }
 0x4c1   :  { %9235 = vmatprep.subr.bf16.mxu1 %v13175_v57 }
 0x4c3   :  { %v1794_v28 = vpop.permute.xlu1 %1793 }
 0x4c7   :  { %9226 = vmatmul.mubr.msk.bf16.vlgmr.msra.gmra.mrb[48].mxu1 %vm698_vm2, %v1586_v43  ;;  %v1901_v60 = vpop.permute.xlu1 %1900 }
 0x4c8   :  { %9236 = vmatpush3.bf16.xpose.msra.mxu1 %v1698_v29  ;;  %9237 = vmatprep.mubr.msk.bf16.mxu1 %vm10422_vm1, %v13175_v57  ;;  %v1906_v37 = vsel %vm698_vm2, %v1901_v60, 0 }
 0x4c9   :  { %9247 = vmatprep.subr.bf16.mxu1 %v13175_v57 }
 0x4cb   :  { %v1898_v34 = vpop.permute.xlu1 %1897 }
 0x4cf   :  { %9238 = vmatmul.mubr.msk.bf16.vlgmr.msra.gmra.mrb[52].mxu1 %vm698_vm2, %v1690_v52  ;;  %v2095_v62 = vpop.permute.xlu1 %2094 }
 0x4d0   :  { %9248 = vmatpush3.bf16.xpose.msra.mxu1 %v1802_v9  ;;  %9249 = vmatprep.mubr.msk.bf16.mxu1 %vm10422_vm1, %v13175_v57  ;;  %v2100_v8 = vsel %vm1166_vm3, %v2095_v62, 0 }
 0x4d1   :  { %9259 = vmatprep.subr.bf16.mxu1 %v13175_v57 }
 0x4d7   :  { %9250 = vmatmul.mubr.msk.bf16.vlgmr.msra.gmra.mrb[56].mxu1 %vm698_vm2, %v1794_v28 }
 0x4d8   :  { %9260 = vmatpush3.bf16.xpose.msra.mxu1 %v1906_v37  ;;  %9261 = vmatprep.mubr.msk.bf16.mxu1 %vm10422_vm1, %v13175_v57 }
 0x4d9   :  { %9271 = vmatprep.subr.bf16.mxu1 %v13175_v57 }
 0x4df   :  { %9262 = vmatmul.mubr.msk.bf16.vlgmr.msra.gmra.mrb[60].mxu1 %vm698_vm2, %v1898_v34 }
 0x4e0   :  { %9272 = vmatpush3.bf16.msra.mxu1 %v2100_v8  ;;  %9273 = vmatprep.mubr.msk.bf16.mxu1 %vm10422_vm1, %v13175_v57 }
 0x4e1   :  { %9283 = vmatprep.subr.bf16.mxu1 %v13175_v57 }
 0x518   :  { %v11174_v14 = vpop.f32.mrb[24].mxu0 }
 0x519   :  { %v9173_v13 = vpop.f32.mrb[25].mxu0 }
 0x51a   :  { %v1207_v32 = vpop.f32.mrb[26].mxu0 }
 0x51b   :  { %v9174_v46 = vpop.f32.mrb[27].mxu0 }
 0x520   :  { %v11176_v12 = vpop.f32.mrb[32].mxu1  ;;  %v11178_v39 = vpop.f32.mrb[28].mxu0 }
 0x521   :  { %v9179_v19 = vpop.f32.mrb[33].mxu1  ;;  %v9185_v61 = vpop.f32.mrb[29].mxu0 }
 0x522   :  { %v1253_v11 = vpop.f32.mrb[34].mxu1  ;;  %v1299_v44 = vpop.f32.mrb[30].mxu0 }
 0x523   :  { %v9180_v33 = vpop.f32.mrb[35].mxu1  ;;  %v9186_v38 = vpop.f32.mrb[31].mxu0 }
 0x528   :  { %v11180_v24 = vpop.f32.mrb[36].mxu1 }
 0x529   :  { %v11182_v3 = vpop.f32.mrb[32].mxu0  ;;  %v9191_v4 = vpop.f32.mrb[37].mxu1 }
 0x52a   :  { %v9197_v55 = vpop.f32.mrb[33].mxu0  ;;  %v1345_v0 = vpop.f32.mrb[38].mxu1 }
 0x52b   :  { %v1391_v41 = vpop.f32.mrb[34].mxu0  ;;  %v9192_v10 = vpop.f32.mrb[39].mxu1 }
 0x52c   :  { %v9198_v43 = vpop.f32.mrb[35].mxu0 }
 0x531   :  { %v11184_v5 = vpop.f32.mrb[36].mxu0 }
 0x532   :  { %13179 = vst [vmem:[#allocation2_spill] sm:$0xff] %v11184_v5  ;;  %v9209_v36 = vpop.f32.mrb[37].mxu0 }
 0x533   :  { %v1483_v17 = vpop.f32.mrb[38].mxu0 }
 0x534   :  { %v9210_v50 = vpop.f32.mrb[39].mxu0 }
 0x552   :  { %v1578_v52 = vpop.f32.mrb[40].mxu0 }
 0x553   :  { %v9221_v58 = vpop.f32.mrb[41].mxu0  ;;  %v1948_v59 = vsel %vm698_vm2, %v1578_v52, -inf }
 0x554   :  { %1949 = vmax.xlane.f32.xlu0 %v1948_v59  ;;  %v1581_v29 = vpop.f32.mrb[42].mxu0 }
 0x555   :  { %v9222_v28 = vpop.f32.mrb[43].mxu0 }
 0x55a   :  { %v1682_v9 = vpop.f32.mrb[44].mxu0 }
 0x55b   :  { %v9233_v60 = vpop.f32.mrb[45].mxu0  ;;  %v1954_v34 = vsel %vm698_vm2, %v1682_v9, -inf }
 0x55c   :  { %1955 = vmax.xlane.f32.xlu0 %v1954_v34  ;;  %v1685_v37 = vpop.f32.mrb[46].mxu0 }
 0x55d   :  { %v11188_v62 = vpop.f32.mrb[40].mxu1  ;;  %v9234_v8 = vpop.f32.mrb[47].mxu0 }
 0x55e   :  { %v9203_v13 = vpop.f32.mrb[41].mxu1 }
 0x55f   :  { %v1437_v32 = vpop.f32.mrb[42].mxu1 }
 0x560   :  { %v9204_v46 = vpop.f32.mrb[43].mxu1 }
 0x562   :  { %v11190_v19 = vpop.f32.mrb[48].mxu0 }
 0x563   :  { %v9245_v61 = vpop.f32.mrb[49].mxu0  ;;  %v1960_v8 = vsel %vm698_vm2, %v11190_v19, -inf }
 0x564   :  { %v1789_v11 = vpop.f32.mrb[50].mxu0 }
 0x565   :  { %v9246_v44 = vpop.f32.mrb[51].mxu0 }
 0x56a   :  { %v11192_v33 = vpop.f32.mrb[52].mxu0 }
 0x56b   :  { %v9257_v38 = vpop.f32.mrb[53].mxu0  ;;  %v1966_v61 = vsel %vm698_vm2, %v11192_v33, -inf }
 0x56c   :  { %v1893_v4 = vpop.f32.mrb[54].mxu0 }
 0x56d   :  { %v9258_v55 = vpop.f32.mrb[55].mxu0 }
 0x592   :  { %v11194_v0 = vpop.f32.mrb[44].mxu1 }
 0x593   :  { %13180 = vst [vmem:[#allocation3_spill] sm:$0xff] %v11194_v0  ;;  %v9215_v41 = vpop.f32.mrb[45].mxu1 }
 0x594   :  { %v1529_v10 = vpop.f32.mrb[46].mxu1 }
 0x595   :  { %v9216_v43 = vpop.f32.mrb[47].mxu1 }
 0x59a   :  { %v1630_v36 = vpop.f32.mrb[48].mxu1 }
 0x59b   :  { %v9227_v17 = vpop.f32.mrb[49].mxu1  ;;  %v1951_v50 = vsel %vm698_vm2, %v1630_v36, -inf }
 0x59c   :  { %1952 = vmax.xlane.f32.xlu1 %v1951_v50  ;;  %v1633_v58 = vpop.f32.mrb[50].mxu1 }
 0x59d   :  { %v9228_v59 = vpop.f32.mrb[51].mxu1 }
 0x5a2   :  { %v1734_v29 = vpop.f32.mrb[52].mxu1 }
 0x5a3   :  { %v9239_v28 = vpop.f32.mrb[53].mxu1  ;;  %v1957_v60 = vsel %vm698_vm2, %v1734_v29, -inf }
 0x5a4   :  { %v1737_v34 = vpop.f32.mrb[54].mxu1  ;;  %1958 = vmax.xlane.f32.xlu0 %v1957_v60 }
 0x5a5   :  { %v9240_v37 = vpop.f32.mrb[55].mxu1 }
 0x5a8   :  { %1961 = vmax.xlane.f32.xlu0 %v1960_v8 }
 0x5aa   :  { %v1838_v13 = vpop.f32.mrb[56].mxu1 }
 0x5ab   :  { %v9251_v32 = vpop.f32.mrb[57].mxu1  ;;  %v1963_v46 = vsel %vm698_vm2, %v1838_v13, -inf }
 0x5ac   :  { %1964 = vmax.xlane.f32.xlu1 %v1963_v46  ;;  %v1841_v11 = vpop.f32.mrb[58].mxu1  ;;  %1967 = vmax.xlane.f32.xlu0 %v1966_v61  ;;  %v2144_v32 = vpop.permute.xlu1 %2143 }
 0x5ad   :  { %v9252_v44 = vpop.f32.mrb[59].mxu1 }
 0x5b0   :  { %v11213_v46 = vpop.permute.xlu1 %2192 }
 0x5b2   :  { %v11203_v38 = vpop.f32.mrb[60].mxu1 }
 0x5b3   :  { %v9263_v4 = vpop.f32.mrb[61].mxu1  ;;  %v1969_v10 = vsel %vm698_vm2, %v11203_v38, -inf }
 0x5b4   :  { %v1945_v55 = vpop.f32.mrb[62].mxu1 }
 0x5b5   :  { %v9264_v41 = vpop.f32.mrb[63].mxu1 }
 0x5bd   :  { %2290 = vrot.lane.b32.xlu1 %v11088_v45, %s10423_s17 }
 0x5c2   :  { %2241 = vrot.lane.b32.xlu0 %v11066_v27, %s10423_s17 }
 0x5e1   :  { %1970 = vmax.xlane.f32.xlu1 %v1969_v10  ;;  %v1950_v43 = vpop.xlane.xlu0 %1949 }
 0x5e2   :  { %v1972_v17 = vsub.f32 %v1578_v52, %v1950_v43 }
 0x5e4   :  { %v1980_v50 = vmul.f32 1.442695, %v1972_v17 }
 0x5e6   :  { %10153 = vpow2.f32 %v1980_v50 }
 0x5e9   :  { %v1956_v58 = vpop.xlane.xlu0 %1955 }
 0x5ea   :  { %v1974_v59 = vsub.f32 %v1682_v9, %v1956_v58 }
 0x5ec   :  { %v1984_v28 = vmul.f32 1.442695, %v1974_v59 }
 0x5ee   :  { %10155 = vpow2.f32 %v1984_v28 }
 0x5f0   :  { %v10154_v60 = vpop.eup %10153 }
 0x5f1   :  { %v1996_v34 = vsel %vm698_vm2, %v10154_v60, 0.0 }
 0x5f2   :  { %1997 = vadd.xlane.f32.xlu0 %v1996_v34 }
 0x5f8   :  { %v10156_v37 = vpop.eup %10155 }
 0x5f9   :  { %v2002_v8 = vsel %vm698_vm2, %v10156_v37, 0.0 }
 0x5fa   :  { %2003 = vadd.xlane.f32.xlu0 %v2002_v8 }
 0x629   :  { %v1953_v61 = vpop.xlane.xlu1 %1952 }
 0x62a   :  { %v1973_v11 = vsub.f32 %v1630_v36, %v1953_v61 }
 0x62c   :  { %v1982_v52 = vmul.f32 1.442695, %v1973_v11 }
 0x62e   :  { %10157 = vpow2.f32 %v1982_v52 }
 0x631   :  { %v1959_v44 = vpop.xlane.xlu0 %1958 }
 0x632   :  { %v1975_v4 = vsub.f32 %v1734_v29, %v1959_v44 }
 0x634   :  { %v1986_v9 = vmul.f32 1.442695, %v1975_v4 }
 0x635   :  { %v1962_v55 = vpop.xlane.xlu0 %1961 }
 0x636   :  { %10159 = vpow2.f32 %v1986_v9  ;;  %v1976_v41 = vsub.f32 %v11190_v19, %v1962_v55 }
 0x638   :  { %v11216_v10 = vpop.eup %10157  ;;  %v1988_v43 = vmul.f32 1.442695, %v1976_v41 }
 0x639   :  { %v1999_v17 = vsel %vm698_vm2, %v11216_v10, 0.0  ;;  %v1965_v19 = vpop.xlane.xlu1 %1964  ;;  %v1968_v28 = vpop.xlane.xlu0 %1967 }
 0x63a   :  { %10161 = vpow2.f32 %v1988_v43  ;;  %2000 = vadd.xlane.f32.xlu1 %v1999_v17  ;;  %v1977_v59 = vsub.f32 %v1838_v13, %v1965_v19  ;;  %v1978_v8 = vsub.f32 %v11192_v33, %v1968_v28  ;;  %v2149_v17 = vsel %vm1166_vm3, %v2144_v32, 0 }
 0x63c   :  { %v1990_v34 = vmul.f32 1.442695, %v1977_v59  ;;  %v1992_v61 = vmul.f32 1.442695, %v1978_v8 }
 0x63d   :  { %v2242_v9 = vpop.permute.xlu0 %2241 }
 0x63e   :  { %10163 = vpow2.f32 %v1990_v34  ;;  %v2247_v28 = vsel %vm1166_vm3, %v2242_v9, 0 }
 0x63f   :  { %10165 = vpow2.f32 %v1992_v61 }
 0x640   :  { %v11220_v50 = vpop.eup %10159 }
 0x641   :  { %v2005_v36 = vsel %vm698_vm2, %v11220_v50, 0.0 }
 0x642   :  { %2006 = vadd.xlane.f32.xlu1 %v2005_v36  ;;  %v2291_v36 = vpop.permute.xlu1 %2290 }
 0x644   :  { %v11224_v29 = vpop.eup %10161 }
 0x645   :  { %v2008_v58 = vsel %vm698_vm2, %v11224_v29, 0.0 }
 0x646   :  { %2009 = vadd.xlane.f32.xlu0 %v2008_v58 }
 0x648   :  { %v11233_v11 = vpop.eup %10163 }
 0x649   :  { %v2011_v52 = vsel %vm698_vm2, %v11233_v11, 0.0  ;;  %v11237_v44 = vpop.eup %10165 }
 0x64a   :  { %v2014_v4 = vsel %vm698_vm2, %v11237_v44, 0.0 }
 0x653   :  { %2388 = vrot.lane.b32.xlu1 %v11124_v63, %s10423_s17 }
 0x65c   :  { %2339 = vrot.lane.b32.xlu0 %v11092_v49, %s10423_s17 }
 0x66e   :  { %v1971_v19 = vpop.xlane.xlu1 %1970 }
 0x66f   :  { %v1979_v32 = vsub.f32 %v11203_v38, %v1971_v19 }
 0x677   :  { %2012 = vadd.xlane.f32.xlu1 %v2011_v52 }
 0x67b   :  { %2015 = vadd.xlane.f32.xlu0 %v2014_v4 }
 0x67f   :  { %v1998_v13 = vpop.xlane.xlu0 %1997 }
 0x680   :  { %10167 = vrcp.f32 %v1998_v13 }
 0x687   :  { %v2004_v55 = vpop.xlane.xlu0 %2003 }
 0x688   :  { %10169 = vrcp.f32 %v2004_v55  ;;  %2488 = vrot.lane.b32.xlu1 %v10846_v20, %s10424_s18  ;;  %v2198_v55 = vsel %vm1166_vm3, %v11213_v46, 0  ;;  %v2296_v46 = vsel %vm1166_vm3, %v2291_v36, 0 }
 0x68a   :  { %v10168_v33 = vpop.eup %10167 }
 0x68b   :  { %v2028_v41 = vmul.f32 %v10168_v33, %v10154_v60 }
 0x68d   :  { %v2036_v43 = vpack.c.bf16 %v2028_v41, %v2028_v41 }
 0x68f   :  { %9268 = vmatmul.mubr.msk.bf16.vlgmr.msra.gmra.mrb[56].mxu0 %vm698_vm2, %v2036_v43 }
 0x690   :  { %9278 = vmatpush3.bf16.msra.mxu0 %v2149_v17  ;;  %9279 = vmatprep.mubr.msk.bf16.mxu0 %vm10422_vm1, %v13175_v57 }
 0x691   :  { %2438 = vrot.lane.b32.xlu0 %v10831_v26, %s10424_s18  ;;  %9289 = vmatprep.subr.bf16.mxu0 %v13175_v57 }
 0x692   :  { %v10170_v58 = vpop.eup %10169 }
 0x693   :  { %v2030_v59 = vmul.f32 %v10170_v58, %v10156_v37  ;;  %v1994_v37 = vmul.f32 1.442695, %v1979_v32 }
 0x695   :  { %2436 = vrot.lane.b32.xlu0 %v10851_v42, %s10424_s18  ;;  %v2038_v60 = vpack.c.bf16 %v2030_v59, %v2030_v59  ;;  %10171 = vpow2.f32 %v1994_v37 }
 0x697   :  { %9280 = vmatmul.mubr.msk.bf16.vlgmr.msra.gmra.mrb[60].mxu0 %vm698_vm2, %v2038_v60 }
 0x698   :  { %9290 = vmatpush3.bf16.msra.mxu0 %v2247_v28  ;;  %9291 = vmatprep.mubr.msk.bf16.mxu0 %vm10422_vm1, %v13175_v57 }
 0x699   :  { %2538 = vrot.lane.b32.xlu0 %v10829_v22, %s10424_s18  ;;  %9301 = vmatprep.subr.bf16.mxu0 %v13175_v57 }
 0x69d   :  { %2536 = vrot.lane.b32.xlu0 %v10849_v1, %s10424_s18 }
 0x69f   :  { %v11266_v38 = vpop.eup %10171 }
 0x6a0   :  { %v2017_v34 = vsel %vm698_vm2, %v11266_v38, 0.0 }
 0x6a1   :  { %2638 = vrot.lane.b32.xlu0 %v10875_v53, %s10424_s18 }
 0x6a5   :  { %2636 = vrot.lane.b32.xlu0 %v10908_v21, %s10424_s18 }
 0x6a9   :  { %2738 = vrot.lane.b32.xlu0 %v10895_v35, %s10424_s18 }
 0x6ac   :  { %2018 = vadd.xlane.f32.xlu1 %v2017_v34 }
 0x6ad   :  { %2736 = vrot.lane.b32.xlu0 %v10936_v18, %s10424_s18 }
 0x6b1   :  { %2932 = vrot.lane.b32.xlu0 %v10932_v54, %s10424_s18 }
 0x6bd   :  { %2486 = vrot.lane.b32.xlu1 %v10873_v23, %s10424_s18 }
 0x6c1   :  { %2588 = vrot.lane.b32.xlu1 %v10868_v51, %s10424_s18 }
 0x6c5   :  { %2586 = vrot.lane.b32.xlu1 %v10910_v6, %s10424_s18 }
 0x6c7   :  { %v2001_v8 = vpop.xlane.xlu1 %2000 }
 0x6c8   :  { %10173 = vrcp.f32 %v2001_v8 }
 0x6c9   :  { %2688 = vrot.lane.b32.xlu1 %v10897_v2, %s10424_s18 }
 0x6cd   :  { %2686 = vrot.lane.b32.xlu1 %v10938_v31, %s10424_s18 }
 0x6cf   :  { %v2007_v61 = vpop.xlane.xlu1 %2006 }
 0x6d0   :  { %10175 = vrcp.f32 %v2007_v61 }
 0x6d1   :  { %2788 = vrot.lane.b32.xlu1 %v10934_v15, %s10424_s18 }
 0x6d2   :  { %v10174_v52 = vpop.eup %10173 }
 0x6d3   :  { %v2010_v4 = vpop.xlane.xlu0 %2009  ;;  %v2029_v9 = vmul.f32 %v10174_v52, %v11216_v10 }
 0x6d4   :  { %10177 = vrcp.f32 %v2010_v4 }
 0x6d5   :  { %2786 = vrot.lane.b32.xlu1 %v10959_v56, %s10424_s18  ;;  %v2037_v13 = vpack.c.bf16 %v2029_v9, %v2029_v9 }
 0x6d7   :  { %9274 = vmatmul.mubr.msk.bf16.vlgmr.msra.gmra.mrb[64].mxu1 %vm698_vm2, %v2037_v13  ;;  %v2340_v58 = vpop.permute.xlu0 %2339 }
 0x6d8   :  { %9284 = vmatpush3.bf16.msra.mxu1 %v2198_v55  ;;  %9285 = vmatprep.mubr.msk.bf16.mxu1 %vm10422_vm1, %v13175_v57  ;;  %v2345_v19 = vsel %vm1166_vm3, %v2340_v58, 0 }
 0x6d9   :  { %2980 = vrot.lane.b32.xlu1 %v10957_v30, %s10424_s18  ;;  %9295 = vmatprep.subr.bf16.mxu1 %v13175_v57 }
 0x6da   :  { %v10176_v10 = vpop.eup %10175 }
 0x6db   :  { %v2031_v33 = vmul.f32 %v10176_v10, %v11220_v50 }
 0x6dd   :  { %3028 = vrot.lane.b32.xlu1 %v11046_v7, %s10424_s18  ;;  %v2039_v41 = vpack.c.bf16 %v2031_v33, %v2031_v33 }
 0x6de   :  { %v10178_v43 = vpop.eup %10177 }
 0x6df   :  { %9286 = vmatmul.mubr.msk.bf16.vlgmr.msra.gmra.mrb[68].mxu1 %vm698_vm2, %v2039_v41  ;;  %v2032_v17 = vmul.f32 %v10178_v43, %v11224_v29  ;;  %v2389_v29 = vpop.permute.xlu1 %2388 }
 0x6e0   :  { %9296 = vmatpush3.bf16.msra.mxu1 %v2296_v46  ;;  %9297 = vmatprep.mubr.msk.bf16.mxu1 %vm10422_vm1, %v13175_v57  ;;  %v2394_v61 = vsel %vm1166_vm3, %v2389_v29, 0 }
 0x6e1   :  { %3076 = vrot.lane.b32.xlu1 %v11064_v16, %s10424_s18  ;;  %v2040_v50 = vpack.c.bf16 %v2032_v17, %v2032_v17  ;;  %9307 = vmatprep.subr.bf16.mxu1 %v13175_v57 }
 0x6e3   :  { %9292 = vmatmul.mubr.msk.bf16.vlgmr.msra.gmra.mrb[64].mxu0 %vm698_vm2, %v2040_v50 }
 0x6e4   :  { %9302 = vmatpush3.bf16.msra.mxu0 %v2345_v19  ;;  %9303 = vmatprep.mubr.msk.bf16.mxu0 %vm10422_vm1, %v13175_v57 }
 0x6e5   :  { %9313 = vmatprep.subr.bf16.mxu0 %v13175_v57 }
 0x704   :  { %v2013_v36 = vpop.xlane.xlu1 %2012 }
 0x705   :  { %10179 = vrcp.f32 %v2013_v36 }
 0x708   :  { %v2016_v59 = vpop.xlane.xlu0 %2015  ;;  %v2489_v17 = vpop.permute.xlu1 %2488 }
 0x709   :  { %10181 = vrcp.f32 %v2016_v59 }
 0x70c   :  { %v2439_v60 = vpop.permute.xlu0 %2438 }
 0x70d   :  { %v2444_v13 = vsel %vm698_vm2, %v2439_v60, 0 }
 0x70f   :  { %v10180_v32 = vpop.eup %10179 }
 0x710   :  { %v2437_v28 = vpop.permute.xlu0 %2436  ;;  %v2033_v37 = vmul.f32 %v10180_v32, %v11233_v11 }
 0x712   :  { %v2041_v34 = vpack.c.bf16 %v2033_v37, %v2033_v37  ;;  %v2494_v37 = vsel %vm698_vm2, %v2489_v17, 0 }
 0x713   :  { %v10182_v8 = vpop.eup %10181 }
 0x714   :  { %9298 = vmatmul.mubr.msk.bf16.vlgmr.msra.gmra.mrb[72].mxu1 %vm698_vm2, %v2041_v34  ;;  %v2539_v52 = vpop.permute.xlu0 %2538  ;;  %v2034_v4 = vmul.f32 %v10182_v8, %v11237_v44 }
 0x715   :  { %9308 = vmatpush3.bf16.msra.mxu1 %v2394_v61  ;;  %9309 = vmatprep.mubr.msk.bf16.mxu1 %vm10422_vm1, %v13175_v57  ;;  %v2544_v44 = vsel %vm698_vm2, %v2539_v52, 0 }
 0x716   :  { %v2042_v9 = vpack.c.bf16 %v2034_v4, %v2034_v4  ;;  %9319 = vmatprep.subr.bf16.mxu1 %v13175_v57 }
 0x718   :  { %9304 = vmatmul.mubr.msk.bf16.vlgmr.msra.gmra.mrb[68].mxu0 %vm698_vm2, %v2042_v9  ;;  %v2537_v11 = vpop.permute.xlu0 %2536 }
 0x719   :  { %9314 = vmatpush3.bf16.xpose.msra.mxu0 %v2444_v13  ;;  %9315 = vmatprep.mubr.msk.bf16.mxu0 %vm10422_vm1, %v13175_v57 }
 0x71a   :  { %9325 = vmatprep.subr.bf16.mxu0 %v13175_v57 }
 0x71c   :  { %v2639_v55 = vpop.permute.xlu0 %2638 }
 0x71d   :  { %v2644_v33 = vsel %vm698_vm2, %v2639_v55, 0 }
 0x720   :  { %9316 = vmatmul.mubr.msk.bf16.vlgmr.msra.gmra.mrb[72].mxu0 %vm698_vm2, %v2437_v28  ;;  %v2637_v10 = vpop.permute.xlu0 %2636 }
 0x721   :  { %9326 = vmatpush3.bf16.xpose.msra.mxu0 %v2544_v44  ;;  %9327 = vmatprep.mubr.msk.bf16.mxu0 %vm10422_vm1, %v13175_v57 }
 0x722   :  { %9337 = vmatprep.subr.bf16.mxu0 %v13175_v57 }
 0x724   :  { %v2739_v41 = vpop.permute.xlu0 %2738 }
 0x725   :  { %v2744_v46 = vsel %vm698_vm2, %v2739_v41, 0 }
 0x728   :  { %9328 = vmatmul.mubr.msk.bf16.vlgmr.msra.gmra.mrb[76].mxu0 %vm698_vm2, %v2537_v11  ;;  %v2737_v43 = vpop.permute.xlu0 %2736 }
 0x729   :  { %9338 = vmatpush3.bf16.xpose.msra.mxu0 %v2644_v33  ;;  %9339 = vmatprep.mubr.msk.bf16.mxu0 %vm10422_vm1, %v13175_v57 }
 0x72a   :  { %9349 = vmatprep.subr.bf16.mxu0 %v13175_v57 }
 0x72c   :  { %v2933_v58 = vpop.permute.xlu0 %2932 }
 0x72d   :  { %v2938_v50 = vsel %vm1166_vm3, %v2933_v58, 0 }
 0x730   :  { %9340 = vmatmul.mubr.msk.bf16.vlgmr.msra.gmra.mrb[80].mxu0 %vm698_vm2, %v2637_v10 }
 0x731   :  { %9350 = vmatpush3.bf16.xpose.msra.mxu0 %v2744_v46  ;;  %9351 = vmatprep.mubr.msk.bf16.mxu0 %vm10422_vm1, %v13175_v57 }
 0x732   :  { %9361 = vmatprep.subr.bf16.mxu0 %v13175_v57 }
 0x738   :  { %9352 = vmatmul.mubr.msk.bf16.vlgmr.msra.gmra.mrb[84].mxu0 %vm698_vm2, %v2737_v43 }
 0x739   :  { %9362 = vmatpush3.bf16.msra.mxu0 %v2938_v50  ;;  %v2019_v19 = vpop.xlane.xlu1 %2018  ;;  %9363 = vmatprep.mubr.msk.bf16.mxu0 %vm10422_vm1, %v13175_v57 }
 0x73a   :  { %10183 = vrcp.f32 %v2019_v19  ;;  %9373 = vmatprep.subr.bf16.mxu0 %v13175_v57 }
 0x73d   :  { %v2487_v29 = vpop.permute.xlu1 %2486 }
 0x741   :  { %v2589_v36 = vpop.permute.xlu1 %2588 }
 0x742   :  { %v2594_v8 = vsel %vm698_vm2, %v2589_v36, 0 }
 0x744   :  { %v10184_v59 = vpop.eup %10183 }
 0x745   :  { %v2035_v60 = vmul.f32 %v10184_v59, %v11266_v38  ;;  %v2587_v28 = vpop.permute.xlu1 %2586 }
 0x747   :  { %v2043_v32 = vpack.c.bf16 %v2035_v60, %v2035_v60 }
 0x749   :  { %9310 = vmatmul.mubr.msk.bf16.vlgmr.msra.gmra.mrb[76].mxu1 %vm698_vm2, %v2043_v32  ;;  %v2689_v34 = vpop.permute.xlu1 %2688 }
 0x74a   :  { %9320 = vmatpush3.bf16.xpose.msra.mxu1 %v2494_v37  ;;  %9321 = vmatprep.mubr.msk.bf16.mxu1 %vm10422_vm1, %v13175_v57  ;;  %v2694_v61 = vsel %vm698_vm2, %v2689_v34, 0 }
 0x74b   :  { %9331 = vmatprep.subr.bf16.mxu1 %v13175_v57 }
 0x74d   :  { %v2687_v38 = vpop.permute.xlu1 %2686 }
 0x751   :  { %9322 = vmatmul.mubr.msk.bf16.vlgmr.msra.gmra.mrb[80].mxu1 %vm698_vm2, %v2487_v29  ;;  %v2789_v52 = vpop.permute.xlu1 %2788 }
 0x752   :  { %9332 = vmatpush3.bf16.xpose.msra.mxu1 %v2594_v8  ;;  %9333 = vmatprep.mubr.msk.bf16.mxu1 %vm10422_vm1, %v13175_v57  ;;  %v2794_v9 = vsel %vm698_vm2, %v2789_v52, 0 }
 0x753   :  { %9343 = vmatprep.subr.bf16.mxu1 %v13175_v57 }
 0x755   :  { %v2787_v4 = vpop.permute.xlu1 %2786 }
 0x759   :  { %9334 = vmatmul.mubr.msk.bf16.vlgmr.msra.gmra.mrb[84].mxu1 %vm698_vm2, %v2587_v28  ;;  %v2981_v10 = vpop.permute.xlu1 %2980 }
 0x75a   :  { %9344 = vmatpush3.bf16.xpose.msra.mxu1 %v2694_v61  ;;  %9345 = vmatprep.mubr.msk.bf16.mxu1 %vm10422_vm1, %v13175_v57  ;;  %v2986_v33 = vsel %vm1166_vm3, %v2981_v10, 0 }
 0x75b   :  { %9355 = vmatprep.subr.bf16.mxu1 %v13175_v57 }
 0x761   :  { %9346 = vmatmul.mubr.msk.bf16.vlgmr.msra.gmra.mrb[88].mxu1 %vm698_vm2, %v2687_v38 }
 0x762   :  { %9356 = vmatpush3.bf16.xpose.msra.mxu1 %v2794_v9  ;;  %v11365_v13 = vpop.f32.mrb[56].mxu0  ;;  %9357 = vmatprep.mubr.msk.bf16.mxu1 %vm10422_vm1, %v13175_v57 }
 0x763   :  { %v9269_v11 = vpop.f32.mrb[57].mxu0  ;;  %9367 = vmatprep.subr.bf16.mxu1 %v13175_v57 }
 0x764   :  { %v2090_v55 = vpop.f32.mrb[58].mxu0 }
 0x765   :  { %v9270_v44 = vpop.f32.mrb[59].mxu0 }
 0x769   :  { %9358 = vmatmul.mubr.msk.bf16.vlgmr.msra.gmra.mrb[92].mxu1 %vm698_vm2, %v2787_v4 }
 0x76a   :  { %9368 = vmatpush3.bf16.msra.mxu1 %v2986_v33  ;;  %v11372_v41 = vpop.f32.mrb[60].mxu0  ;;  %9369 = vmatprep.mubr.msk.bf16.mxu1 %vm10422_vm1, %v13175_v57 }
 0x76b   :  { %v9281_v43 = vpop.f32.mrb[61].mxu0  ;;  %9379 = vmatprep.subr.bf16.mxu1 %v13175_v57 }
 0x76c   :  { %v2188_v46 = vpop.f32.mrb[62].mxu0 }
 0x76d   :  { %v9282_v17 = vpop.f32.mrb[63].mxu0 }
 0x7aa   :  { %v11377_v58 = vpop.f32.mrb[64].mxu1 }
 0x7ab   :  { %v9275_v19 = vpop.f32.mrb[65].mxu1 }
 0x7ac   :  { %v2139_v29 = vpop.f32.mrb[66].mxu1 }
 0x7ad   :  { %v9276_v36 = vpop.f32.mrb[67].mxu1 }
 0x7b2   :  { %v11381_v59 = vpop.f32.mrb[68].mxu1 }
 0x7b3   :  { %v9287_v32 = vpop.f32.mrb[69].mxu1 }
 0x7b4   :  { %v2237_v28 = vpop.f32.mrb[70].mxu1 }
 0x7b5   :  { %v9288_v37 = vpop.f32.mrb[71].mxu1 }
 0x7b6   :  { %v11385_v34 = vpop.f32.mrb[64].mxu0 }
 0x7b7   :  { %v9293_v8 = vpop.f32.mrb[65].mxu0 }
 0x7b8   :  { %v2286_v38 = vpop.f32.mrb[66].mxu0 }
 0x7b9   :  { %v9294_v61 = vpop.f32.mrb[67].mxu0 }
 0x7e7   :  { %v11387_v52 = vpop.f32.mrb[72].mxu1 }
 0x7e8   :  { %v9299_v9 = vpop.f32.mrb[73].mxu1 }
 0x7e9   :  { %v2335_v11 = vpop.f32.mrb[74].mxu1 }
 0x7ea   :  { %v9300_v55 = vpop.f32.mrb[75].mxu1 }
 0x7eb   :  { %v11391_v44 = vpop.f32.mrb[68].mxu0 }
 0x7ec   :  { %v9305_v10 = vpop.f32.mrb[69].mxu0 }
 0x7ed   :  { %v2384_v33 = vpop.f32.mrb[70].mxu0 }
 0x7ee   :  { %v9306_v43 = vpop.f32.mrb[71].mxu0 }
 0x7f3   :  { %v2480_v46 = vpop.f32.mrb[72].mxu0 }
 0x7f4   :  { %v9317_v17 = vpop.f32.mrb[73].mxu0  ;;  %v2836_v19 = vsel %vm698_vm2, %v2480_v46, -inf }
 0x7f5   :  { %2837 = vmax.xlane.f32.xlu0 %v2836_v19  ;;  %v2483_v29 = vpop.f32.mrb[74].mxu0 }
 0x7f6   :  { %v9318_v36 = vpop.f32.mrb[75].mxu0 }
 0x7fb   :  { %v2580_v32 = vpop.f32.mrb[76].mxu0 }
 0x7fc   :  { %v9329_v28 = vpop.f32.mrb[77].mxu0  ;;  %v2842_v37 = vsel %vm698_vm2, %v2580_v32, -inf }
 0x7fd   :  { %2843 = vmax.xlane.f32.xlu0 %v2842_v37  ;;  %v2583_v8 = vpop.f32.mrb[78].mxu0 }
 0x7fe   :  { %v9330_v38 = vpop.f32.mrb[79].mxu0 }
 0x803   :  { %v11395_v61 = vpop.f32.mrb[80].mxu0 }
 0x804   :  { %v9341_v9 = vpop.f32.mrb[81].mxu0  ;;  %v2848_v29 = vsel %vm698_vm2, %v11395_v61, -inf }
 0x805   :  { %v2683_v11 = vpop.f32.mrb[82].mxu0 }
 0x806   :  { %v9342_v55 = vpop.f32.mrb[83].mxu0 }
 0x80b   :  { %v11397_v10 = vpop.f32.mrb[84].mxu0 }
 0x80c   :  { %v9353_v33 = vpop.f32.mrb[85].mxu0 }
 0x80d   :  { %v2783_v43 = vpop.f32.mrb[86].mxu0 }
 0x80e   :  { %v9354_v17 = vpop.f32.mrb[87].mxu0 }
 0x81c   :  { %v11399_v19 = vpop.f32.mrb[76].mxu1 }
 0x81d   :  { %v9311_v36 = vpop.f32.mrb[77].mxu1 }
 0x81e   :  { %v2433_v28 = vpop.f32.mrb[78].mxu1 }
 0x81f   :  { %v9312_v37 = vpop.f32.mrb[79].mxu1 }
 0x824   :  { %v2530_v8 = vpop.f32.mrb[80].mxu1 }
 0x825   :  { %v9323_v38 = vpop.f32.mrb[81].mxu1  ;;  %v2839_v4 = vsel %vm698_vm2, %v2530_v8, -inf }
 0x826   :  { %2840 = vmax.xlane.f32.xlu1 %v2839_v4  ;;  %v2533_v9 = vpop.f32.mrb[82].mxu1  ;;  %v2854_v4 = vsel %vm698_vm2, %v11397_v10, -inf }
 0x827   :  { %v9324_v11 = vpop.f32.mrb[83].mxu1 }
 0x82c   :  { %v2630_v55 = vpop.f32.mrb[84].mxu1 }
 0x82d   :  { %v9335_v60 = vpop.f32.mrb[85].mxu1  ;;  %v2845_v33 = vsel %vm698_vm2, %v2630_v55, -inf }
 0x82e   :  { %v2633_v43 = vpop.f32.mrb[86].mxu1  ;;  %2846 = vmax.xlane.f32.xlu0 %v2845_v33 }
 0x82f   :  { %v9336_v17 = vpop.f32.mrb[87].mxu1 }
 0x832   :  { %2849 = vmax.xlane.f32.xlu0 %v2848_v29 }
 0x834   :  { %v2730_v36 = vpop.f32.mrb[88].mxu1 }
 0x835   :  { %v9347_v28 = vpop.f32.mrb[89].mxu1  ;;  %v2851_v37 = vsel %vm698_vm2, %v2730_v36, -inf }
 0x836   :  { %2852 = vmax.xlane.f32.xlu1 %v2851_v37  ;;  %v2733_v38 = vpop.f32.mrb[90].mxu1  ;;  %2855 = vmax.xlane.f32.xlu0 %v2854_v4 }
 0x837   :  { %v9348_v60 = vpop.f32.mrb[91].mxu1 }
 0x83c   :  { %v11410_v9 = vpop.f32.mrb[92].mxu1 }
 0x83d   :  { %v9359_v11 = vpop.f32.mrb[93].mxu1  ;;  %v2857_v29 = vsel %vm698_vm2, %v11410_v9, -inf }
 0x83e   :  { %v2833_v33 = vpop.f32.mrb[94].mxu1 }
 0x83f   :  { %v9360_v43 = vpop.f32.mrb[95].mxu1 }
 0x847   :  { %3172 = vrot.lane.b32.xlu1 %v11088_v45, %s10424_s18 }
 0x84c   :  { %3124 = vrot.lane.b32.xlu0 %v11066_v27, %s10424_s18 }
 0x86b   :  { %2858 = vmax.xlane.f32.xlu1 %v2857_v29  ;;  %v3029_v29 = vpop.permute.xlu1 %3028 }
 0x882   :  { %v2838_v17 = vpop.xlane.xlu0 %2837 }
 0x883   :  { %v2860_v28 = vsub.f32 %v2480_v46, %v2838_v17  ;;  %v11426_v46 = vpop.permute.xlu1 %3076 }
 0x885   :  { %v2868_v37 = vmul.f32 1.442695, %v2860_v28 }
 0x887   :  { %10185 = vpow2.f32 %v2868_v37 }
 0x88a   :  { %v2844_v4 = vpop.xlane.xlu0 %2843 }
 0x88b   :  { %v2862_v38 = vsub.f32 %v2580_v32, %v2844_v4 }
 0x88d   :  { %v2872_v60 = vmul.f32 1.442695, %v2862_v38 }
 0x88f   :  { %10187 = vpow2.f32 %v2872_v60 }
 0x891   :  { %v11418_v11 = vpop.eup %10185 }
 0x892   :  { %v2884_v33 = vsel %vm698_vm2, %v11418_v11, 0.0 }
 0x893   :  { %2885 = vadd.xlane.f32.xlu0 %v2884_v33 }
 0x899   :  { %v11422_v43 = vpop.eup %10187 }
 0x89a   :  { %v2890_v50 = vsel %vm698_vm2, %v11422_v43, 0.0 }
 0x89b   :  { %2891 = vadd.xlane.f32.xlu0 %v2890_v50 }
 0x8b3   :  { %v2841_v17 = vpop.xlane.xlu1 %2840 }
 0x8b4   :  { %v2861_v28 = vsub.f32 %v2530_v8, %v2841_v17 }
 0x8b6   :  { %v2870_v32 = vmul.f32 1.442695, %v2861_v28 }
 0x8b8   :  { %10189 = vpow2.f32 %v2870_v32 }
 0x8bb   :  { %v2847_v37 = vpop.xlane.xlu0 %2846 }
 0x8bc   :  { %v2863_v4 = vsub.f32 %v2630_v55, %v2847_v37 }
 0x8be   :  { %v2874_v38 = vmul.f32 1.442695, %v2863_v4 }
 0x8bf   :  { %v2850_v60 = vpop.xlane.xlu0 %2849 }
 0x8c0   :  { %10191 = vpow2.f32 %v2874_v38  ;;  %v2864_v33 = vsub.f32 %v11395_v61, %v2850_v60 }
 0x8c2   :  { %v11429_v57 = vpop.eup %10189  ;;  %v2876_v5 = vmul.f32 1.442695, %v2864_v33 }
 0x8c3   :  { %v2887_v50 = vsel %vm698_vm2, %v11429_v57, 0.0  ;;  %v2856_v28 = vpop.xlane.xlu0 %2855 }
 0x8c4   :  { %10193 = vpow2.f32 %v2876_v5  ;;  %2888 = vadd.xlane.f32.xlu1 %v2887_v50  ;;  %v2853_v5 = vpop.xlane.xlu1 %2852  ;;  %v2866_v37 = vsub.f32 %v11397_v10, %v2856_v28 }
 0x8c5   :  { %v2865_v61 = vsub.f32 %v2730_v36, %v2853_v5 }
 0x8c6   :  { %v2880_v4 = vmul.f32 1.442695, %v2866_v37 }
 0x8c7   :  { %v2878_v32 = vmul.f32 1.442695, %v2865_v61  ;;  %v3125_v36 = vpop.permute.xlu0 %3124 }
 0x8c8   :  { %v3173_v10 = vpop.permute.xlu1 %3172 }
 0x8c9   :  { %10195 = vpow2.f32 %v2878_v32 }
 0x8ca   :  { %v11433_v0 = vpop.eup %10191  ;;  %10197 = vpow2.f32 %v2880_v4  ;;  %v3178_v4 = vsel %vm1166_vm3, %v3173_v10, 0 }
 0x8cb   :  { %v2893_v8 = vsel %vm698_vm2, %v11433_v0, 0.0 }
 0x8cc   :  { %2894 = vadd.xlane.f32.xlu1 %v2893_v8 }
 0x8ce   :  { %v11437_v55 = vpop.eup %10193 }
 0x8cf   :  { %v2896_v17 = vsel %vm698_vm2, %v11437_v55, 0.0 }
 0x8d0   :  { %2897 = vadd.xlane.f32.xlu0 %v2896_v17 }
 0x8d3   :  { %v11446_v38 = vpop.eup %10195 }
 0x8d4   :  { %v2899_v60 = vsel %vm698_vm2, %v11446_v38, 0.0  ;;  %v11450_v33 = vpop.eup %10197 }
 0x8d5   :  { %v2902_v50 = vsel %vm698_vm2, %v11450_v33, 0.0 }
 0x8dd   :  { %3268 = vrot.lane.b32.xlu1 %v11124_v63, %s10424_s18 }
 0x8e6   :  { %3220 = vrot.lane.b32.xlu0 %v11092_v49, %s10424_s18 }
 0x8f8   :  { %v2859_v8 = vpop.xlane.xlu1 %2858 }
 0x8f9   :  { %v2867_v17 = vsub.f32 %v11410_v9, %v2859_v8  ;;  %v3034_v9 = vsel %vm1166_vm3, %v3029_v29, 0  ;;  %v3130_v29 = vsel %vm1166_vm3, %v3125_v36, 0 }
 0x8fb   :  { %v2882_v61 = vmul.f32 1.442695, %v2867_v17 }
 0x901   :  { %2900 = vadd.xlane.f32.xlu1 %v2899_v60 }
 0x905   :  { %2903 = vadd.xlane.f32.xlu0 %v2902_v50 }
 0x912   :  { %3368 = vrot.lane.b32.xlu1 %v10846_v20, %s10425_s19 }
 0x91b   :  { %3318 = vrot.lane.b32.xlu0 %v10831_v26, %s10425_s19 }
 0x91f   :  { %3316 = vrot.lane.b32.xlu0 %v10851_v42, %s10425_s19 }
 0x920   :  { %v2886_v5 = vpop.xlane.xlu0 %2885 }
 0x921   :  { %10199 = vrcp.f32 %v2886_v5 }
 0x922   :  { %10201 = vpow2.f32 %v2882_v61 }
 0x923   :  { %3418 = vrot.lane.b32.xlu0 %v10829_v22, %s10425_s19  ;;  %v13181_v22 = vmov 0.0  }
 0x927   :  { %3416 = vrot.lane.b32.xlu0 %v10849_v1, %s10425_s19 }
 0x928   :  { %v2892_v20 = vpop.xlane.xlu0 %2891 }
 0x929   :  { %10203 = vrcp.f32 %v2892_v20 }
 0x92b   :  { %v10200_v26 = vpop.eup %10199  ;;  %3518 = vrot.lane.b32.xlu0 %v10875_v53, %s10425_s19 }
 0x92c   :  { %v2916_v42 = vmul.f32 %v10200_v26, %v11418_v11  ;;  %v11474_v1 = vpop.eup %10201 }
 0x92e   :  { %v2924_v28 = vpack.c.bf16 %v2916_v42, %v2916_v42 }
 0x92f   :  { %3516 = vrot.lane.b32.xlu0 %v10908_v21, %s10425_s19  ;;  %v2905_v21 = vsel %vm698_vm2, %v11474_v1, 0.0 }
 0x930   :  { %9364 = vmatmul.mubr.msk.bf16.vlgmr.msra.gmra.mrb[88].mxu0 %vm698_vm2, %v2924_v28 }
 0x931   :  { %9374 = vmatpush3.bf16.msra.mxu0 %v3034_v9  ;;  %9375 = vmatprep.mubr.msk.bf16.mxu0 %vm10422_vm1, %v13181_v22 }
 0x932   :  { %9385 = vmatprep.subr.bf16.mxu0 %v13181_v22 }
 0x933   :  { %v10204_v32 = vpop.eup %10203  ;;  %3618 = vrot.lane.b32.xlu0 %v10895_v35, %s10425_s19 }
 0x934   :  { %v2918_v53 = vmul.f32 %v10204_v32, %v11422_v43 }
 0x936   :  { %2906 = vadd.xlane.f32.xlu1 %v2905_v21  ;;  %v2926_v11 = vpack.c.bf16 %v2918_v53, %v2918_v53 }
 0x937   :  { %3616 = vrot.lane.b32.xlu0 %v10936_v18, %s10425_s19 }
 0x938   :  { %9376 = vmatmul.mubr.msk.bf16.vlgmr.msra.gmra.mrb[92].mxu0 %vm698_vm2, %v2926_v11 }
 0x939   :  { %9386 = vmatpush3.bf16.msra.mxu0 %v3130_v29  ;;  %9387 = vmatprep.mubr.msk.bf16.mxu0 %vm10422_vm1, %v13181_v22 }
 0x93a   :  { %9397 = vmatprep.subr.bf16.mxu0 %v13181_v22 }
 0x947   :  { %3366 = vrot.lane.b32.xlu1 %v10873_v23, %s10425_s19 }
 0x94b   :  { %3468 = vrot.lane.b32.xlu1 %v10868_v51, %s10425_s19 }
 0x94f   :  { %3466 = vrot.lane.b32.xlu1 %v10910_v6, %s10425_s19 }
 0x951   :  { %v2889_v35 = vpop.xlane.xlu1 %2888 }
 0x952   :  { %10205 = vrcp.f32 %v2889_v35 }
 0x953   :  { %3568 = vrot.lane.b32.xlu1 %v10897_v2, %s10425_s19  ;;  %v3082_v2 = vsel %vm1166_vm3, %v11426_v46, 0 }
 0x957   :  { %3566 = vrot.lane.b32.xlu1 %v10938_v31, %s10425_s19 }
 0x959   :  { %v2895_v18 = vpop.xlane.xlu1 %2894 }
 0x95a   :  { %10207 = vrcp.f32 %v2895_v18 }
 0x95b   :  { %3668 = vrot.lane.b32.xlu1 %v10934_v15, %s10425_s19 }
 0x95c   :  { %v10206_v23 = vpop.eup %10205 }
 0x95d   :  { %v2898_v43 = vpop.xlane.xlu0 %2897  ;;  %v2917_v51 = vmul.f32 %v10206_v23, %v11429_v57 }
 0x95e   :  { %10209 = vrcp.f32 %v2898_v43 }
 0x95f   :  { %3666 = vrot.lane.b32.xlu1 %v10959_v56, %s10425_s19  ;;  %v2925_v6 = vpack.c.bf16 %v2917_v51, %v2917_v51 }
 0x961   :  { %9370 = vmatmul.mubr.msk.bf16.vlgmr.msra.gmra.mrb[96].mxu1 %vm698_vm2, %v2925_v6  ;;  %v3221_v46 = vpop.permute.xlu0 %3220 }
 0x962   :  { %9380 = vmatpush3.bf16.msra.mxu1 %v3082_v2  ;;  %9381 = vmatprep.mubr.msk.bf16.mxu1 %vm10422_vm1, %v13181_v22  ;;  %v3226_v50 = vsel %vm1166_vm3, %v3221_v46, 0 }
 0x963   :  { %9391 = vmatprep.subr.bf16.mxu1 %v13181_v22 }
 0x964   :  { %v10208_v15 = vpop.eup %10207 }
 0x965   :  { %v2919_v31 = vmul.f32 %v10208_v15, %v11433_v0  ;;  %v3269_v0 = vpop.permute.xlu1 %3268 }
 0x966   :  { %v3274_v26 = vsel %vm1166_vm3, %v3269_v0, 0 }
 0x967   :  { %v2927_v57 = vpack.c.bf16 %v2919_v31, %v2919_v31 }
 0x968   :  { %v10210_v37 = vpop.eup %10209 }
 0x969   :  { %9382 = vmatmul.mubr.msk.bf16.vlgmr.msra.gmra.mrb[100].mxu1 %vm698_vm2, %v2927_v57  ;;  %v2920_v56 = vmul.f32 %v10210_v37, %v11437_v55 }
 0x96a   :  { %9392 = vmatpush3.bf16.msra.mxu1 %v3178_v4  ;;  %9393 = vmatprep.mubr.msk.bf16.mxu1 %vm10422_vm1, %v13181_v22 }
 0x96b   :  { %v2928_v60 = vpack.c.bf16 %v2920_v56, %v2920_v56  ;;  %9403 = vmatprep.subr.bf16.mxu1 %v13181_v22 }
 0x96d   :  { %9388 = vmatmul.mubr.msk.bf16.vlgmr.msra.gmra.mrb[96].mxu0 %vm698_vm2, %v2928_v60 }
 0x96e   :  { %9398 = vmatpush3.bf16.msra.mxu0 %v3226_v50  ;;  %9399 = vmatprep.mubr.msk.bf16.mxu0 %vm10422_vm1, %v13181_v22 }
 0x96f   :  { %9409 = vmatprep.subr.bf16.mxu0 %v13181_v22 }
 0x98e   :  { %v2901_v55 = vpop.xlane.xlu1 %2900 }
 0x98f   :  { %10211 = vrcp.f32 %v2901_v55 }
 0x992   :  { %v2904_v10 = vpop.xlane.xlu0 %2903  ;;  %v3369_v18 = vpop.permute.xlu1 %3368 }
 0x993   :  { %10213 = vrcp.f32 %v2904_v10  ;;  %v3374_v57 = vsel %vm698_vm2, %v3369_v18, 0 }
 0x996   :  { %v3319_v36 = vpop.permute.xlu0 %3318 }
 0x997   :  { %v3324_v32 = vsel %vm698_vm2, %v3319_v36, 0 }
 0x999   :  { %v10212_v8 = vpop.eup %10211 }
 0x99a   :  { %v3317_v17 = vpop.permute.xlu0 %3316  ;;  %v2921_v5 = vmul.f32 %v10212_v8, %v11446_v38 }
 0x99c   :  { %v2929_v61 = vpack.c.bf16 %v2921_v5, %v2921_v5 }
 0x99d   :  { %v10214_v20 = vpop.eup %10213 }
 0x99e   :  { %9394 = vmatmul.mubr.msk.bf16.vlgmr.msra.gmra.mrb[104].mxu1 %vm698_vm2, %v2929_v61  ;;  %v2922_v42 = vmul.f32 %v10214_v20, %v11450_v33  ;;  %v3419_v28 = vpop.permute.xlu0 %3418 }
 0x99f   :  { %9404 = vmatpush3.bf16.msra.mxu1 %v3274_v26  ;;  %9405 = vmatprep.mubr.msk.bf16.mxu1 %vm10422_vm1, %v13181_v22  ;;  %v3424_v33 = vsel %vm698_vm2, %v3419_v28, 0 }
 0x9a0   :  { %v2930_v9 = vpack.c.bf16 %v2922_v42, %v2922_v42  ;;  %9415 = vmatprep.subr.bf16.mxu1 %v13181_v22 }
 0x9a2   :  { %9400 = vmatmul.mubr.msk.bf16.vlgmr.msra.gmra.mrb[100].mxu0 %vm698_vm2, %v2930_v9  ;;  %v3417_v38 = vpop.permute.xlu0 %3416 }
 0x9a3   :  { %9410 = vmatpush3.bf16.xpose.msra.mxu0 %v3324_v32  ;;  %9411 = vmatprep.mubr.msk.bf16.mxu0 %vm10422_vm1, %v13181_v22 }
 0x9a4   :  { %9421 = vmatprep.subr.bf16.mxu0 %v13181_v22 }
 0x9a6   :  { %v3519_v53 = vpop.permute.xlu0 %3518 }
 0x9a7   :  { %v3524_v11 = vsel %vm698_vm2, %v3519_v53, 0 }
 0x9aa   :  { %9412 = vmatmul.mubr.msk.bf16.vlgmr.msra.gmra.mrb[104].mxu0 %vm698_vm2, %v3317_v17  ;;  %v3517_v21 = vpop.permute.xlu0 %3516 }
 0x9ab   :  { %9422 = vmatpush3.bf16.xpose.msra.mxu0 %v3424_v33  ;;  %9423 = vmatprep.mubr.msk.bf16.mxu0 %vm10422_vm1, %v13181_v22 }
 0x9ac   :  { %9433 = vmatprep.subr.bf16.mxu0 %v13181_v22 }
 0x9ae   :  { %v3619_v29 = vpop.permute.xlu0 %3618 }
 0x9af   :  { %v3624_v35 = vsel %vm698_vm2, %v3619_v29, 0 }
 0x9b2   :  { %9424 = vmatmul.mubr.msk.bf16.vlgmr.msra.gmra.mrb[108].mxu0 %vm698_vm2, %v3417_v38  ;;  %v3617_v23 = vpop.permute.xlu0 %3616 }
 0x9b3   :  { %9434 = vmatpush3.bf16.xpose.msra.mxu0 %v3524_v11  ;;  %9435 = vmatprep.mubr.msk.bf16.mxu0 %vm10422_vm1, %v13181_v22 }
 0x9b4   :  { %9445 = vmatprep.subr.bf16.mxu0 %v13181_v22 }
 0x9ba   :  { %9436 = vmatmul.mubr.msk.bf16.vlgmr.msra.gmra.mrb[112].mxu0 %vm698_vm2, %v3517_v21 }
 0x9bb   :  { %9446 = vmatpush3.bf16.xpose.msra.mxu0 %v3624_v35  ;;  %9447 = vmatprep.mubr.msk.bf16.mxu0 %vm10422_vm1, %v13181_v22 }
 0x9bc   :  { %9457 = vmatprep.subr.bf16.mxu0 %v13181_v22 }
 0x9c2   :  { %9448 = vmatmul.mubr.msk.bf16.vlgmr.msra.gmra.mrb[116].mxu0 %vm698_vm2, %v3617_v23 }
 0x9c3   :  { %v2907_v43 = vpop.xlane.xlu1 %2906  ;;  %9459 = vmatprep.mubr.msk.bf16.mxu0 %vm10422_vm1, %v13181_v22 }
 0x9c4   :  { %10215 = vrcp.f32 %v2907_v43 }
 0x9c7   :  { %v3367_v51 = vpop.permute.xlu1 %3366 }
 0x9cb   :  { %v3469_v15 = vpop.permute.xlu1 %3468 }
 0x9cc   :  { %v3474_v4 = vsel %vm698_vm2, %v3469_v15, 0 }
 0x9ce   :  { %v10216_v6 = vpop.eup %10215 }
 0x9cf   :  { %v2923_v2 = vmul.f32 %v10216_v6, %v11474_v1  ;;  %v3467_v37 = vpop.permute.xlu1 %3466 }
 0x9d1   :  { %v2931_v31 = vpack.c.bf16 %v2923_v2, %v2923_v2 }
 0x9d3   :  { %9406 = vmatmul.mubr.msk.bf16.vlgmr.msra.gmra.mrb[108].mxu1 %vm698_vm2, %v2931_v31  ;;  %v3569_v56 = vpop.permute.xlu1 %3568 }
 0x9d4   :  { %9416 = vmatpush3.bf16.xpose.msra.mxu1 %v3374_v57  ;;  %9417 = vmatprep.mubr.msk.bf16.mxu1 %vm10422_vm1, %v13181_v22  ;;  %v3574_v46 = vsel %vm698_vm2, %v3569_v56, 0 }
 0x9d5   :  { %9427 = vmatprep.subr.bf16.mxu1 %v13181_v22 }
 0x9d7   :  { %v3567_v1 = vpop.permute.xlu1 %3566 }
 0x9db   :  { %9418 = vmatmul.mubr.msk.bf16.vlgmr.msra.gmra.mrb[112].mxu1 %vm698_vm2, %v3367_v51  ;;  %v3669_v60 = vpop.permute.xlu1 %3668 }
 0x9dc   :  { %9428 = vmatpush3.bf16.xpose.msra.mxu1 %v3474_v4  ;;  %9429 = vmatprep.mubr.msk.bf16.mxu1 %vm10422_vm1, %v13181_v22  ;;  %v3674_v50 = vsel %vm698_vm2, %v3669_v60, 0 }
 0x9dd   :  { %9439 = vmatprep.subr.bf16.mxu1 %v13181_v22 }
 0x9df   :  { %v3667_v0 = vpop.permute.xlu1 %3666 }
 0x9e3   :  { %9430 = vmatmul.mubr.msk.bf16.vlgmr.msra.gmra.mrb[116].mxu1 %vm698_vm2, %v3467_v37 }
 0x9e4   :  { %9440 = vmatpush3.bf16.xpose.msra.mxu1 %v3574_v46  ;;  %9441 = vmatprep.mubr.msk.bf16.mxu1 %vm10422_vm1, %v13181_v22 }
 0x9e5   :  { %9451 = vmatprep.subr.bf16.mxu1 %v13181_v22 }
 0x9eb   :  { %9442 = vmatmul.mubr.msk.bf16.vlgmr.msra.gmra.mrb[120].mxu1 %vm698_vm2, %v3567_v1 }
 0x9ec   :  { %9452 = vmatpush3.bf16.xpose.msra.mxu1 %v3674_v50  ;;  %9453 = vmatprep.mubr.msk.bf16.mxu1 %vm10422_vm1, %v13181_v22 }
 0x9ed   :  { %9463 = vmatprep.subr.bf16.mxu1 %v13181_v22 }
 0x9f3   :  { %9454 = vmatmul.mubr.msk.bf16.vlgmr.msra.gmra.mrb[124].mxu1 %vm698_vm2, %v3667_v0 }
 0x9f4   :  { %9465 = vmatprep.mubr.msk.bf16.mxu1 %vm10422_vm1, %v13181_v22 }
 0xa03   :  { %v11576_v55 = vpop.f32.mrb[88].mxu0 }
 0xa04   :  { %v9365_v10 = vpop.f32.mrb[89].mxu0 }
 0xa05   :  { %v2977_v36 = vpop.f32.mrb[90].mxu0 }
 0xa06   :  { %v9366_v8 = vpop.f32.mrb[91].mxu0 }
 0xa0b   :  { %v11578_v17 = vpop.f32.mrb[92].mxu0 }
 0xa0c   :  { %v9377_v5 = vpop.f32.mrb[93].mxu0 }
 0xa0d   :  { %v3073_v61 = vpop.f32.mrb[94].mxu0 }
 0xa0e   :  { %v9378_v20 = vpop.f32.mrb[95].mxu0 }
 0xa34   :  { %v11580_v26 = vpop.f32.mrb[96].mxu1 }
 0xa35   :  { %v9971_v42 = vpack.i.bf16 %v11580_v26, %v11576_v55  ;;  %v9371_v28 = vpop.f32.mrb[97].mxu1 }
 0xa36   :  { %v3025_v9 = vpop.f32.mrb[98].mxu1 }
 0xa37   :  { %v9372_v32 = vpop.f32.mrb[99].mxu1 }
 0xa3c   :  { %v11584_v38 = vpop.f32.mrb[100].mxu1 }
 0xa3d   :  { %v9976_v33 = vpack.i.bf16 %v11584_v38, %v11578_v17  ;;  %v9383_v53 = vpop.f32.mrb[101].mxu1 }
 0xa3e   :  { %v3121_v21 = vpop.f32.mrb[102].mxu1 }
 0xa3f   :  { %v9384_v11 = vpop.f32.mrb[103].mxu1 }
 0xa40   :  { %v11588_v29 = vpop.f32.mrb[96].mxu0 }
 0xa41   :  { %v9389_v35 = vpop.f32.mrb[97].mxu0 }
 0xa42   :  { %v3169_v18 = vpop.f32.mrb[98].mxu0 }
 0xa43   :  { %v9390_v23 = vpop.f32.mrb[99].mxu0 }
 0xa71   :  { %v11590_v43 = vpop.f32.mrb[104].mxu1 }
 0xa72   :  { %v10001_v51 = vpack.i.bf16 %v11590_v43, %v11588_v29  ;;  %v9395_v6 = vpop.f32.mrb[105].mxu1 }
 0xa73   :  { %v3217_v2 = vpop.f32.mrb[106].mxu1 }
 0xa74   :  { %v9396_v15 = vpop.f32.mrb[107].mxu1 }
 0xa75   :  { %v11594_v31 = vpop.f32.mrb[100].mxu0 }
 0xa76   :  { %v9401_v57 = vpop.f32.mrb[101].mxu0 }
 0xa77   :  { %v3265_v37 = vpop.f32.mrb[102].mxu0 }
 0xa78   :  { %v9402_v4 = vpop.f32.mrb[103].mxu0 }
 0xa7d   :  { %v3360_v56 = vpop.f32.mrb[104].mxu0 }
 0xa7e   :  { %v9413_v1 = vpop.f32.mrb[105].mxu0  ;;  %v3716_v46 = vsel %vm698_vm2, %v3360_v56, -inf }
 0xa7f   :  { %3717 = vmax.xlane.f32.xlu0 %v3716_v46  ;;  %v3363_v60 = vpop.f32.mrb[106].mxu0 }
 0xa80   :  { %v9414_v50 = vpop.f32.mrb[107].mxu0 }
 0xa85   :  { %v3460_v0 = vpop.f32.mrb[108].mxu0 }
 0xa86   :  { %v9425_v10 = vpop.f32.mrb[109].mxu0  ;;  %v3722_v36 = vsel %vm698_vm2, %v3460_v0, -inf }
 0xa87   :  { %3723 = vmax.xlane.f32.xlu0 %v3722_v36  ;;  %v3463_v8 = vpop.f32.mrb[110].mxu0 }
 0xa88   :  { %v9426_v5 = vpop.f32.mrb[111].mxu0 }
 0xa8d   :  { %v11598_v61 = vpop.f32.mrb[112].mxu0 }
 0xa8e   :  { %v9437_v20 = vpop.f32.mrb[113].mxu0  ;;  %v3728_v8 = vsel %vm698_vm2, %v11598_v61, -inf }
 0xa8f   :  { %v3563_v28 = vpop.f32.mrb[114].mxu0 }
 0xa90   :  { %v9438_v9 = vpop.f32.mrb[115].mxu0 }
 0xa95   :  { %v11600_v32 = vpop.f32.mrb[116].mxu0 }
 0xa96   :  { %v9449_v53 = vpop.f32.mrb[117].mxu0  ;;  %v3734_v9 = vsel %vm698_vm2, %v11600_v32, -inf }
 0xa97   :  { %v3663_v21 = vpop.f32.mrb[118].mxu0 }
 0xa98   :  { %v9450_v11 = vpop.f32.mrb[119].mxu0 }
 0xaa6   :  { %v11602_v35 = vpop.f32.mrb[108].mxu1 }
 0xaa7   :  { %v10006_v18 = vpack.i.bf16 %v11602_v35, %v11594_v31  ;;  %v9407_v23 = vpop.f32.mrb[109].mxu1 }
 0xaa8   :  { %v3313_v6 = vpop.f32.mrb[110].mxu1 }
 0xaa9   :  { %v9408_v2 = vpop.f32.mrb[111].mxu1 }
 0xaae   :  { %v3410_v15 = vpop.f32.mrb[112].mxu1 }
 0xaaf   :  { %v9419_v57 = vpop.f32.mrb[113].mxu1  ;;  %v3719_v37 = vsel %vm698_vm2, %v3410_v15, -inf }
 0xab0   :  { %3720 = vmax.xlane.f32.xlu1 %v3719_v37  ;;  %v3413_v4 = vpop.f32.mrb[114].mxu1 }
 0xab1   :  { %v9420_v1 = vpop.f32.mrb[115].mxu1 }
 0xab6   :  { %v11607_v46 = vpop.f32.mrb[116].mxu1 }
 0xab7   :  { %v9431_v60 = vpop.f32.mrb[117].mxu1  ;;  %v3725_v50 = vsel %vm698_vm2, %v11607_v46, -inf }
 0xab8   :  { %v3513_v10 = vpop.f32.mrb[118].mxu1  ;;  %3726 = vmax.xlane.f32.xlu0 %v3725_v50 }
 0xab9   :  { %v9432_v36 = vpop.f32.mrb[119].mxu1 }
 0xabc   :  { %3729 = vmax.xlane.f32.xlu0 %v3728_v8 }
 0xabe   :  { %v11613_v5 = vpop.f32.mrb[120].mxu1 }
 0xabf   :  { %v9443_v20 = vpop.f32.mrb[121].mxu1  ;;  %v3731_v28 = vsel %vm698_vm2, %v11613_v5, -inf }
 0xac0   :  { %3732 = vmax.xlane.f32.xlu1 %v3731_v28  ;;  %v3613_v53 = vpop.f32.mrb[122].mxu1  ;;  %3735 = vmax.xlane.f32.xlu0 %v3734_v9 }
 0xac1   :  { %v9444_v21 = vpop.f32.mrb[123].mxu1 }
 0xac6   :  { %v11619_v11 = vpop.f32.mrb[124].mxu1 }
 0xac7   :  { %v9455_v23 = vpop.f32.mrb[125].mxu1  ;;  %v3737_v57 = vsel %vm698_vm2, %v11619_v11, -inf }
 0xac8   :  { %v3713_v6 = vpop.f32.mrb[126].mxu1 }
 0xac9   :  { %v9456_v2 = vpop.f32.mrb[127].mxu1 }
 0xad1   :  { %3860 = vrot.lane.b32.xlu1 %v10957_v30, %s10425_s19 }
 0xad5   :  { %3908 = vrot.lane.b32.xlu1 %v11046_v7, %s10425_s19 }
 0xad6   :  { %3812 = vrot.lane.b32.xlu0 %v10932_v54, %s10425_s19 }
 0xaf9   :  { %3738 = vmax.xlane.f32.xlu1 %v3737_v57 }
 0xb0a   :  { %3956 = vrot.lane.b32.xlu1 %v11064_v16, %s10425_s19 }
 0xb0c   :  { %v3718_v37 = vpop.xlane.xlu0 %3717 }
 0xb0d   :  { %v3740_v4 = vsub.f32 %v3360_v56, %v3718_v37 }
 0xb0f   :  { %v3748_v1 = vmul.f32 1.442695, %v3740_v4 }
 0xb11   :  { %10217 = vpow2.f32 %v3748_v1 }
 0xb14   :  { %v3724_v60 = vpop.xlane.xlu0 %3723 }
 0xb15   :  { %v3742_v50 = vsub.f32 %v3460_v0, %v3724_v60 }
 0xb17   :  { %v3752_v30 = vmul.f32 1.442695, %v3742_v50 }
 0xb19   :  { %10219 = vpow2.f32 %v3752_v30 }
 0xb1b   :  { %v11631_v10 = vpop.eup %10217 }
 0xb1c   :  { %v3764_v54 = vsel %vm698_vm2, %v11631_v10, 0.0 }
 0xb1d   :  { %3765 = vadd.xlane.f32.xlu0 %v3764_v54 }
 0xb23   :  { %v11635_v7 = vpop.eup %10219 }
 0xb24   :  { %v3770_v36 = vsel %vm698_vm2, %v11635_v7, 0.0 }
 0xb25   :  { %3771 = vadd.xlane.f32.xlu0 %v3770_v36 }
 0xb3b   :  { %4004 = vrot.lane.b32.xlu0 %v11066_v27, %s10425_s19 }
 0xb3d   :  { %v3721_v16 = vpop.xlane.xlu1 %3720 }
 0xb3e   :  { %v3741_v56 = vsub.f32 %v3410_v15, %v3721_v16  ;;  %v13182_v16 = vpack.i.bf16 %v11377_v58, %v11365_v13 }
 0xb40   :  { %v3750_v0 = vmul.f32 1.442695, %v3741_v56 }
 0xb42   :  { %10221 = vpow2.f32 %v3750_v0 }
 0xb45   :  { %v3727_v8 = vpop.xlane.xlu0 %3726 }
 0xb46   :  { %v3743_v50 = vsub.f32 %v11607_v46, %v3727_v8  ;;  %v13183_v8 = vpack.i.bf16 %v11381_v59, %v11372_v41 }
 0xb48   :  { %v3754_v30 = vmul.f32 1.442695, %v3743_v50 }
 0xb49   :  { %v3730_v20 = vpop.xlane.xlu0 %3729 }
 0xb4a   :  { %v3744_v28 = vsub.f32 %v11598_v61, %v3730_v20 }
 0xb4c   :  { %v11642_v9 = vpop.eup %10221  ;;  %v3756_v53 = vmul.f32 1.442695, %v3744_v28 }
 0xb4d   :  { %v3733_v21 = vpop.xlane.xlu1 %3732  ;;  %v3736_v23 = vpop.xlane.xlu0 %3735  ;;  %v3767_v6 = vsel %vm698_vm2, %v11642_v9, 0.0 }
 0xb4e   :  { %10223 = vpow2.f32 %v3756_v53  ;;  %v3746_v2 = vsub.f32 %v11600_v32, %v3736_v23  ;;  %3768 = vadd.xlane.f32.xlu1 %v3767_v6  ;;  %v3745_v54 = vsub.f32 %v11613_v5, %v3733_v21 }
 0xb50   :  { %v3760_v27 = vmul.f32 1.442695, %v3746_v2  ;;  %v3758_v36 = vmul.f32 1.442695, %v3745_v54 }
 0xb51   :  { %v3861_v15 = vpop.permute.xlu1 %3860  ;;  %v3813_v57 = vpop.permute.xlu0 %3812 }
 0xb52   :  { %v3866_v37 = vsel %vm1166_vm3, %v3861_v15, 0  ;;  %v3818_v4 = vsel %vm1166_vm3, %v3813_v57, 0  ;;  %10225 = vpow2.f32 %v3760_v27 }
 0xb53   :  { %9458 = vmatpush3.bf16.msra.mxu0 %v3818_v4  ;;  %9464 = vmatpush3.bf16.msra.mxu1 %v3866_v37  ;;  %10227 = vpow2.f32 %v3754_v30 }
 0xb54   :  { %9469 = vmatprep.subr.bf16.mxu0 %v13181_v22  ;;  %9475 = vmatprep.subr.bf16.mxu1 %v13181_v22  ;;  %10229 = vpow2.f32 %v3758_v36 }
 0xb55   :  { %v3909_v46 = vpop.permute.xlu1 %3908 }
 0xb58   :  { %v11651_v61 = vpop.eup %10223 }
 0xb59   :  { %v3776_v32 = vsel %vm698_vm2, %v11651_v61, 0.0 }
 0xb5a   :  { %3777 = vadd.xlane.f32.xlu0 %v3776_v32 }
 0xb5c   :  { %v11655_v1 = vpop.eup %10225 }
 0xb5d   :  { %v3782_v60 = vsel %vm698_vm2, %v11655_v1, 0.0 }
 0xb5e   :  { %3783 = vadd.xlane.f32.xlu0 %v3782_v60 }
 0xb5f   :  { %4052 = vrot.lane.b32.xlu1 %v11088_v45, %s10425_s19  ;;  %v11673_v45 = vpop.eup %10227 }
 0xb60   :  { %v3773_v5 = vsel %vm698_vm2, %v11673_v45, 0.0 }
 0xb74   :  { %4100 = vrot.lane.b32.xlu0 %v11092_v49, %s10425_s19  ;;  %v11677_v49 = vpop.eup %10229 }
 0xb75   :  { %v3779_v13 = vsel %vm698_vm2, %v11677_v49, 0.0 }
 0xb78   :  { %9962 = vrot.lane.b32.xlu0 %v13182_v16, %s10426_s20 }
 0xb7c   :  { %9972 = vrot.lane.b32.xlu0 %v9971_v42, %s10427_s21 }
 0xb83   :  { %3774 = vadd.xlane.f32.xlu1 %v3773_v5 }
 0xb86   :  { %v3739_v56 = vpop.xlane.xlu1 %3738 }
 0xb87   :  { %v3747_v58 = vsub.f32 %v11619_v11, %v3739_v56  ;;  %3780 = vadd.xlane.f32.xlu1 %v3779_v13 }
 0xb89   :  { %v3762_v0 = vmul.f32 1.442695, %v3747_v58 }
 0xb8b   :  { %10231 = vpow2.f32 %v3762_v0 }
 0xb95   :  { %v11682_v55 = vpop.eup %10231 }
 0xb96   :  { %v3785_v26 = vsel %vm698_vm2, %v11682_v55, 0.0 }
 0xb97   :  { %3786 = vadd.xlane.f32.xlu1 %v3785_v26 }
 0xba8   :  { %4148 = vrot.lane.b32.xlu1 %v11124_v63, %s10425_s19  ;;  %v3914_v63 = vsel %vm1166_vm3, %v3909_v46, 0 }
 0xbaa   :  { %v3766_v42 = vpop.xlane.xlu0 %3765 }
 0xbab   :  { %10233 = vrcp.f32 %v3766_v42  ;;  %v10393_v42 = vld [vmem:[%s13159_s6] sm:$0xff]  }
 0xbac   :  { %9967 = vrot.lane.b32.xlu1 %v13183_v8, %s10426_s20 }
 0xbb0   :  { %9977 = vrot.lane.b32.xlu1 %v9976_v33, %s10427_s21 }
 0xbb2   :  { %v3772_v11 = vpop.xlane.xlu0 %3771 }
 0xbb3   :  { %10235 = vrcp.f32 %v3772_v11 }
 0xbb5   :  { %v10234_v20 = vpop.eup %10233 }
 0xbb6   :  { %v3796_v28 = vmul.f32 %v10234_v20, %v11631_v10  ;;  %v4005_v17 = vpop.permute.xlu0 %4004  ;;  %v3957_v10 = vpop.permute.xlu1 %3956  ;;  %v10394_v20 = vld [vmem:[%s13159_s6 + $0x8] sm:$0xff]  }
 0xbb7   :  { %v4010_v33 = vsel %vm1166_vm3, %v4005_v17, 0  ;;  %v3962_v27 = vsel %vm1166_vm3, %v3957_v10, 0 }
 0xbb8   :  { %v3804_v53 = vpack.c.bf16 %v3796_v28, %v3796_v28  ;;  %v10395_v28 = vld [vmem:[%s13161_s8] sm:$0xff]  }
 0xbba   :  { %9460 = vmatmul.mubr.msk.bf16.vlgmr.msra.gmra.mrb[120].mxu0 %vm698_vm2, %v3804_v53 }
 0xbbb   :  { %9470 = vmatpush3.bf16.msra.mxu0 %v3914_v63  ;;  %9471 = vmatprep.mubr.msk.bf16.mxu0 %vm10422_vm1, %v13181_v22 }
 0xbbc   :  { %9481 = vmatprep.subr.bf16.mxu0 %v13181_v22 }
 0xbbd   :  { %v10236_v41 = vpop.eup %10235 }
 0xbbe   :  { %v3798_v59 = vmul.f32 %v10236_v41, %v11635_v7 }
 0xbc0   :  { %v3806_v38 = vpack.c.bf16 %v3798_v59, %v3798_v59 }
 0xbc2   :  { %9472 = vmatmul.mubr.msk.bf16.vlgmr.msra.gmra.mrb[124].mxu0 %vm698_vm2, %v3806_v38 }
 0xbc3   :  { %9482 = vmatpush3.bf16.msra.mxu0 %v4010_v33  ;;  %9483 = vmatprep.mubr.msk.bf16.mxu0 %vm10422_vm1, %v13181_v22 }
 0xbc4   :  { %9493 = vmatprep.subr.bf16.mxu0 %v13181_v22 }
 0xbdb   :  { %v3769_v21 = vpop.xlane.xlu1 %3768 }
 0xbdc   :  { %10237 = vrcp.f32 %v3769_v21  ;;  %v10087_v21 = vld [vmem:[%s13167_s12] sm:$0xff]  }
 0xbdf   :  { %v4053_v54 = vpop.permute.xlu1 %4052 }
 0xbe0   :  { %v4058_v13 = vsel %vm1166_vm3, %v4053_v54, 0 }
 0xbe6   :  { %v10238_v23 = vpop.eup %10237 }
 0xbe7   :  { %v3778_v6 = vpop.xlane.xlu0 %3777  ;;  %v3797_v2 = vmul.f32 %v10238_v23, %v11642_v9 }
 0xbe8   :  { %10239 = vrcp.f32 %v3778_v6 }
 0xbe9   :  { %v3805_v7 = vpack.c.bf16 %v3797_v2, %v3797_v2 }
 0xbeb   :  { %9466 = vmatmul.mubr.msk.bf16.vlgmr.msra.gmra.mrb[128].mxu1 %vm698_vm2, %v3805_v7  ;;  %v3784_v15 = vpop.xlane.xlu0 %3783 }
 0xbec   :  { %9476 = vmatpush3.bf16.msra.mxu1 %v3962_v27  ;;  %9477 = vmatprep.mubr.msk.bf16.mxu1 %vm10422_vm1, %v13181_v22  ;;  %10241 = vrcp.f32 %v3784_v15 }
 0xbed   :  { %9487 = vmatprep.subr.bf16.mxu1 %v13181_v22 }
 0xbef   :  { %v4101_v4 = vpop.permute.xlu0 %4100 }
 0xbf0   :  { %v4106_v60 = vsel %vm1166_vm3, %v4101_v4, 0 }
 0xbf2   :  { %v10240_v57 = vpop.eup %10239 }
 0xbf3   :  { %v3800_v37 = vmul.f32 %v10240_v57, %v11651_v61 }
 0xbf5   :  { %v3808_v32 = vpack.c.bf16 %v3800_v37, %v3800_v37 }
 0xbf6   :  { %v10242_v9 = vpop.eup %10241 }
 0xbf7   :  { %9484 = vmatmul.mubr.msk.bf16.vlgmr.msra.gmra.mrb[128].mxu0 %vm698_vm2, %v3808_v32  ;;  %v3802_v50 = vmul.f32 %v10242_v9, %v11655_v1  ;;  %v10088_v9 = vld [vmem:[%s13167_s12 + $0x8] sm:$0xff]  }
 0xbf8   :  { %9494 = vmatpush3.bf16.msra.mxu0 %v4106_v60  ;;  %9495 = vmatprep.mubr.msk.bf16.mxu0 %vm10422_vm1, %v13181_v22 }
 0xbf9   :  { %v3810_v30 = vpack.c.bf16 %v3802_v50, %v3802_v50  ;;  %9505 = vmatprep.subr.bf16.mxu0 %v10087_v21  ;;  %v13185_v50 = vpack.i.bf16 %v11399_v19, %v11391_v44 }
 0xbff   :  { %9496 = vmatmul.mubr.msk.bf16.vlgmr.msra.gmra.mrb[132].mxu0 %vm698_vm2, %v3810_v30 }
 0xc00   :  { %9506 = vmatpush3.bf16.msra.mxu0 %v10087_v21 }
 0xc01   :  { %9507 = vmatprep.subr.bf16.mxu0 %v10088_v9 }
 0xc04   :  { %9508 = vmatpush3.bf16.msra.mxu0 %v10088_v9 }
 0xc10   :  { %v3775_v36 = vpop.xlane.xlu1 %3774 }
 0xc11   :  { %10243 = vrcp.f32 %v3775_v36 }
 0xc14   :  { %v3781_v61 = vpop.xlane.xlu1 %3780 }
 0xc15   :  { %10245 = vrcp.f32 %v3781_v61 }
 0xc1b   :  { %v10244_v16 = vpop.eup %10243 }
 0xc1c   :  { %v3799_v46 = vmul.f32 %v10244_v16, %v11673_v45 }
 0xc1e   :  { %v3807_v5 = vpack.c.bf16 %v3799_v46, %v3799_v46 }
 0xc1f   :  { %v10246_v56 = vpop.eup %10245 }
 0xc20   :  { %9478 = vmatmul.mubr.msk.bf16.vlgmr.msra.gmra.mrb[132].mxu1 %vm698_vm2, %v3807_v5  ;;  %v3801_v1 = vmul.f32 %v10246_v56, %v11677_v49 }
 0xc21   :  { %9488 = vmatpush3.bf16.msra.mxu1 %v4058_v13  ;;  %9489 = vmatprep.mubr.msk.bf16.mxu1 %vm10422_vm1, %v13181_v22 }
 0xc22   :  { %9499 = vmatprep.subr.bf16.mxu1 %v13181_v22  ;;  %v3809_v0 = vpack.c.bf16 %v3801_v1, %v3801_v1 }
 0xc24   :  { %v3787_v58 = vpop.xlane.xlu1 %3786 }
 0xc25   :  { %10247 = vrcp.f32 %v3787_v58 }
 0xc28   :  { %9490 = vmatmul.mubr.msk.bf16.vlgmr.msra.gmra.mrb[136].mxu1 %vm698_vm2, %v3809_v0  ;;  %v4149_v45 = vpop.permute.xlu1 %4148 }
 0xc29   :  { %v4154_v26 = vsel %vm1166_vm3, %v4149_v45, 0  ;;  %9501 = vmatprep.mubr.msk.bf16.mxu1 %vm10422_vm1, %v13181_v22 }
 0xc2a   :  { %9500 = vmatpush3.bf16.msra.mxu1 %v4154_v26  ;;  %v9963_v26 = vpop.permute.xlu0 %9962 }
 0xc2b   :  { %9517 = vmatprep.subr.bf16.mxu1 %v10393_v42 }
 0xc2f   :  { %v10248_v49 = vpop.eup %10247 }
 0xc30   :  { %v3803_v8 = vmul.f32 %v10248_v49, %v11682_v55  ;;  %v9965_v49 = vunpack.i.h.bf16 %v9963_v26 }
 0xc32   :  { %v3811_v11 = vpack.c.bf16 %v3803_v8, %v3803_v8  ;;  %v9964_v8 = vunpack.i.l.bf16 %v9963_v26 }
 0xc34   :  { %9502 = vmatmul.mubr.msk.bf16.vlgmr.msra.gmra.mrb[140].mxu1 %vm698_vm2, %v3811_v11 }
 0xc35   :  { %9518 = vmatpush3.bf16.msra.mxu1 %v10393_v42  ;;  %9521 = vmatprep.mubr.msk.bf16.mxu1 %vm91_vm0, %v10755_v40  ;;  %v10396_v40 = vld [vmem:[%s13161_s8 + $0x8] sm:$0xff]   ;;  %v9973_v42 = vpop.permute.xlu0 %9972 }
 0xc36   :  { %9519 = vmatprep.subr.bf16.mxu1 %v10394_v20  ;;  %v9975_v11 = vunpack.i.h.bf16 %v9973_v42 }
 0xc39   :  { %9520 = vmatpush3.bf16.msra.mxu1 %v10394_v20  ;;  %v9974_v20 = vunpack.i.l.bf16 %v9973_v42  ;;  %v13186_v42 = vld [vmem:[#allocation3_spill] sm:$0xff] }
 0xc3a   :  { %9541 = vmatprep.subr.bf16.mxu1 %v10395_v28 }
 0xc3c   :  { %9522 = vmatmul.mubr.msk.bf16.vlgmr.msra.gmra.mrb[144].mxu1 %vm91_vm0, %v10764_v48 }
 0xc3d   :  { %9525 = vmatprep.mubr.msk.bf16.mxu1 %vm91_vm0, %v10793_v47  ;;  %9542 = vmatpush3.bf16.msra.mxu1 %v10395_v28 }
 0xc3e   :  { %9543 = vmatprep.subr.bf16.mxu1 %v10396_v40 }
 0xc41   :  { %9544 = vmatpush3.bf16.msra.mxu1 %v10396_v40  ;;  %v4293_v40 = vsel %vm698_vm2, %v11176_v12, %v9965_v49 }
 0xc42   :  { %9559 = vmatprep.subr.bf16.mxu1 %v13181_v22 }
 0xc44   :  { %9526 = vmatmul.mubr.msk.bf16.gmra.mrb[148].mxu1 %vm91_vm0, %v10800_v25  ;;  %v13184_v25 = vpack.i.bf16 %v11387_v52, %v11385_v34  ;;  %v11773_v34 = vld [vmem:[%s13160_s7] sm:$0xff]  }
 0xc45   :  { %9529 = vmatprep.subr.bf16.mxu0 %v11773_v34 }
 0xc8d   :  { %v3854_v55 = vpop.f32.mrb[120].mxu0 }
 0xc8e   :  { %v9461_v53 = vpop.f32.mrb[121].mxu0 }
 0xc8f   :  { %v3857_v63 = vpop.f32.mrb[122].mxu0 }
 0xc90   :  { %v9462_v41 = vpop.f32.mrb[123].mxu0 }
 0xc95   :  { %v3950_v48 = vpop.f32.mrb[124].mxu0 }
 0xc96   :  { %v9473_v59 = vpop.f32.mrb[125].mxu0 }
 0xc97   :  { %v3953_v17 = vpop.f32.mrb[126].mxu0 }
 0xc98   :  { %v9474_v47 = vpop.f32.mrb[127].mxu0 }
 0xcbe   :  { %v3902_v38 = vpop.f32.mrb[128].mxu1 }
 0xcbf   :  { %v9981_v33 = vpack.i.bf16 %v3902_v38, %v3854_v55  ;;  %v9467_v10 = vpop.f32.mrb[129].mxu1  ;;  %v4292_v55 = vsel %vm698_vm2, %v11174_v14, %v9964_v8  ;;  %v9968_v38 = vpop.permute.xlu1 %9967  ;;  %v13187_v8 = vld [vmem:[#allocation2_spill] sm:$0xff] }
 0xcc0   :  { %v3905_v23 = vpop.f32.mrb[130].mxu1  ;;  %v4301_v41 = vsel %vm4300_vm4, %v4292_v55, %v9974_v20  ;;  %v9970_v10 = vunpack.i.h.bf16 %v9968_v38  ;;  %v9969_v12 = vunpack.i.l.bf16 %v9968_v38 }
 0xcc1   :  { %v9468_v6 = vpop.f32.mrb[131].mxu1  ;;  %9982 = vrot.lane.b32.xlu0 %v9981_v33, %s10428_s29 }
 0xcc3   :  { %v9978_v33 = vpop.permute.xlu1 %9977 }
 0xcc4   :  { %v9980_v23 = vunpack.i.h.bf16 %v9978_v33  ;;  %v9979_v14 = vunpack.i.l.bf16 %v9978_v33 }
 0xcc5   :  { %9992 = vrot.lane.b32.xlu0 %v13184_v25, %s10426_s20  ;;  %v4295_v25 = vsel %vm698_vm2, %v11180_v24, %v9970_v10  ;;  %v10398_v24 = vld [vmem:[%s13160_s7 + $0x8] sm:$0xff]   ;;  %v10399_v10 = vld [vmem:[%s13178_s23 + $0x10] sm:$0xff] }
 0xcc9   :  { %10002 = vrot.lane.b32.xlu0 %v10001_v51, %s10427_s21 }
 0xcca   :  { %v4046_v2 = vpop.f32.mrb[128].mxu0 }
 0xccb   :  { %v9485_v7 = vpop.f32.mrb[129].mxu0 }
 0xccc   :  { %v4049_v27 = vpop.f32.mrb[130].mxu0 }
 0xccd   :  { %v9486_v15 = vpop.f32.mrb[131].mxu0 }
 0xcd2   :  { %v4142_v57 = vpop.f32.mrb[132].mxu0 }
 0xcd3   :  { %v9497_v37 = vpop.f32.mrb[133].mxu0 }
 0xcd4   :  { %v4145_v4 = vpop.f32.mrb[134].mxu0 }
 0xcd5   :  { %v9498_v32 = vpop.f32.mrb[135].mxu0 }
 0xcf3   :  { %v3998_v52 = vpop.f32.mrb[132].mxu1 }
 0xcf4   :  { %v9986_v29 = vpack.i.bf16 %v3998_v52, %v3950_v48  ;;  %v9479_v43 = vpop.f32.mrb[133].mxu1  ;;  %v4302_v48 = vsel %vm4300_vm4, %v4293_v40, %v9975_v11 }
 0xcf5   :  { %v4001_v51 = vpop.f32.mrb[134].mxu1 }
 0xcf6   :  { %v9480_v60 = vpop.f32.mrb[135].mxu1  ;;  %9987 = vrot.lane.b32.xlu1 %v9986_v29, %s10428_s29 }
 0xcfa   :  { %9997 = vrot.lane.b32.xlu1 %v13185_v50, %s10426_s20 }
 0xcfb   :  { %v4094_v30 = vpop.f32.mrb[136].mxu1 }
 0xcfc   :  { %v10011_v54 = vpack.i.bf16 %v4094_v30, %v4046_v2  ;;  %v9491_v36 = vpop.f32.mrb[137].mxu1  ;;  %v4294_v2 = vsel %vm698_vm2, %v11178_v39, %v9969_v12 }
 0xcfd   :  { %v4097_v61 = vpop.f32.mrb[138].mxu1  ;;  %v4303_v15 = vsel %vm4300_vm4, %v4294_v2, %v9979_v14  ;;  %v10400_v14 = vld [vmem:[%s13178_s23] sm:$0xff]  ;;  %v10401_v2 = vld [vmem:[%s13178_s23 + $0x18] sm:$0xff] }
 0xcfe   :  { %v9492_v16 = vpop.f32.mrb[139].mxu1  ;;  %10007 = vrot.lane.b32.xlu1 %v10006_v18, %s10427_s21  ;;  %10012 = vrot.lane.b32.xlu0 %v10011_v54, %s10428_s29 }
 0xd07   :  { %v4190_v46 = vpop.f32.mrb[140].mxu1 }
 0xd08   :  { %v10016_v5 = vpack.i.bf16 %v4190_v46, %v4142_v57  ;;  %v9503_v56 = vpop.f32.mrb[141].mxu1  ;;  %v4304_v57 = vsel %vm4300_vm4, %v4295_v25, %v9980_v23 }
 0xd09   :  { %v4193_v13 = vpop.f32.mrb[142].mxu1 }
 0xd0a   :  { %v9504_v1 = vpop.f32.mrb[143].mxu1  ;;  %10017 = vrot.lane.b32.xlu1 %v10016_v5, %s10428_s29 }
 0xd0f   :  { %v11787_v44 = vpop.f32.mrb[144].mxu1 }
 0xd10   :  { %v11789_v19 = vpop.f32.mrb[145].mxu1 }
 0xd11   :  { %v11791_v58 = vpop.f32.mrb[146].mxu1 }
 0xd12   :  { %v11793_v0 = vpop.f32.mrb[147].mxu1 }
 0xd17   :  { %v11795_v45 = vpop.f32.mrb[148].mxu1 }
 0xd18   :  { %v11797_v31 = vpop.f32.mrb[149].mxu1 }
 0xd19   :  { %v11799_v35 = vpop.f32.mrb[150].mxu1 }
 0xd1a   :  { %v11801_v18 = vpop.f32.mrb[151].mxu1 }
 0xd33   :  { %v9983_v28 = vpop.permute.xlu0 %9982 }
 0xd34   :  { %v9985_v53 = vunpack.i.h.bf16 %v9983_v28  ;;  %v9984_v63 = vunpack.i.l.bf16 %v9983_v28 }
 0xd36   :  { %v4311_v59 = vsel %vm4309_vm5, %v4302_v48, %v9985_v53  ;;  %v4310_v17 = vsel %vm4309_vm5, %v4301_v41, %v9984_v63  ;;  %v8676_v48 = vld [vmem:[%s13168_s13] ss:$0 sm:$0xff] }
 0xd37   :  { %v4318_v47 = vpack.c.bf16 %v4311_v59, %v4310_v17  ;;  %v9993_v21 = vpop.permute.xlu0 %9992 }
 0xd38   :  { %v9995_v52 = vunpack.i.h.bf16 %v9993_v21  ;;  %v9994_v29 = vunpack.i.l.bf16 %v9993_v21 }
 0xd39   :  { %9509 = vmatprep.mubr.msk.bf16.mxu0 %vm91_vm0, %v4318_v47 }
 0xd3a   :  { %v4297_v60 = vsel %vm698_vm2, %v11188_v62, %v9995_v52  ;;  %v4296_v50 = vsel %vm698_vm2, %v11182_v3, %v9994_v29 }
 0xd3b   :  { %v10003_v37 = vpop.permute.xlu0 %10002 }
 0xd3c   :  { %v10005_v43 = vunpack.i.h.bf16 %v10003_v37  ;;  %v10004_v51 = vunpack.i.l.bf16 %v10003_v37 }
 0xd3e   :  { %v4305_v61 = vsel %vm4300_vm4, %v4296_v50, %v10004_v51  ;;  %v4306_v16 = vsel %vm4300_vm4, %v4297_v60, %v10005_v43 }
 0xd68   :  { %v9988_v6 = vpop.permute.xlu1 %9987 }
 0xd69   :  { %v9990_v7 = vunpack.i.h.bf16 %v9988_v6  ;;  %v9989_v27 = vunpack.i.l.bf16 %v9988_v6 }
 0xd6b   :  { %v4313_v4 = vsel %vm4309_vm5, %v4304_v57, %v9990_v7  ;;  %v4312_v32 = vsel %vm4309_vm5, %v4303_v15, %v9989_v27  ;;  %v10402_v27 = vld [vmem:[%s13178_s23 + $0x8] sm:$0xff] }
 0xd6c   :  { %v4319_v9 = vpack.c.bf16 %v4313_v4, %v4312_v32  ;;  %v9998_v30 = vpop.permute.xlu1 %9997 }
 0xd6d   :  { %v10000_v56 = vunpack.i.h.bf16 %v9998_v30  ;;  %v9999_v3 = vunpack.i.l.bf16 %v9998_v30  ;;  %v10404_v30 = vld [vmem:[%s13178_s23 + $0x20] sm:$0xff] }
 0xd6e   :  { %9510 = vmatmul.mubr.msk.bf16.vlgmr.msra.gmra.mrb[136].mxu0 %vm91_vm0, %v4319_v9 }
 0xd6f   :  { %9530 = vmatpush3.bf16.msra.mxu0 %v11773_v34  ;;  %v4299_v49 = vsel %vm698_vm2, %v13186_v42, %v10000_v56  ;;  %v4298_v11 = vsel %vm698_vm2, %v13187_v8, %v9999_v3 }
 0xd70   :  { %v10013_v39 = vpop.permute.xlu0 %10012  ;;  %9531 = vmatprep.subr.bf16.mxu0 %v10398_v24  ;;  %v10008_v62 = vpop.permute.xlu1 %10007 }
 0xd71   :  { %v10015_v54 = vunpack.i.h.bf16 %v10013_v39  ;;  %v10014_v36 = vunpack.i.l.bf16 %v10013_v39  ;;  %v10010_v13 = vunpack.i.h.bf16 %v10008_v62  ;;  %v10009_v1 = vunpack.i.l.bf16 %v10008_v62  ;;  %v10403_v39 = vld [vmem:[%s13178_s23 + $0x30] sm:$0xff] }
 0xd73   :  { %v4315_v34 = vsel %vm4309_vm5, %v4306_v16, %v10015_v54  ;;  %v4314_v46 = vsel %vm4309_vm5, %v4305_v61, %v10014_v36  ;;  %9532 = vmatpush3.bf16.msra.mxu0 %v10398_v24  ;;  %v4307_v40 = vsel %vm4300_vm4, %v4298_v11, %v10009_v1  ;;  %v4308_v55 = vsel %vm4300_vm4, %v4299_v49, %v10010_v13  ;;  %v10405_v61 = vld [vmem:[%s13178_s23 + $0x38] sm:$0xff] }
 0xd74   :  { %v4320_v5 = vpack.c.bf16 %v4315_v34, %v4314_v46  ;;  %9553 = vmatprep.subr.bf16.mxu0 %v13181_v22  ;;  %v10406_v34 = vld [vmem:[%s13178_s23 + $0x28] sm:$0xff] }
 0xd76   :  { %9513 = vmatprep.mubr.msk.bf16.mxu0 %vm91_vm0, %v4320_v5 }
 0xd7c   :  { %v10018_v26 = vpop.permute.xlu1 %10017 }
 0xd7d   :  { %v10020_v20 = vunpack.i.h.bf16 %v10018_v26  ;;  %v10019_v28 = vunpack.i.l.bf16 %v10018_v26 }
 0xd7f   :  { %v4317_v53 = vsel %vm4309_vm5, %v4308_v55, %v10020_v20  ;;  %v4316_v63 = vsel %vm4309_vm5, %v4307_v40, %v10019_v28 }
 0xd80   :  { %v4321_v41 = vpack.c.bf16 %v4317_v53, %v4316_v63 }
 0xd82   :  { %9514 = vmatmul.mubr.msk.bf16.gmra.mrb[140].mxu0 %vm91_vm0, %v4321_v41 }
 0xe41   :  { %v9511_v59 = vpop.f32.mrb[136].mxu0 }
 0xe42   :  { %v4395_v17 = vadd.f32 %v9511_v59, %v8676_v48  ;;  %v4386_v47 = vpop.f32.mrb[137].mxu0 }
 0xe43   :  { %v4387_v38 = vadd.f32 %v8676_v48, %v4386_v47  ;;  %v9512_v33 = vpop.f32.mrb[138].mxu0 }
 0xe44   :  { %v4419_v12 = vadd.f32 %v10399_v10, %v4395_v17  ;;  %v4398_v21 = vadd.f32 %v9512_v33, %v8676_v48  ;;  %v4389_v23 = vpop.f32.mrb[139].mxu0 }
 0xe45   :  { %v4417_v6 = vadd.f32 %v10400_v14, %v4387_v38  ;;  %v4390_v25 = vadd.f32 %v8676_v48, %v4389_v23 }
 0xe46   :  { %4427 = vst.msk [vmem:[%s13169_s15 + $0x10] sm:$0xff] %vm91_vm0, %v4419_v12  ;;  %v4420_v7 = vadd.f32 %v10401_v2, %v4398_v21  ;;  %v4439_v4 = vsel %vm91_vm0, %v4419_v12, 0.0 }
 0xe47   :  { %4425 = vst.msk [vmem:[%s13169_s15] sm:$0xff] %vm91_vm0, %v4417_v6  ;;  %v4418_v15 = vadd.f32 %v10402_v27, %v4390_v25  ;;  %v4433_v57 = vsel %vm91_vm0, %v4417_v6, 0.0 }
 0xe48   :  { %4428 = vst.msk [vmem:[%s13169_s15 + $0x18] sm:$0xff] %vm91_vm0, %v4420_v7  ;;  %4434 = vadd.xlane.f32.xlu0 %v4433_v57  ;;  %v4442_v32 = vsel %vm91_vm0, %v4420_v7, 0.0 }
 0xe49   :  { %4426 = vst.msk [vmem:[%s13169_s15 + $0x8] sm:$0xff] %vm91_vm0, %v4418_v15  ;;  %v4436_v37 = vsel %vm91_vm0, %v4418_v15, 0.0 }
 0xe4a   :  { %4437 = vadd.xlane.f32.xlu1 %v4436_v37 }
 0xe4c   :  { %4440 = vadd.xlane.f32.xlu0 %v4439_v4 }
 0xe50   :  { %4443 = vadd.xlane.f32.xlu0 %v4442_v32 }
 0xe55   :  { %v9515_v9 = vpop.f32.mrb[140].mxu0 }
 0xe56   :  { %v4411_v52 = vadd.f32 %v9515_v9, %v8676_v48  ;;  %v4402_v29 = vpop.f32.mrb[141].mxu0 }
 0xe57   :  { %v4403_v43 = vadd.f32 %v8676_v48, %v4402_v29  ;;  %v9516_v51 = vpop.f32.mrb[142].mxu0 }
 0xe58   :  { %v4423_v24 = vadd.f32 %v10403_v39, %v4411_v52  ;;  %v4414_v60 = vadd.f32 %v9516_v51, %v8676_v48  ;;  %v4405_v50 = vpop.f32.mrb[143].mxu0 }
 0xe59   :  { %v4421_v54 = vadd.f32 %v10404_v30, %v4403_v43  ;;  %v4406_v36 = vadd.f32 %v8676_v48, %v4405_v50 }
 0xe5a   :  { %4431 = vst.msk [vmem:[%s13169_s15 + $0x30] sm:$0xff] %vm91_vm0, %v4423_v24  ;;  %v4424_v16 = vadd.f32 %v10405_v61, %v4414_v60  ;;  %v4451_v56 = vsel %vm91_vm0, %v4423_v24, 0.0 }
 0xe5b   :  { %4429 = vst.msk [vmem:[%s13169_s15 + $0x20] sm:$0xff] %vm91_vm0, %v4421_v54  ;;  %v4422_v46 = vadd.f32 %v10406_v34, %v4406_v36  ;;  %v4445_v5 = vsel %vm91_vm0, %v4421_v54, 0.0 }
 0xe5c   :  { %4432 = vst.msk [vmem:[%s13169_s15 + $0x38] sm:$0xff] %vm91_vm0, %v4424_v16  ;;  %4446 = vadd.xlane.f32.xlu0 %v4445_v5  ;;  %v4454_v3 = vsel %vm91_vm0, %v4424_v16, 0.0 }
 0xe5d   :  { %4430 = vst.msk [vmem:[%s13169_s15 + $0x28] sm:$0xff] %vm91_vm0, %v4422_v46  ;;  %v4448_v62 = vsel %vm91_vm0, %v4422_v46, 0.0 }
 0xe5e   :  { %4449 = vadd.xlane.f32.xlu1 %v4448_v62 }
 0xe60   :  { %4452 = vadd.xlane.f32.xlu0 %v4451_v56  ;;  %v8683_v56 = vld [vmem:[%s13170_s4] ss:$0 sm:$0xff] }
 0xe62   :  { %4455 = vadd.xlane.f32.xlu1 %v4454_v3 }
 0xed5   :  { %v4435_v13 = vpop.xlane.xlu0 %4434 }
 0xed6   :  { %v4457_v1 = vmul.f32 0.03125, %v4435_v13 }
 0xed7   :  { %v4438_v26 = vpop.xlane.xlu1 %4437 }
 0xed8   :  { %v11911_v42 = vsub.f32 %v4417_v6, %v4457_v1  ;;  %v4458_v49 = vmul.f32 0.03125, %v4438_v26 }
 0xed9   :  { %v4441_v8 = vpop.xlane.xlu0 %4440 }
 0xeda   :  { %v11913_v11 = vsub.f32 %v4418_v15, %v4458_v49  ;;  %v4459_v20 = vmul.f32 0.03125, %v4441_v8  ;;  %v4473_v28 = vmul.f32 %v11911_v42, %v11911_v42  ;;  %v8684_v8 = vld [vmem:[%s13171_s5] ss:$0 sm:$0xff] }
 0xedc   :  { %v11917_v40 = vsub.f32 %v4419_v12, %v4459_v20  ;;  %v4481_v55 = vsel %vm91_vm0, %v4473_v28, 0.0  ;;  %v4474_v53 = vmul.f32 %v11913_v11, %v11913_v11 }
 0xedd   :  { %4482 = vadd.xlane.f32.xlu0 %v4481_v55  ;;  %v4444_v63 = vpop.xlane.xlu0 %4443 }
 0xede   :  { %v4460_v41 = vmul.f32 0.03125, %v4444_v63  ;;  %v4484_v48 = vsel %vm91_vm0, %v4474_v53, 0.0  ;;  %v4475_v59 = vmul.f32 %v11917_v40, %v11917_v40 }
 0xedf   :  { %4485 = vadd.xlane.f32.xlu1 %v4484_v48 }
 0xee0   :  { %v11925_v17 = vsub.f32 %v4420_v7, %v4460_v41  ;;  %v4487_v47 = vsel %vm91_vm0, %v4475_v59, 0.0 }
 0xee1   :  { %4488 = vadd.xlane.f32.xlu0 %v4487_v47 }
 0xee2   :  { %v4476_v38 = vmul.f32 %v11925_v17, %v11925_v17 }
 0xee4   :  { %v4490_v33 = vsel %vm91_vm0, %v4476_v38, 0.0 }
 0xee5   :  { %4491 = vadd.xlane.f32.xlu1 %v4490_v33 }
 0xee9   :  { %v4447_v10 = vpop.xlane.xlu0 %4446 }
 0xeea   :  { %v4461_v12 = vmul.f32 0.03125, %v4447_v10 }
 0xeeb   :  { %v4450_v21 = vpop.xlane.xlu1 %4449 }
 0xeec   :  { %v11931_v23 = vsub.f32 %v4421_v54, %v4461_v12  ;;  %v4462_v14 = vmul.f32 0.03125, %v4450_v21 }
 0xeed   :  { %v4453_v6 = vpop.xlane.xlu0 %4452 }
 0xeee   :  { %v11933_v25 = vsub.f32 %v4422_v46, %v4462_v14  ;;  %v4463_v2 = vmul.f32 0.03125, %v4453_v6  ;;  %v4477_v7 = vmul.f32 %v11931_v23, %v11931_v23 }
 0xeef   :  { %v4456_v27 = vpop.xlane.xlu1 %4455 }
 0xef0   :  { %v11937_v15 = vsub.f32 %v4423_v24, %v4463_v2  ;;  %v4464_v57 = vmul.f32 0.03125, %v4456_v27  ;;  %v4493_v37 = vsel %vm91_vm0, %v4477_v7, 0.0  ;;  %v4478_v4 = vmul.f32 %v11933_v25, %v11933_v25 }
 0xef1   :  { %4494 = vadd.xlane.f32.xlu0 %v4493_v37 }
 0xef2   :  { %v11942_v32 = vsub.f32 %v4424_v16, %v4464_v57  ;;  %v4496_v9 = vsel %vm91_vm0, %v4478_v4, 0.0  ;;  %v4479_v52 = vmul.f32 %v11937_v15, %v11937_v15 }
 0xef3   :  { %4497 = vadd.xlane.f32.xlu1 %v4496_v9 }
 0xef4   :  { %v4499_v29 = vsel %vm91_vm0, %v4479_v52, 0.0  ;;  %v4480_v43 = vmul.f32 %v11942_v32, %v11942_v32 }
 0xef5   :  { %4500 = vadd.xlane.f32.xlu0 %v4499_v29 }
 0xef6   :  { %v4502_v51 = vsel %vm91_vm0, %v4480_v43, 0.0 }
 0xef7   :  { %4503 = vadd.xlane.f32.xlu1 %v4502_v51 }
 0xf6a   :  { %v4483_v39 = vpop.xlane.xlu0 %4482 }
 0xf6b   :  { %v4505_v24 = vmul.f32 0.03125, %v4483_v39 }
 0xf6c   :  { %v4486_v60 = vpop.xlane.xlu1 %4485 }
 0xf6d   :  { %v4513_v50 = vadd.f32 1e-05, %v4505_v24  ;;  %v4506_v30 = vmul.f32 0.03125, %v4486_v60 }
 0xf6e   :  { %v4489_v54 = vpop.xlane.xlu0 %4488 }
 0xf6f   :  { %10249 = vrsqrt.f32 %v4513_v50  ;;  %v4514_v36 = vadd.f32 1e-05, %v4506_v30  ;;  %v4507_v61 = vmul.f32 0.03125, %v4489_v54 }
 0xf71   :  { %10251 = vrsqrt.f32 %v4514_v36  ;;  %v4515_v16 = vadd.f32 1e-05, %v4507_v61 }
 0xf72   :  { %v4492_v34 = vpop.xlane.xlu1 %4491 }
 0xf73   :  { %10253 = vrsqrt.f32 %v4515_v16  ;;  %v4508_v46 = vmul.f32 0.03125, %v4492_v34 }
 0xf75   :  { %v4516_v5 = vadd.f32 1e-05, %v4508_v46 }
 0xf77   :  { %10255 = vrsqrt.f32 %v4516_v5  ;;  %v10407_v5 = vld [vmem:[%s13164_s10] ss:$0 sm:$0xff] }
 0xf79   :  { %v10250_v62 = vpop.eup %10249 }
 0xf7a   :  { %v4529_v3 = vmul.f32 %v10250_v62, %v11911_v42 }
 0xf7b   :  { %v10252_v13 = vpop.eup %10251 }
 0xf7c   :  { %v4530_v1 = vmul.f32 %v10252_v13, %v11913_v11  ;;  %v4543_v26 = vmul.f32 %v8683_v56, %v4529_v3 }
 0xf7d   :  { %v10254_v49 = vpop.eup %10253 }
 0xf7e   :  { %v4531_v20 = vmul.f32 %v10254_v49, %v11917_v40  ;;  %v4495_v28 = vpop.xlane.xlu0 %4494  ;;  %v4544_v55 = vmul.f32 %v8683_v56, %v4530_v1  ;;  %v4557_v41 = vadd.f32 %v8684_v8, %v4543_v26 }
 0xf7f   :  { %v4509_v53 = vmul.f32 0.03125, %v4495_v28 }
 0xf80   :  { %v4498_v63 = vpop.xlane.xlu1 %4497  ;;  %v4558_v48 = vadd.f32 %v8684_v8, %v4544_v55  ;;  %v4545_v38 = vmul.f32 %v8683_v56, %v4531_v20  ;;  %v11997_v55 = vld [vmem:[%s13165_s9] ss:$0 sm:$0xff] }
 0xf81   :  { %v10256_v59 = vpop.eup %10255  ;;  %v4517_v47 = vadd.f32 1e-05, %v4509_v53  ;;  %v4510_v42 = vmul.f32 0.03125, %v4498_v63  ;;  %v4608_v53 = vadd.f32 %v11997_v55, %v11789_v19 }
 0xf82   :  { %v4532_v11 = vmul.f32 %v10256_v59, %v11925_v17  ;;  %v4501_v33 = vpop.xlane.xlu0 %4500  ;;  %v8777_v10 = vpack.c.bf16 %v4558_v48, %v4557_v41  ;;  %v4559_v7 = vadd.f32 %v8684_v8, %v4545_v38  ;;  %v4611_v48 = vadd.f32 %v11997_v55, %v11793_v0 }
 0xf83   :  { %10257 = vrsqrt.f32 %v4517_v47  ;;  %v4518_v12 = vadd.f32 1e-05, %v4510_v42  ;;  %v4511_v21 = vmul.f32 0.03125, %v4501_v33  ;;  %v12009_v47 = vpack.c.bf16 %v4608_v53, %v4608_v53 }
 0xf84   :  { %v4546_v14 = vmul.f32 %v8683_v56, %v4532_v11  ;;  %v4504_v6 = vpop.xlane.xlu1 %4503  ;;  %9533 = vmatprep.mubr.msk.bf16.mxu0 %vm91_vm0, %v8777_v10  ;;  %9545 = vmatprep.mubr.msk.bf16.mxu1 %vm91_vm0, %v8777_v10  ;;  %v12013_v38 = vpack.c.bf16 %v4611_v48, %v4611_v48  ;;  %v4616_v0 = vadd.f32 %v11997_v55, %v11787_v44 }
 0xf85   :  { %10259 = vrsqrt.f32 %v4518_v12  ;;  %v4519_v40 = vadd.f32 1e-05, %v4511_v21  ;;  %v4512_v2 = vmul.f32 0.03125, %v4504_v6  ;;  %v4619_v33 = vadd.f32 %v11997_v55, %v11791_v58 }
 0xf86   :  { %v4560_v27 = vadd.f32 %v8684_v8, %v4546_v14  ;;  %v12037_v14 = vpack.c.bf16 %v4616_v0, %v4616_v0 }
 0xf87   :  { %10261 = vrsqrt.f32 %v4519_v40  ;;  %v4520_v57 = vadd.f32 1e-05, %v4512_v2 }
 0xf88   :  { %v8778_v37 = vpack.c.bf16 %v4560_v27, %v4559_v7 }
 0xf89   :  { %10263 = vrsqrt.f32 %v4520_v57  ;;  %v12043_v57 = vpack.c.bf16 %v4619_v33, %v4619_v33 }
 0xf8a   :  { %9534 = vmatmul.mubr.msk.bf16.vlgmr.msra.gmra.mrb[144].mxu0 %vm91_vm0, %v8778_v37  ;;  %9546 = vmatmul.mubr.msk.bf16.vlgmr.msra.gmra.mrb[152].mxu1 %vm91_vm0, %v8778_v37 }
 0xf8d   :  { %v10258_v17 = vpop.eup %10257 }
 0xf8e   :  { %v4533_v4 = vmul.f32 %v10258_v17, %v11931_v23 }
 0xf8f   :  { %v10260_v9 = vpop.eup %10259 }
 0xf90   :  { %v4534_v52 = vmul.f32 %v10260_v9, %v11933_v25  ;;  %v4547_v29 = vmul.f32 %v8683_v56, %v4533_v4 }
 0xf91   :  { %v10262_v43 = vpop.eup %10261 }
 0xf92   :  { %v4548_v51 = vmul.f32 %v8683_v56, %v4534_v52  ;;  %v4535_v39 = vmul.f32 %v10262_v43, %v11937_v15  ;;  %v4561_v60 = vadd.f32 %v8684_v8, %v4547_v29  ;;  %v4624_v52 = vadd.f32 %v11997_v55, %v11797_v31  ;;  %v12078_v31 = vld [vmem:[%s13166_s11] ss:$0 sm:$0xff] }
 0xf93   :  { %v10264_v24 = vpop.eup %10263 }
 0xf94   :  { %v4562_v50 = vadd.f32 %v8684_v8, %v4548_v51  ;;  %v4536_v30 = vmul.f32 %v10264_v24, %v11942_v32  ;;  %v4549_v54 = vmul.f32 %v8683_v56, %v4535_v39  ;;  %v4627_v51 = vadd.f32 %v11997_v55, %v11801_v18 }
 0xf95   :  { %v12069_v24 = vpack.c.bf16 %v4624_v52, %v4624_v52 }
 0xf96   :  { %v8779_v36 = vpack.c.bf16 %v4562_v50, %v4561_v60  ;;  %v4550_v61 = vmul.f32 %v8683_v56, %v4536_v30  ;;  %v4563_v23 = vadd.f32 %v8684_v8, %v4549_v54  ;;  %v12073_v50 = vpack.c.bf16 %v4627_v51, %v4627_v51 }
 0xf97   :  { %v4632_v54 = vadd.f32 %v11997_v55, %v11795_v45 }
 0xf98   :  { %9537 = vmatprep.mubr.msk.bf16.mxu0 %vm91_vm0, %v8779_v36  ;;  %9549 = vmatprep.mubr.msk.bf16.mxu1 %vm91_vm0, %v8779_v36  ;;  %v4564_v16 = vadd.f32 %v8684_v8, %v4550_v61 }
 0xf99   :  { %v12104_v45 = vpack.c.bf16 %v4632_v54, %v4632_v54 }
 0xf9a   :  { %v8780_v25 = vpack.c.bf16 %v4564_v16, %v4563_v23  ;;  %v4635_v23 = vadd.f32 %v11997_v55, %v11799_v35 }
 0xf9c   :  { %9538 = vmatmul.mubr.msk.bf16.gmra.mrb[148].mxu0 %vm91_vm0, %v8780_v25  ;;  %9550 = vmatmul.mubr.msk.bf16.gmra.mrb[156].mxu1 %vm91_vm0, %v8780_v25 }
 0xf9d   :  { %9555 = vmatprep.mubr.msk.bf16.mxu0 %vm10422_vm1, %v13181_v22  ;;  %9561 = vmatprep.mubr.msk.bf16.mxu1 %vm10422_vm1, %v13181_v22 }
0x105d   :  { %v9535_v15 = vpop.f32.mrb[144].mxu0  ;;  %v11977_v32 = vpop.f32.mrb[152].mxu1 }
0x105e   :  { %v4704_v34 = vpop.f32.mrb[145].mxu0  ;;  %v11979_v46 = vpop.f32.mrb[153].mxu1  ;;  %v4713_v8 = vadd.f32 %v10407_v5, %v9535_v15  ;;  %v12108_v15 = vpack.c.bf16 %v4635_v23, %v4635_v23 }
0x105f   :  { %v4705_v62 = vadd.f32 %v10407_v5, %v4704_v34  ;;  %v9536_v56 = vpop.f32.mrb[146].mxu0  ;;  %v11984_v3 = vpop.f32.mrb[154].mxu1  ;;  %v4770_v30 = vadd.f32 %v12078_v31, %v11979_v46 }
0x1060   :  { %v4707_v13 = vpop.f32.mrb[147].mxu0  ;;  %v11986_v1 = vpop.f32.mrb[155].mxu1  ;;  %v4716_v63 = vadd.f32 %v10407_v5, %v9536_v56  ;;  %v12006_v59 = vpack.c.bf16 %v4713_v8, %v4713_v8 }
0x1061   :  { %v11988_v26 = vpack.c.bf16 %v4705_v62, %v4705_v62  ;;  %v4708_v49 = vadd.f32 %v10407_v5, %v4707_v13  ;;  %v4773_v36 = vadd.f32 %v12078_v31, %v11986_v1  ;;  %v12101_v16 = vpack.c.bf16 %v4770_v30, %v4770_v30 }
0x1062   :  { %v12011_v42 = vpack.c.bf16 %v4716_v63, %v4716_v63  ;;  %v4920_v19 = vsel %vm698_vm2, %v12006_v59, 0 }
0x1063   :  { %v11990_v20 = vpack.c.bf16 %v4708_v49, %v4708_v49  ;;  %v4828_v28 = vsel %vm698_vm2, %v11988_v26, 0  ;;  %v12106_v25 = vpack.c.bf16 %v4773_v36, %v4773_v36  ;;  %v5292_v34 = vsel %vm1166_vm3, %v12101_v16, 0 }
0x1064   :  { %9554 = vmatpush3.bf16.xpose.msra.mxu0 %v4828_v28  ;;  %v4966_v11 = vsel %vm698_vm2, %v12011_v42, 0 }
0x1065   :  { %v4874_v41 = vsel %vm698_vm2, %v11990_v20, 0  ;;  %9565 = vmatprep.subr.bf16.mxu0 %v13181_v22  ;;  %v5338_v35 = vsel %vm1166_vm3, %v12106_v25, 0 }
0x1066   :  { %9560 = vmatpush3.bf16.xpose.msra.mxu1 %v4874_v41 }
0x1067   :  { %9571 = vmatprep.subr.bf16.mxu1 %v13181_v22 }
0x106b   :  { %9556 = vmatmul.mubr.msk.bf16.vlgmr.msra.gmra.mrb[152].mxu0 %vm698_vm2, %v12009_v47 }
0x106c   :  { %9566 = vmatpush3.bf16.xpose.msra.mxu0 %v4920_v19  ;;  %9567 = vmatprep.mubr.msk.bf16.mxu0 %vm10422_vm1, %v13181_v22 }
0x106d   :  { %9562 = vmatmul.mubr.msk.bf16.vlgmr.msra.gmra.mrb[160].mxu1 %vm698_vm2, %v12013_v38  ;;  %9577 = vmatprep.subr.bf16.mxu0 %v13181_v22 }
0x106e   :  { %9572 = vmatpush3.bf16.xpose.msra.mxu1 %v4966_v11  ;;  %9573 = vmatprep.mubr.msk.bf16.mxu1 %vm10422_vm1, %v13181_v22 }
0x106f   :  { %v9539_v10 = vpop.f32.mrb[148].mxu0  ;;  %v12032_v12 = vpop.f32.mrb[156].mxu1  ;;  %9583 = vmatprep.subr.bf16.mxu1 %v13181_v22 }
0x1070   :  { %v4720_v44 = vpop.f32.mrb[149].mxu0  ;;  %v12035_v21 = vpop.f32.mrb[157].mxu1  ;;  %v4729_v17 = vadd.f32 %v10407_v5, %v9539_v10 }
0x1071   :  { %v4721_v6 = vadd.f32 %v10407_v5, %v4720_v44  ;;  %v9540_v40 = vpop.f32.mrb[150].mxu0  ;;  %v12039_v2 = vpop.f32.mrb[158].mxu1 }
0x1072   :  { %v4723_v7 = vpop.f32.mrb[151].mxu0  ;;  %v12041_v27 = vpop.f32.mrb[159].mxu1  ;;  %v4732_v29 = vadd.f32 %v10407_v5, %v9540_v40  ;;  %v12066_v39 = vpack.c.bf16 %v4729_v17, %v4729_v17 }
0x1073   :  { %v12045_v58 = vpack.c.bf16 %v4721_v6, %v4721_v6  ;;  %v4724_v37 = vadd.f32 %v10407_v5, %v4723_v7  ;;  %9568 = vmatmul.mubr.msk.bf16.vlgmr.msra.gmra.mrb[156].mxu0 %vm698_vm2, %v12037_v14 }
0x1074   :  { %9579 = vmatprep.mubr.msk.bf16.mxu0 %vm10422_vm1, %v13181_v22  ;;  %v12071_v60 = vpack.c.bf16 %v4732_v29, %v4732_v29  ;;  %v5104_v18 = vsel %vm698_vm2, %v12066_v39, 0 }
0x1075   :  { %v12051_v4 = vpack.c.bf16 %v4724_v37, %v4724_v37  ;;  %9574 = vmatmul.mubr.msk.bf16.vlgmr.msra.gmra.mrb[164].mxu1 %vm698_vm2, %v12043_v57  ;;  %v5012_v9 = vsel %vm698_vm2, %v12045_v58, 0 }
0x1076   :  { %9578 = vmatpush3.bf16.xpose.msra.mxu0 %v5012_v9  ;;  %9585 = vmatprep.mubr.msk.bf16.mxu1 %vm10422_vm1, %v13181_v22  ;;  %v5150_v61 = vsel %vm698_vm2, %v12071_v60, 0 }
0x1077   :  { %v5058_v43 = vsel %vm698_vm2, %v12051_v4, 0  ;;  %9589 = vmatprep.subr.bf16.mxu0 %v13181_v22 }
0x1078   :  { %9584 = vmatpush3.bf16.xpose.msra.mxu1 %v5058_v43 }
0x1079   :  { %9595 = vmatprep.subr.bf16.mxu1 %v13181_v22 }
0x107d   :  { %9580 = vmatmul.mubr.msk.bf16.vlgmr.msra.gmra.mrb[160].mxu0 %vm698_vm2, %v12069_v24 }
0x107e   :  { %9590 = vmatpush3.bf16.xpose.msra.mxu0 %v5104_v18  ;;  %9591 = vmatprep.mubr.msk.bf16.mxu0 %vm10422_vm1, %v13181_v22 }
0x107f   :  { %9586 = vmatmul.mubr.msk.bf16.vlgmr.msra.gmra.mrb[168].mxu1 %vm698_vm2, %v12073_v50  ;;  %9601 = vmatprep.subr.bf16.mxu0 %v13181_v22 }
0x1080   :  { %9596 = vmatpush3.bf16.xpose.msra.mxu1 %v5150_v61  ;;  %9597 = vmatprep.mubr.msk.bf16.mxu1 %vm10422_vm1, %v13181_v22 }
0x1081   :  { %9607 = vmatprep.subr.bf16.mxu1 %v13181_v22 }
0x1085   :  { %9592 = vmatmul.mubr.msk.bf16.vlgmr.msra.gmra.mrb[164].mxu0 %vm698_vm2, %v12104_v45 }
0x1086   :  { %9602 = vmatpush3.bf16.msra.mxu0 %v5292_v34  ;;  %9603 = vmatprep.mubr.msk.bf16.mxu0 %vm10422_vm1, %v13181_v22 }
0x1087   :  { %9598 = vmatmul.mubr.msk.bf16.vlgmr.msra.gmra.mrb[172].mxu1 %vm698_vm2, %v12108_v15  ;;  %9613 = vmatprep.subr.bf16.mxu0 %v13181_v22 }
0x1088   :  { %9608 = vmatpush3.bf16.msra.mxu1 %v5338_v35  ;;  %9609 = vmatprep.mubr.msk.bf16.mxu1 %vm10422_vm1, %v13181_v22 }
0x1089   :  { %9619 = vmatprep.subr.bf16.mxu1 %v13181_v22 }
0x113e   :  { %v12124_v46 = vpop.f32.mrb[152].mxu0 }
0x113f   :  { %v9557_v5 = vpop.f32.mrb[153].mxu0  ;;  %v5192_v62 = vsel %vm698_vm2, %v12124_v46, -inf }
0x1140   :  { %v12128_v56 = vpop.f32.mrb[160].mxu1  ;;  %5193 = vmax.xlane.f32.xlu0 %v5192_v62  ;;  %v4867_v13 = vpop.f32.mrb[154].mxu0 }
0x1141   :  { %v9558_v1 = vpop.f32.mrb[155].mxu0  ;;  %v9563_v49 = vpop.f32.mrb[161].mxu1  ;;  %v5195_v8 = vsel %vm698_vm2, %v12128_v56, -inf }
0x1142   :  { %5196 = vmax.xlane.f32.xlu1 %v5195_v8  ;;  %v4913_v28 = vpop.f32.mrb[162].mxu1 }
0x1143   :  { %v9564_v55 = vpop.f32.mrb[163].mxu1 }
0x1146   :  { %v12132_v53 = vpop.f32.mrb[156].mxu0 }
0x1147   :  { %v9569_v63 = vpop.f32.mrb[157].mxu0  ;;  %v5198_v41 = vsel %vm698_vm2, %v12132_v53, -inf }
0x1148   :  { %v12136_v48 = vpop.f32.mrb[164].mxu1  ;;  %5199 = vmax.xlane.f32.xlu0 %v5198_v41  ;;  %v4959_v19 = vpop.f32.mrb[158].mxu0 }
0x1149   :  { %v9570_v0 = vpop.f32.mrb[159].mxu0  ;;  %v9575_v11 = vpop.f32.mrb[165].mxu1  ;;  %v5201_v33 = vsel %vm698_vm2, %v12136_v48, -inf }
0x114a   :  { %5202 = vmax.xlane.f32.xlu1 %v5201_v33  ;;  %v5005_v10 = vpop.f32.mrb[166].mxu1 }
0x114b   :  { %v9576_v44 = vpop.f32.mrb[167].mxu1 }
0x1150   :  { %v12140_v6 = vpop.f32.mrb[160].mxu0 }
0x1151   :  { %v9581_v40 = vpop.f32.mrb[161].mxu0  ;;  %v5204_v7 = vsel %vm698_vm2, %v12140_v6, -inf }
0x1152   :  { %v12144_v37 = vpop.f32.mrb[168].mxu1  ;;  %5205 = vmax.xlane.f32.xlu0 %v5204_v7  ;;  %v5051_v17 = vpop.f32.mrb[162].mxu0 }
0x1153   :  { %v9582_v9 = vpop.f32.mrb[163].mxu0  ;;  %v9587_v52 = vpop.f32.mrb[169].mxu1  ;;  %v5207_v29 = vsel %vm698_vm2, %v12144_v37, -inf }
0x1154   :  { %5208 = vmax.xlane.f32.xlu1 %v5207_v29  ;;  %v5097_v43 = vpop.f32.mrb[170].mxu1 }
0x1155   :  { %v9588_v51 = vpop.f32.mrb[171].mxu1 }
0x1158   :  { %v12148_v30 = vpop.f32.mrb[164].mxu0 }
0x1159   :  { %v9593_v18 = vpop.f32.mrb[165].mxu0  ;;  %v5210_v54 = vsel %vm698_vm2, %v12148_v30, -inf }
0x115a   :  { %v12152_v36 = vpop.f32.mrb[172].mxu1  ;;  %5211 = vmax.xlane.f32.xlu0 %v5210_v54  ;;  %v5143_v61 = vpop.f32.mrb[166].mxu0 }
0x115b   :  { %v9594_v23 = vpop.f32.mrb[167].mxu0  ;;  %v9599_v34 = vpop.f32.mrb[173].mxu1  ;;  %v5213_v35 = vsel %vm698_vm2, %v12152_v36, -inf }
0x115c   :  { %5214 = vmax.xlane.f32.xlu1 %v5213_v35  ;;  %v5189_v5 = vpop.f32.mrb[174].mxu1 }
0x115d   :  { %v9600_v62 = vpop.f32.mrb[175].mxu1 }
0x11cd   :  { %v5194_v13 = vpop.xlane.xlu0 %5193 }
0x11ce   :  { %v5216_v1 = vsub.f32 %v12124_v46, %v5194_v13 }
0x11cf   :  { %v5197_v49 = vpop.xlane.xlu1 %5196 }
0x11d0   :  { %v5224_v8 = vmul.f32 1.442695, %v5216_v1  ;;  %v5217_v28 = vsub.f32 %v12128_v56, %v5197_v49 }
0x11d2   :  { %10265 = vpow2.f32 %v5224_v8  ;;  %v5226_v55 = vmul.f32 1.442695, %v5217_v28 }
0x11d4   :  { %10267 = vpow2.f32 %v5226_v55 }
0x11d5   :  { %v5200_v63 = vpop.xlane.xlu0 %5199 }
0x11d6   :  { %v5218_v41 = vsub.f32 %v12132_v53, %v5200_v63 }
0x11d7   :  { %v5203_v19 = vpop.xlane.xlu1 %5202 }
0x11d8   :  { %v5228_v0 = vmul.f32 1.442695, %v5218_v41  ;;  %v5219_v11 = vsub.f32 %v12136_v48, %v5203_v19 }
0x11da   :  { %10269 = vpow2.f32 %v5228_v0  ;;  %v5230_v33 = vmul.f32 1.442695, %v5219_v11  ;;  %v4778_v11 = vadd.f32 %v12078_v31, %v11977_v32 }
0x11dc   :  { %v12160_v10 = vpop.eup %10265  ;;  %10271 = vpow2.f32 %v5230_v33  ;;  %v12234_v33 = vpack.c.bf16 %v4778_v11, %v4778_v11 }
0x11dd   :  { %v5240_v44 = vsel %vm698_vm2, %v12160_v10, 0.0 }
0x11de   :  { %v12164_v40 = vpop.eup %10267  ;;  %5241 = vadd.xlane.f32.xlu0 %v5240_v44  ;;  %v4781_v44 = vadd.f32 %v12078_v31, %v11984_v3 }
0x11df   :  { %v5206_v7 = vpop.xlane.xlu0 %5205  ;;  %v5243_v17 = vsel %vm698_vm2, %v12164_v40, 0.0 }
0x11e0   :  { %v5220_v9 = vsub.f32 %v12140_v6, %v5206_v7  ;;  %5244 = vadd.xlane.f32.xlu1 %v5243_v17  ;;  %v12240_v7 = vpack.c.bf16 %v4781_v44, %v4781_v44 }
0x11e1   :  { %v5209_v52 = vpop.xlane.xlu1 %5208 }
0x11e2   :  { %v5232_v29 = vmul.f32 1.442695, %v5220_v9  ;;  %v5221_v43 = vsub.f32 %v12144_v37, %v5209_v52 }
0x11e4   :  { %v12170_v51 = vpop.eup %10269  ;;  %10273 = vpow2.f32 %v5232_v29  ;;  %v5234_v18 = vmul.f32 1.442695, %v5221_v43 }
0x11e5   :  { %v5246_v54 = vsel %vm698_vm2, %v12170_v51, 0.0 }
0x11e6   :  { %v12174_v61 = vpop.eup %10271  ;;  %10275 = vpow2.f32 %v5234_v18  ;;  %5247 = vadd.xlane.f32.xlu0 %v5246_v54 }
0x11e7   :  { %v5212_v23 = vpop.xlane.xlu0 %5211  ;;  %v5249_v34 = vsel %vm698_vm2, %v12174_v61, 0.0 }
0x11e8   :  { %v5222_v35 = vsub.f32 %v12148_v30, %v5212_v23  ;;  %5250 = vadd.xlane.f32.xlu1 %v5249_v34  ;;  %v4786_v23 = vadd.f32 %v12078_v31, %v12035_v21  ;;  %v5384_v34 = vsel %vm1166_vm3, %v12234_v33, 0 }
0x11e9   :  { %v5215_v55 = vpop.xlane.xlu1 %5214 }
0x11ea   :  { %v5236_v5 = vmul.f32 1.442695, %v5222_v35  ;;  %v5223_v63 = vsub.f32 %v12152_v36, %v5215_v55 }
0x11ec   :  { %10277 = vpow2.f32 %v5236_v5  ;;  %v5238_v41 = vmul.f32 1.442695, %v5223_v63 }
0x11ee   :  { %v12179_v62 = vpop.eup %10273  ;;  %10279 = vpow2.f32 %v5238_v41 }
0x11ef   :  { %v5252_v13 = vsel %vm698_vm2, %v12179_v62, 0.0 }
0x11f0   :  { %v12183_v1 = vpop.eup %10275  ;;  %5253 = vadd.xlane.f32.xlu0 %v5252_v13  ;;  %v12261_v13 = vpack.c.bf16 %v4786_v23, %v4786_v23 }
0x11f1   :  { %v5255_v49 = vsel %vm698_vm2, %v12183_v1, 0.0 }
0x11f2   :  { %5256 = vadd.xlane.f32.xlu1 %v5255_v49 }
0x11f6   :  { %v12187_v8 = vpop.eup %10277 }
0x11f7   :  { %v5258_v28 = vsel %vm698_vm2, %v12187_v8, 0.0 }
0x11f8   :  { %5259 = vadd.xlane.f32.xlu0 %v5258_v28  ;;  %v12210_v19 = vpop.eup %10279 }
0x11f9   :  { %v5261_v0 = vsel %vm698_vm2, %v12210_v19, 0.0 }
0x1203   :  { %5712 = vrot.lane.b32.xlu1 %v11990_v20, %s10423_s17 }
0x1207   :  { %5657 = vrot.lane.b32.xlu1 %v12009_v47, %s10423_s17 }
0x120e   :  { %5660 = vrot.lane.b32.xlu0 %v11988_v26, %s10423_s17 }
0x1212   :  { %5764 = vrot.lane.b32.xlu0 %v12006_v59, %s10423_s17 }
0x1216   :  { %5761 = vrot.lane.b32.xlu0 %v12037_v14, %s10423_s17 }
0x121a   :  { %5868 = vrot.lane.b32.xlu0 %v12045_v58, %s10423_s17 }
0x121e   :  { %5865 = vrot.lane.b32.xlu0 %v12069_v24, %s10423_s17 }
0x1222   :  { %5972 = vrot.lane.b32.xlu0 %v12066_v39, %s10423_s17 }
0x1226   :  { %5969 = vrot.lane.b32.xlu0 %v12104_v45, %s10423_s17 }
0x122a   :  { %6177 = vrot.lane.b32.xlu0 %v12101_v16, %s10423_s17 }
0x122b   :  { %5262 = vadd.xlane.f32.xlu1 %v5261_v0  ;;  %v5476_v0 = vsel %vm1166_vm3, %v12261_v13, 0 }
0x123c   :  { %5709 = vrot.lane.b32.xlu1 %v12013_v38, %s10423_s17 }
0x1240   :  { %5816 = vrot.lane.b32.xlu1 %v12011_v42, %s10423_s17 }
0x1244   :  { %5813 = vrot.lane.b32.xlu1 %v12043_v57, %s10423_s17 }
0x1248   :  { %5920 = vrot.lane.b32.xlu1 %v12051_v4, %s10423_s17 }
0x124c   :  { %5917 = vrot.lane.b32.xlu1 %v12073_v50, %s10423_s17 }
0x1250   :  { %6024 = vrot.lane.b32.xlu1 %v12071_v60, %s10423_s17 }
0x1254   :  { %6021 = vrot.lane.b32.xlu1 %v12108_v15, %s10423_s17 }
0x1258   :  { %6226 = vrot.lane.b32.xlu1 %v12106_v25, %s10423_s17 }
0x125c   :  { %6275 = vrot.lane.b32.xlu1 %v12234_v33, %s10423_s17 }
0x1260   :  { %6324 = vrot.lane.b32.xlu1 %v12240_v7, %s10423_s17 }
0x126b   :  { %v5242_v17 = vpop.xlane.xlu0 %5241 }
0x126c   :  { %10281 = vrcp.f32 %v5242_v17 }
0x126d   :  { %v5245_v9 = vpop.xlane.xlu1 %5244 }
0x126e   :  { %10283 = vrcp.f32 %v5245_v9 }
0x1273   :  { %v5248_v32 = vpop.xlane.xlu0 %5247 }
0x1274   :  { %10285 = vrcp.f32 %v5248_v32 }
0x1275   :  { %v5251_v52 = vpop.xlane.xlu1 %5250 }
0x1276   :  { %v10282_v29 = vpop.eup %10281  ;;  %10287 = vrcp.f32 %v5251_v52 }
0x1277   :  { %v5272_v43 = vmul.f32 %v10282_v29, %v12160_v10  ;;  %v4789_v10 = vadd.f32 %v12078_v31, %v12041_v27 }
0x1278   :  { %v10284_v3 = vpop.eup %10283 }
0x1279   :  { %v5280_v18 = vpack.c.bf16 %v5272_v43, %v5272_v43  ;;  %v5273_v54 = vmul.f32 %v10284_v3, %v12164_v40  ;;  %v5430_v40 = vsel %vm1166_vm3, %v12240_v7, 0  ;;  %v12265_v55 = vpack.c.bf16 %v4789_v10, %v4789_v10 }
0x127b   :  { %9604 = vmatmul.mubr.msk.bf16.vlgmr.msra.gmra.mrb[168].mxu0 %vm698_vm2, %v5280_v18  ;;  %v5281_v35 = vpack.c.bf16 %v5273_v54, %v5273_v54  ;;  %v5522_v44 = vsel %vm1166_vm3, %v12265_v55, 0 }
0x127c   :  { %9614 = vmatpush3.bf16.msra.mxu0 %v5384_v34  ;;  %9615 = vmatprep.mubr.msk.bf16.mxu0 %vm10422_vm1, %v13181_v22 }
0x127d   :  { %9610 = vmatmul.mubr.msk.bf16.vlgmr.msra.gmra.mrb[176].mxu1 %vm698_vm2, %v5281_v35  ;;  %v5254_v5 = vpop.xlane.xlu0 %5253  ;;  %9625 = vmatprep.subr.bf16.mxu0 %v13181_v22 }
0x127e   :  { %v10286_v21 = vpop.eup %10285  ;;  %9620 = vmatpush3.bf16.msra.mxu1 %v5430_v40  ;;  %10289 = vrcp.f32 %v5254_v5  ;;  %9621 = vmatprep.mubr.msk.bf16.mxu1 %vm10422_vm1, %v13181_v22 }
0x127f   :  { %v5257_v49 = vpop.xlane.xlu1 %5256  ;;  %v5274_v28 = vmul.f32 %v10286_v21, %v12170_v51  ;;  %9631 = vmatprep.subr.bf16.mxu1 %v13181_v22  ;;  %v4794_v51 = vadd.f32 %v12078_v31, %v12032_v12 }
0x1280   :  { %v10288_v27 = vpop.eup %10287  ;;  %10291 = vrcp.f32 %v5257_v49 }
0x1281   :  { %v5282_v63 = vpack.c.bf16 %v5274_v28, %v5274_v28  ;;  %v5275_v41 = vmul.f32 %v10288_v27, %v12174_v61  ;;  %v4797_v61 = vadd.f32 %v12078_v31, %v12039_v2  ;;  %v12284_v12 = vpack.c.bf16 %v4794_v51, %v4794_v51 }
0x1283   :  { %9616 = vmatmul.mubr.msk.bf16.vlgmr.msra.gmra.mrb[172].mxu0 %vm698_vm2, %v5282_v63  ;;  %v5283_v11 = vpack.c.bf16 %v5275_v41, %v5275_v41  ;;  %v12287_v43 = vpack.c.bf16 %v4797_v61, %v4797_v61  ;;  %v5568_v54 = vsel %vm1166_vm3, %v12284_v12, 0  ;;  %v5713_v40 = vpop.permute.xlu1 %5712 }
0x1284   :  { %9626 = vmatpush3.bf16.msra.mxu0 %v5476_v0  ;;  %9627 = vmatprep.mubr.msk.bf16.mxu0 %vm10422_vm1, %v13181_v22 }
0x1285   :  { %9622 = vmatmul.mubr.msk.bf16.vlgmr.msra.gmra.mrb[180].mxu1 %vm698_vm2, %v5283_v11  ;;  %v5260_v17 = vpop.xlane.xlu0 %5259  ;;  %9637 = vmatprep.subr.bf16.mxu0 %v13181_v22 }
0x1286   :  { %9632 = vmatpush3.bf16.msra.mxu1 %v5522_v44  ;;  %10293 = vrcp.f32 %v5260_v17  ;;  %9633 = vmatprep.mubr.msk.bf16.mxu1 %vm10422_vm1, %v13181_v22 }
0x1287   :  { %9643 = vmatprep.subr.bf16.mxu1 %v13181_v22  ;;  %v5658_v21 = vpop.permute.xlu1 %5657 }
0x1288   :  { %v10290_v9 = vpop.eup %10289 }
0x1289   :  { %v5661_v32 = vpop.permute.xlu0 %5660  ;;  %v5276_v52 = vmul.f32 %v10290_v9, %v12179_v62  ;;  %v5614_v62 = vsel %vm1166_vm3, %v12287_v43, 0 }
0x128a   :  { %v10292_v29 = vpop.eup %10291  ;;  %v5666_v10 = vsel %vm698_vm2, %v5661_v32, 0 }
0x128b   :  { %v5284_v3 = vpack.c.bf16 %v5276_v52, %v5276_v52  ;;  %v5277_v18 = vmul.f32 %v10292_v29, %v12183_v1  ;;  %v5718_v29 = vsel %vm698_vm2, %v5713_v40, 0 }
0x128d   :  { %9628 = vmatmul.mubr.msk.bf16.vlgmr.msra.gmra.mrb[176].mxu0 %vm698_vm2, %v5284_v3  ;;  %v5285_v2 = vpack.c.bf16 %v5277_v18, %v5277_v18  ;;  %v5765_v31 = vpop.permute.xlu0 %5764 }
0x128e   :  { %9638 = vmatpush3.bf16.msra.mxu0 %v5568_v54  ;;  %9639 = vmatprep.mubr.msk.bf16.mxu0 %vm10422_vm1, %v13181_v22  ;;  %v5770_v49 = vsel %vm698_vm2, %v5765_v31, 0 }
0x128f   :  { %9634 = vmatmul.mubr.msk.bf16.vlgmr.msra.gmra.mrb[184].mxu1 %vm698_vm2, %v5285_v2  ;;  %9649 = vmatprep.subr.bf16.mxu0 %v13181_v22 }
0x1290   :  { %v10294_v23 = vpop.eup %10293  ;;  %9644 = vmatpush3.bf16.msra.mxu1 %v5614_v62  ;;  %9645 = vmatprep.mubr.msk.bf16.mxu1 %vm10422_vm1, %v13181_v22 }
0x1291   :  { %v5278_v1 = vmul.f32 %v10294_v23, %v12187_v8  ;;  %9655 = vmatprep.subr.bf16.mxu1 %v13181_v22  ;;  %v5762_v35 = vpop.permute.xlu0 %5761 }
0x1293   :  { %v5286_v34 = vpack.c.bf16 %v5278_v1, %v5278_v1 }
0x1295   :  { %9640 = vmatmul.mubr.msk.bf16.vlgmr.msra.gmra.mrb[180].mxu0 %vm698_vm2, %v5286_v34  ;;  %v5869_v5 = vpop.permute.xlu0 %5868 }
0x1296   :  { %9651 = vmatprep.mubr.msk.bf16.mxu0 %vm10422_vm1, %v13181_v22  ;;  %v5874_v28 = vsel %vm698_vm2, %v5869_v5, 0 }
0x1297   :  { %9650 = vmatpush3.bf16.xpose.msra.mxu0 %v5666_v10 }
0x1298   :  { %9661 = vmatprep.subr.bf16.mxu0 %v13181_v22 }
0x1299   :  { %v5866_v8 = vpop.permute.xlu0 %5865 }
0x129d   :  { %v5973_v27 = vpop.permute.xlu0 %5972 }
0x129e   :  { %9652 = vmatmul.mubr.msk.bf16.vlgmr.msra.gmra.mrb[184].mxu0 %vm698_vm2, %v5658_v21  ;;  %v5978_v41 = vsel %vm698_vm2, %v5973_v27, 0 }
0x129f   :  { %9662 = vmatpush3.bf16.xpose.msra.mxu0 %v5770_v49  ;;  %9663 = vmatprep.mubr.msk.bf16.mxu0 %vm10422_vm1, %v13181_v22 }
0x12a0   :  { %9673 = vmatprep.subr.bf16.mxu0 %v13181_v22 }
0x12a1   :  { %v5970_v63 = vpop.permute.xlu0 %5969 }
0x12a5   :  { %v6178_v0 = vpop.permute.xlu0 %6177 }
0x12a6   :  { %9664 = vmatmul.mubr.msk.bf16.vlgmr.msra.gmra.mrb[188].mxu0 %vm698_vm2, %v5762_v35  ;;  %v6183_v11 = vsel %vm1166_vm3, %v6178_v0, 0 }
0x12a7   :  { %9674 = vmatpush3.bf16.xpose.msra.mxu0 %v5874_v28  ;;  %9675 = vmatprep.mubr.msk.bf16.mxu0 %vm10422_vm1, %v13181_v22 }
0x12a8   :  { %9685 = vmatprep.subr.bf16.mxu0 %v13181_v22 }
0x12ae   :  { %9676 = vmatmul.mubr.msk.bf16.vlgmr.msra.gmra.mrb[192].mxu0 %vm698_vm2, %v5866_v8 }
0x12af   :  { %9686 = vmatpush3.bf16.xpose.msra.mxu0 %v5978_v41  ;;  %9687 = vmatprep.mubr.msk.bf16.mxu0 %vm10422_vm1, %v13181_v22 }
0x12b0   :  { %9697 = vmatprep.subr.bf16.mxu0 %v13181_v22 }
0x12b6   :  { %9688 = vmatmul.mubr.msk.bf16.vlgmr.msra.gmra.mrb[196].mxu0 %vm698_vm2, %v5970_v63 }
0x12b7   :  { %9698 = vmatpush3.bf16.msra.mxu0 %v6183_v11  ;;  %9699 = vmatprep.mubr.msk.bf16.mxu0 %vm10422_vm1, %v13181_v22 }
0x12b8   :  { %v5263_v51 = vpop.xlane.xlu1 %5262  ;;  %9709 = vmatprep.subr.bf16.mxu0 %v13181_v22 }
0x12b9   :  { %10295 = vrcp.f32 %v5263_v51 }
0x12bc   :  { %v5710_v44 = vpop.permute.xlu1 %5709 }
0x12c0   :  { %v5817_v17 = vpop.permute.xlu1 %5816 }
0x12c1   :  { %v5822_v18 = vsel %vm698_vm2, %v5817_v17, 0 }
0x12c3   :  { %v10296_v61 = vpop.eup %10295 }
0x12c4   :  { %v5279_v9 = vmul.f32 %v10296_v61, %v12210_v19  ;;  %v5814_v52 = vpop.permute.xlu1 %5813 }
0x12c6   :  { %v5287_v32 = vpack.c.bf16 %v5279_v9, %v5279_v9 }
0x12c8   :  { %9646 = vmatmul.mubr.msk.bf16.vlgmr.msra.gmra.mrb[188].mxu1 %vm698_vm2, %v5287_v32  ;;  %v5921_v3 = vpop.permute.xlu1 %5920 }
0x12c9   :  { %9656 = vmatpush3.bf16.xpose.msra.mxu1 %v5718_v29  ;;  %9657 = vmatprep.mubr.msk.bf16.mxu1 %vm10422_vm1, %v13181_v22  ;;  %v5926_v54 = vsel %vm698_vm2, %v5921_v3, 0 }
0x12ca   :  { %9667 = vmatprep.subr.bf16.mxu1 %v13181_v22 }
0x12cc   :  { %v5918_v19 = vpop.permute.xlu1 %5917 }
0x12d0   :  { %9658 = vmatmul.mubr.msk.bf16.vlgmr.msra.gmra.mrb[192].mxu1 %vm698_vm2, %v5710_v44  ;;  %v6025_v2 = vpop.permute.xlu1 %6024 }
0x12d1   :  { %9668 = vmatpush3.bf16.xpose.msra.mxu1 %v5822_v18  ;;  %9669 = vmatprep.mubr.msk.bf16.mxu1 %vm10422_vm1, %v13181_v22  ;;  %v6030_v62 = vsel %vm698_vm2, %v6025_v2, 0 }
0x12d2   :  { %9679 = vmatprep.subr.bf16.mxu1 %v13181_v22 }
0x12d4   :  { %v6022_v31 = vpop.permute.xlu1 %6021 }
0x12d8   :  { %9670 = vmatmul.mubr.msk.bf16.vlgmr.msra.gmra.mrb[196].mxu1 %vm698_vm2, %v5814_v52  ;;  %v6227_v23 = vpop.permute.xlu1 %6226 }
0x12d9   :  { %9680 = vmatpush3.bf16.xpose.msra.mxu1 %v5926_v54  ;;  %9681 = vmatprep.mubr.msk.bf16.mxu1 %vm10422_vm1, %v13181_v22  ;;  %v6232_v1 = vsel %vm1166_vm3, %v6227_v23, 0 }
0x12da   :  { %9691 = vmatprep.subr.bf16.mxu1 %v13181_v22 }
0x12e0   :  { %9682 = vmatmul.mubr.msk.bf16.vlgmr.msra.gmra.mrb[200].mxu1 %vm698_vm2, %v5918_v19 }
0x12e1   :  { %9692 = vmatpush3.bf16.xpose.msra.mxu1 %v6030_v62  ;;  %9693 = vmatprep.mubr.msk.bf16.mxu1 %vm10422_vm1, %v13181_v22 }
0x12e2   :  { %9703 = vmatprep.subr.bf16.mxu1 %v13181_v22 }
0x12e8   :  { %9694 = vmatmul.mubr.msk.bf16.vlgmr.msra.gmra.mrb[204].mxu1 %vm698_vm2, %v6022_v31 }
0x12e9   :  { %9704 = vmatpush3.bf16.msra.mxu1 %v6232_v1  ;;  %9705 = vmatprep.mubr.msk.bf16.mxu1 %vm10422_vm1, %v13181_v22 }
0x12ea   :  { %9715 = vmatprep.subr.bf16.mxu1 %v13181_v22 }
0x134e   :  { %v12354_v34 = vpop.f32.mrb[168].mxu0 }
0x134f   :  { %13188 = vst [vmem:[#allocation3_spill] sm:$0xff] %v12354_v34  ;;  %v9605_v35 = vpop.f32.mrb[169].mxu0 }
0x1350   :  { %v5331_v10 = vpop.f32.mrb[170].mxu0  ;;  %v12356_v40 = vpop.f32.mrb[176].mxu1 }
0x1351   :  { %v9606_v5 = vpop.f32.mrb[171].mxu0  ;;  %v9611_v21 = vpop.f32.mrb[177].mxu1 }
0x1352   :  { %v5377_v49 = vpop.f32.mrb[178].mxu1 }
0x1353   :  { %v9612_v8 = vpop.f32.mrb[179].mxu1 }
0x1356   :  { %v12358_v28 = vpop.f32.mrb[172].mxu0 }
0x1357   :  { %13189 = vst [vmem:[#allocation2_spill] sm:$0xff] %v12358_v28  ;;  %v9617_v27 = vpop.f32.mrb[173].mxu0 }
0x1358   :  { %v5423_v63 = vpop.f32.mrb[174].mxu0  ;;  %v12360_v41 = vpop.f32.mrb[180].mxu1 }
0x1359   :  { %13190 = vst [vmem:[#allocation4_spill] sm:$0xff] %v12360_v41  ;;  %v9618_v0 = vpop.f32.mrb[175].mxu0  ;;  %v9623_v11 = vpop.f32.mrb[181].mxu1 }
0x135a   :  { %v5469_v51 = vpop.f32.mrb[182].mxu1 }
0x135b   :  { %v9624_v44 = vpop.f32.mrb[183].mxu1 }
0x1360   :  { %v12362_v17 = vpop.f32.mrb[176].mxu0 }
0x1361   :  { %13191 = vst [vmem:[#allocation5_spill] sm:$0xff] %v12362_v17  ;;  %v9629_v61 = vpop.f32.mrb[177].mxu0 }
0x1362   :  { %v5515_v9 = vpop.f32.mrb[178].mxu0  ;;  %v12364_v32 = vpop.f32.mrb[184].mxu1 }
0x1363   :  { %13192 = vst [vmem:[#allocation6_spill] sm:$0xff] %v12364_v32  ;;  %v9630_v52 = vpop.f32.mrb[179].mxu0  ;;  %v9635_v29 = vpop.f32.mrb[185].mxu1 }
0x1364   :  { %v5561_v3 = vpop.f32.mrb[186].mxu1 }
0x1365   :  { %v9636_v18 = vpop.f32.mrb[187].mxu1 }
0x1368   :  { %v12366_v19 = vpop.f32.mrb[180].mxu0 }
0x1369   :  { %13193 = vst [vmem:[#allocation7_spill] sm:$0xff] %v12366_v19  ;;  %v9641_v54 = vpop.f32.mrb[181].mxu0 }
0x136a   :  { %v5607_v2 = vpop.f32.mrb[182].mxu0 }
0x136b   :  { %v9642_v31 = vpop.f32.mrb[183].mxu0 }
0x1371   :  { %v12368_v62 = vpop.f32.mrb[184].mxu0 }
0x1372   :  { %v12372_v23 = vadd.f32 %v12368_v62, %v12124_v46  ;;  %v9653_v1 = vpop.f32.mrb[185].mxu0  ;;  %v6080_v35 = vsel %vm698_vm2, %v12368_v62, -inf }
0x1373   :  { %6081 = vmax.xlane.f32.xlu0 %v6080_v35  ;;  %v5705_v10 = vpop.f32.mrb[186].mxu0 }
0x1374   :  { %v9654_v5 = vpop.f32.mrb[187].mxu0 }
0x1379   :  { %v5806_v21 = vpop.f32.mrb[188].mxu0 }
0x137a   :  { %v12377_v49 = vadd.f32 %v5806_v21, %v12132_v53  ;;  %v9665_v8 = vpop.f32.mrb[189].mxu0  ;;  %v6086_v27 = vsel %vm698_vm2, %v5806_v21, -inf }
0x137b   :  { %6087 = vmax.xlane.f32.xlu0 %v6086_v27  ;;  %v5809_v63 = vpop.f32.mrb[190].mxu0 }
0x137c   :  { %v9666_v0 = vpop.f32.mrb[191].mxu0 }
0x1381   :  { %v12380_v11 = vpop.f32.mrb[192].mxu0 }
0x1382   :  { %v12384_v46 = vadd.f32 %v12380_v11, %v12140_v6  ;;  %v9677_v51 = vpop.f32.mrb[193].mxu0 }
0x1383   :  { %v5913_v44 = vpop.f32.mrb[194].mxu0 }
0x1384   :  { %v9678_v61 = vpop.f32.mrb[195].mxu0 }
0x1389   :  { %v12386_v9 = vpop.f32.mrb[196].mxu0 }
0x138a   :  { %v12390_v53 = vadd.f32 %v12386_v9, %v12148_v30  ;;  %v9689_v52 = vpop.f32.mrb[197].mxu0 }
0x138b   :  { %v6017_v29 = vpop.f32.mrb[198].mxu0 }
0x138c   :  { %v9690_v3 = vpop.f32.mrb[199].mxu0 }
0x139b   :  { %v12392_v18 = vpop.f32.mrb[188].mxu1 }
0x139c   :  { %13194 = vst [vmem:[#allocation8_spill] sm:$0xff] %v12392_v18  ;;  %v9647_v54 = vpop.f32.mrb[189].mxu1 }
0x139d   :  { %v5653_v2 = vpop.f32.mrb[190].mxu1 }
0x139e   :  { %v9648_v31 = vpop.f32.mrb[191].mxu1 }
0x13a3   :  { %v5754_v1 = vpop.f32.mrb[192].mxu1 }
0x13a4   :  { %v12395_v6 = vadd.f32 %v5754_v1, %v12128_v56  ;;  %v9659_v35 = vpop.f32.mrb[193].mxu1  ;;  %v6083_v10 = vsel %vm698_vm2, %v5754_v1, -inf  ;;  %v6092_v56 = vsel %vm698_vm2, %v12380_v11, -inf }
0x13a5   :  { %6084 = vmax.xlane.f32.xlu1 %v6083_v10  ;;  %v5757_v5 = vpop.f32.mrb[194].mxu1 }
0x13a6   :  { %v9660_v8 = vpop.f32.mrb[195].mxu1 }
0x13ab   :  { %v5858_v30 = vpop.f32.mrb[196].mxu1 }
0x13ac   :  { %v12399_v27 = vadd.f32 %v5858_v30, %v12136_v48  ;;  %v9671_v63 = vpop.f32.mrb[197].mxu1  ;;  %v6089_v0 = vsel %vm698_vm2, %v5858_v30, -inf  ;;  %v6098_v48 = vsel %vm698_vm2, %v12386_v9, -inf }
0x13ad   :  { %v5861_v51 = vpop.f32.mrb[198].mxu1  ;;  %6090 = vmax.xlane.f32.xlu0 %v6089_v0 }
0x13ae   :  { %v9672_v44 = vpop.f32.mrb[199].mxu1 }
0x13b1   :  { %6093 = vmax.xlane.f32.xlu0 %v6092_v56 }
0x13b3   :  { %v5962_v61 = vpop.f32.mrb[200].mxu1 }
0x13b4   :  { %v12405_v52 = vadd.f32 %v5962_v61, %v12144_v37  ;;  %v9683_v29 = vpop.f32.mrb[201].mxu1  ;;  %v6095_v3 = vsel %vm698_vm2, %v5962_v61, -inf }
0x13b5   :  { %6096 = vmax.xlane.f32.xlu1 %v6095_v3  ;;  %v5965_v54 = vpop.f32.mrb[202].mxu1  ;;  %6099 = vmax.xlane.f32.xlu0 %v6098_v48 }
0x13b6   :  { %v9684_v2 = vpop.f32.mrb[203].mxu1 }
0x13b7   :  { %v6276_v2 = vpop.permute.xlu1 %6275 }
0x13bb   :  { %v12410_v31 = vpop.f32.mrb[204].mxu1 }
0x13bc   :  { %v12414_v35 = vadd.f32 %v12410_v31, %v12152_v36  ;;  %v9695_v10 = vpop.f32.mrb[205].mxu1  ;;  %v6101_v8 = vsel %vm698_vm2, %v12410_v31, -inf }
0x13bd   :  { %v6069_v5 = vpop.f32.mrb[206].mxu1  ;;  %v12428_v10 = vpop.permute.xlu1 %6324 }
0x13be   :  { %v9696_v37 = vpop.f32.mrb[207].mxu1 }
0x13c6   :  { %6422 = vrot.lane.b32.xlu1 %v12265_v55, %s10423_s17 }
0x13cb   :  { %6373 = vrot.lane.b32.xlu0 %v12261_v13, %s10423_s17 }
0x13ea   :  { %6102 = vmax.xlane.f32.xlu1 %v6101_v8 }
0x1400   :  { %v6082_v63 = vpop.xlane.xlu0 %6081 }
0x1401   :  { %v6104_v0 = vsub.f32 %v12368_v62, %v6082_v63 }
0x1403   :  { %v6112_v51 = vmul.f32 1.442695, %v6104_v0 }
0x1405   :  { %10297 = vpow2.f32 %v6112_v51 }
0x1408   :  { %v6088_v36 = vpop.xlane.xlu0 %6087 }
0x1409   :  { %v6106_v44 = vsub.f32 %v5806_v21, %v6088_v36 }
0x140b   :  { %v6116_v56 = vmul.f32 1.442695, %v6106_v44 }
0x140d   :  { %10299 = vpow2.f32 %v6116_v56 }
0x140f   :  { %v10298_v29 = vpop.eup %10297 }
0x1410   :  { %v6128_v3 = vsel %vm698_vm2, %v10298_v29, 0.0 }
0x1411   :  { %6129 = vadd.xlane.f32.xlu0 %v6128_v3 }
0x1417   :  { %v12424_v48 = vpop.eup %10299 }
0x1418   :  { %v6134_v54 = vsel %vm698_vm2, %v12424_v48, 0.0 }
0x1419   :  { %6135 = vadd.xlane.f32.xlu0 %v6134_v54 }
0x1432   :  { %v6085_v62 = vpop.xlane.xlu1 %6084 }
0x1433   :  { %v6105_v5 = vsub.f32 %v5754_v1, %v6085_v62 }
0x1435   :  { %v6114_v37 = vmul.f32 1.442695, %v6105_v5 }
0x1437   :  { %10301 = vpow2.f32 %v6114_v37 }
0x143a   :  { %v6091_v21 = vpop.xlane.xlu0 %6090 }
0x143b   :  { %v6107_v8 = vsub.f32 %v5858_v30, %v6091_v21 }
0x143d   :  { %v6118_v63 = vmul.f32 1.442695, %v6107_v8 }
0x143e   :  { %v6094_v0 = vpop.xlane.xlu0 %6093 }
0x143f   :  { %10303 = vpow2.f32 %v6118_v63  ;;  %v6108_v51 = vsub.f32 %v12380_v11, %v6094_v0 }
0x1441   :  { %v12431_v36 = vpop.eup %10301  ;;  %v6120_v44 = vmul.f32 1.442695, %v6108_v51 }
0x1442   :  { %v6131_v56 = vsel %vm698_vm2, %v12431_v36, 0.0  ;;  %v6097_v11 = vpop.xlane.xlu1 %6096  ;;  %v6100_v5 = vpop.xlane.xlu0 %6099 }
0x1443   :  { %10305 = vpow2.f32 %v6120_v44  ;;  %6132 = vadd.xlane.f32.xlu1 %v6131_v56  ;;  %v6109_v62 = vsub.f32 %v5962_v61, %v6097_v11  ;;  %v6110_v21 = vsub.f32 %v12386_v9, %v6100_v5 }
0x1445   :  { %v6122_v37 = vmul.f32 1.442695, %v6109_v62  ;;  %v6124_v8 = vmul.f32 1.442695, %v6110_v21  ;;  %v6281_v21 = vsel %vm1166_vm3, %v6276_v2, 0 }
0x1446   :  { %v12458_v61 = vpop.permute.xlu1 %6422  ;;  %v6374_v9 = vpop.permute.xlu0 %6373 }
0x1447   :  { %10307 = vpow2.f32 %v6122_v37 }
0x1448   :  { %10309 = vpow2.f32 %v6124_v8 }
0x1449   :  { %v12435_v3 = vpop.eup %10303 }
0x144a   :  { %v6137_v1 = vsel %vm698_vm2, %v12435_v3, 0.0 }
0x144b   :  { %6138 = vadd.xlane.f32.xlu1 %v6137_v1 }
0x144d   :  { %v12439_v30 = vpop.eup %10305 }
0x144e   :  { %v6140_v54 = vsel %vm698_vm2, %v12439_v30, 0.0 }
0x144f   :  { %6141 = vadd.xlane.f32.xlu0 %v6140_v54 }
0x1451   :  { %v12448_v63 = vpop.eup %10307 }
0x1452   :  { %v6143_v0 = vsel %vm698_vm2, %v12448_v63, 0.0  ;;  %v12452_v51 = vpop.eup %10309 }
0x1453   :  { %v6146_v44 = vsel %vm698_vm2, %v12452_v51, 0.0 }
0x145c   :  { %6520 = vrot.lane.b32.xlu1 %v12287_v43, %s10423_s17 }
0x1465   :  { %6471 = vrot.lane.b32.xlu0 %v12284_v12, %s10423_s17 }
0x1477   :  { %v6103_v56 = vpop.xlane.xlu1 %6102 }
0x1478   :  { %v6111_v1 = vsub.f32 %v12410_v31, %v6103_v56  ;;  %v6379_v56 = vsel %vm1166_vm3, %v6374_v9, 0 }
0x147a   :  { %v6126_v11 = vmul.f32 1.442695, %v6111_v1 }
0x1480   :  { %6144 = vadd.xlane.f32.xlu1 %v6143_v0 }
0x1484   :  { %6147 = vadd.xlane.f32.xlu0 %v6146_v44 }
0x1491   :  { %6620 = vrot.lane.b32.xlu1 %v11990_v20, %s10424_s18 }
0x149a   :  { %6570 = vrot.lane.b32.xlu0 %v11988_v26, %s10424_s18 }
0x149e   :  { %v6130_v54 = vpop.xlane.xlu0 %6129  ;;  %6568 = vrot.lane.b32.xlu0 %v12009_v47, %s10424_s18 }
0x149f   :  { %10311 = vrcp.f32 %v6130_v54 }
0x14a0   :  { %10313 = vpow2.f32 %v6126_v11 }
0x14a2   :  { %6670 = vrot.lane.b32.xlu0 %v12006_v59, %s10424_s18 }
0x14a6   :  { %v6136_v62 = vpop.xlane.xlu0 %6135  ;;  %6668 = vrot.lane.b32.xlu0 %v12037_v14, %s10424_s18 }
0x14a7   :  { %10315 = vrcp.f32 %v6136_v62 }
0x14a9   :  { %v10312_v5 = vpop.eup %10311 }
0x14aa   :  { %6770 = vrot.lane.b32.xlu0 %v12045_v58, %s10424_s18  ;;  %v6160_v31 = vmul.f32 %v10312_v5, %v10298_v29  ;;  %v12477_v8 = vpop.eup %10313  ;;  %v6330_v5 = vsel %vm1166_vm3, %v12428_v10, 0  ;;  %v6428_v10 = vsel %vm1166_vm3, %v12458_v61, 0 }
0x14ab   :  { %v6149_v2 = vsel %vm698_vm2, %v12477_v8, 0.0 }
0x14ac   :  { %v6168_v37 = vpack.c.bf16 %v6160_v31, %v6160_v31 }
0x14ae   :  { %9700 = vmatmul.mubr.msk.bf16.vlgmr.msra.gmra.mrb[200].mxu0 %vm698_vm2, %v6168_v37  ;;  %6768 = vrot.lane.b32.xlu0 %v12069_v24, %s10424_s18 }
0x14af   :  { %9710 = vmatpush3.bf16.msra.mxu0 %v6281_v21  ;;  %9711 = vmatprep.mubr.msk.bf16.mxu0 %vm10422_vm1, %v13181_v22 }
0x14b0   :  { %9721 = vmatprep.subr.bf16.mxu0 %v13181_v22 }
0x14b1   :  { %v10316_v0 = vpop.eup %10315 }
0x14b2   :  { %6870 = vrot.lane.b32.xlu0 %v12066_v39, %s10424_s18  ;;  %v6162_v29 = vmul.f32 %v10316_v0, %v12424_v48 }
0x14b4   :  { %v6170_v44 = vpack.c.bf16 %v6162_v29, %v6162_v29 }
0x14b5   :  { %6150 = vadd.xlane.f32.xlu1 %v6149_v2 }
0x14b6   :  { %9712 = vmatmul.mubr.msk.bf16.vlgmr.msra.gmra.mrb[204].mxu0 %vm698_vm2, %v6170_v44  ;;  %6868 = vrot.lane.b32.xlu0 %v12104_v45, %s10424_s18 }
0x14b7   :  { %9722 = vmatpush3.bf16.msra.mxu0 %v6379_v56  ;;  %9723 = vmatprep.mubr.msk.bf16.mxu0 %vm10422_vm1, %v13181_v22 }
0x14b8   :  { %9733 = vmatprep.subr.bf16.mxu0 %v13181_v22 }
0x14ba   :  { %7072 = vrot.lane.b32.xlu0 %v12101_v16, %s10424_s18 }
0x14c6   :  { %6618 = vrot.lane.b32.xlu1 %v12013_v38, %s10424_s18 }
0x14ca   :  { %6720 = vrot.lane.b32.xlu1 %v12011_v42, %s10424_s18 }
0x14ce   :  { %6718 = vrot.lane.b32.xlu1 %v12043_v57, %s10424_s18 }
0x14d0   :  { %v6133_v48 = vpop.xlane.xlu1 %6132 }
0x14d1   :  { %10317 = vrcp.f32 %v6133_v48 }
0x14d2   :  { %6820 = vrot.lane.b32.xlu1 %v12051_v4, %s10424_s18 }
0x14d6   :  { %6818 = vrot.lane.b32.xlu1 %v12073_v50, %s10424_s18 }
0x14d8   :  { %v6139_v9 = vpop.xlane.xlu1 %6138 }
0x14d9   :  { %10319 = vrcp.f32 %v6139_v9 }
0x14da   :  { %6920 = vrot.lane.b32.xlu1 %v12071_v60, %s10424_s18 }
0x14db   :  { %v10318_v1 = vpop.eup %10317 }
0x14dc   :  { %v6142_v54 = vpop.xlane.xlu0 %6141  ;;  %v6161_v11 = vmul.f32 %v10318_v1, %v12431_v36 }
0x14dd   :  { %10321 = vrcp.f32 %v6142_v54 }
0x14de   :  { %6918 = vrot.lane.b32.xlu1 %v12108_v15, %s10424_s18  ;;  %v6169_v62 = vpack.c.bf16 %v6161_v11, %v6161_v11 }
0x14e0   :  { %9706 = vmatmul.mubr.msk.bf16.vlgmr.msra.gmra.mrb[208].mxu1 %vm698_vm2, %v6169_v62  ;;  %v6472_v29 = vpop.permute.xlu0 %6471 }
0x14e1   :  { %9716 = vmatpush3.bf16.msra.mxu1 %v6330_v5  ;;  %9717 = vmatprep.mubr.msk.bf16.mxu1 %vm10422_vm1, %v13181_v22  ;;  %v6477_v2 = vsel %vm1166_vm3, %v6472_v29, 0 }
0x14e2   :  { %7120 = vrot.lane.b32.xlu1 %v12106_v25, %s10424_s18  ;;  %9727 = vmatprep.subr.bf16.mxu1 %v13181_v22 }
0x14e3   :  { %v10320_v36 = vpop.eup %10319 }
0x14e4   :  { %v6163_v31 = vmul.f32 %v10320_v36, %v12435_v3 }
0x14e6   :  { %7168 = vrot.lane.b32.xlu1 %v12234_v33, %s10424_s18  ;;  %v6171_v37 = vpack.c.bf16 %v6163_v31, %v6163_v31 }
0x14e7   :  { %v10322_v21 = vpop.eup %10321 }
0x14e8   :  { %v6164_v0 = vmul.f32 %v10322_v21, %v12439_v30  ;;  %9718 = vmatmul.mubr.msk.bf16.vlgmr.msra.gmra.mrb[212].mxu1 %vm698_vm2, %v6171_v37  ;;  %v6521_v30 = vpop.permute.xlu1 %6520 }
0x14e9   :  { %9728 = vmatpush3.bf16.msra.mxu1 %v6428_v10  ;;  %9729 = vmatprep.mubr.msk.bf16.mxu1 %vm10422_vm1, %v13181_v22  ;;  %v6526_v62 = vsel %vm1166_vm3, %v6521_v30, 0 }
0x14ea   :  { %7216 = vrot.lane.b32.xlu1 %v12240_v7, %s10424_s18  ;;  %v6172_v3 = vpack.c.bf16 %v6164_v0, %v6164_v0  ;;  %9739 = vmatprep.subr.bf16.mxu1 %v13181_v22 }
0x14ec   :  { %9724 = vmatmul.mubr.msk.bf16.vlgmr.msra.gmra.mrb[208].mxu0 %vm698_vm2, %v6172_v3 }
0x14ed   :  { %9734 = vmatpush3.bf16.msra.mxu0 %v6477_v2  ;;  %9735 = vmatprep.mubr.msk.bf16.mxu0 %vm10422_vm1, %v13181_v22 }
0x14ee   :  { %9745 = vmatprep.subr.bf16.mxu0 %v13181_v22 }
0x150d   :  { %v6145_v61 = vpop.xlane.xlu1 %6144 }
0x150e   :  { %10323 = vrcp.f32 %v6145_v61 }
0x1511   :  { %v6148_v44 = vpop.xlane.xlu0 %6147  ;;  %v6621_v30 = vpop.permute.xlu1 %6620 }
0x1512   :  { %10325 = vrcp.f32 %v6148_v44 }
0x1515   :  { %v6571_v56 = vpop.permute.xlu0 %6570 }
0x1516   :  { %v6576_v37 = vsel %vm698_vm2, %v6571_v56, 0 }
0x1518   :  { %v10324_v48 = vpop.eup %10323 }
0x1519   :  { %v6165_v9 = vmul.f32 %v10324_v48, %v12448_v63  ;;  %v6569_v1 = vpop.permute.xlu0 %6568 }
0x151b   :  { %v6173_v54 = vpack.c.bf16 %v6165_v9, %v6165_v9 }
0x151c   :  { %v10326_v11 = vpop.eup %10325 }
0x151d   :  { %v6166_v5 = vmul.f32 %v10326_v11, %v12452_v51  ;;  %9730 = vmatmul.mubr.msk.bf16.vlgmr.msra.gmra.mrb[216].mxu1 %vm698_vm2, %v6173_v54  ;;  %v6671_v36 = vpop.permute.xlu0 %6670 }
0x151e   :  { %9740 = vmatpush3.bf16.msra.mxu1 %v6526_v62  ;;  %9741 = vmatprep.mubr.msk.bf16.mxu1 %vm10422_vm1, %v13181_v22  ;;  %v6676_v21 = vsel %vm698_vm2, %v6671_v36, 0 }
0x151f   :  { %v6174_v31 = vpack.c.bf16 %v6166_v5, %v6166_v5  ;;  %9751 = vmatprep.subr.bf16.mxu1 %v13181_v22  ;;  %v6626_v5 = vsel %vm698_vm2, %v6621_v30, 0 }
0x1521   :  { %9736 = vmatmul.mubr.msk.bf16.vlgmr.msra.gmra.mrb[212].mxu0 %vm698_vm2, %v6174_v31  ;;  %v6669_v63 = vpop.permute.xlu0 %6668 }
0x1522   :  { %9746 = vmatpush3.bf16.xpose.msra.mxu0 %v6576_v37  ;;  %9747 = vmatprep.mubr.msk.bf16.mxu0 %vm10422_vm1, %v13181_v22 }
0x1523   :  { %9757 = vmatprep.subr.bf16.mxu0 %v13181_v22 }
0x1525   :  { %v6771_v51 = vpop.permute.xlu0 %6770 }
0x1526   :  { %v6776_v0 = vsel %vm698_vm2, %v6771_v51, 0 }
0x1529   :  { %9748 = vmatmul.mubr.msk.bf16.vlgmr.msra.gmra.mrb[216].mxu0 %vm698_vm2, %v6569_v1  ;;  %v6769_v10 = vpop.permute.xlu0 %6768 }
0x152a   :  { %9758 = vmatpush3.bf16.xpose.msra.mxu0 %v6676_v21  ;;  %9759 = vmatprep.mubr.msk.bf16.mxu0 %vm10422_vm1, %v13181_v22 }
0x152b   :  { %9769 = vmatprep.subr.bf16.mxu0 %v13181_v22 }
0x152d   :  { %v6871_v29 = vpop.permute.xlu0 %6870 }
0x152e   :  { %v6876_v2 = vsel %vm698_vm2, %v6871_v29, 0 }
0x1531   :  { %9760 = vmatmul.mubr.msk.bf16.vlgmr.msra.gmra.mrb[220].mxu0 %vm698_vm2, %v6669_v63  ;;  %v6869_v3 = vpop.permute.xlu0 %6868 }
0x1532   :  { %9770 = vmatpush3.bf16.xpose.msra.mxu0 %v6776_v0  ;;  %9771 = vmatprep.mubr.msk.bf16.mxu0 %vm10422_vm1, %v13181_v22 }
0x1533   :  { %9781 = vmatprep.subr.bf16.mxu0 %v13181_v22 }
0x1535   :  { %v7073_v61 = vpop.permute.xlu0 %7072 }
0x1536   :  { %v7078_v44 = vsel %vm1166_vm3, %v7073_v61, 0 }
0x1539   :  { %9772 = vmatmul.mubr.msk.bf16.vlgmr.msra.gmra.mrb[224].mxu0 %vm698_vm2, %v6769_v10 }
0x153a   :  { %9782 = vmatpush3.bf16.xpose.msra.mxu0 %v6876_v2  ;;  %9783 = vmatprep.mubr.msk.bf16.mxu0 %vm10422_vm1, %v13181_v22 }
0x153b   :  { %9793 = vmatprep.subr.bf16.mxu0 %v13181_v22 }
0x1541   :  { %9784 = vmatmul.mubr.msk.bf16.vlgmr.msra.gmra.mrb[228].mxu0 %vm698_vm2, %v6869_v3 }
0x1542   :  { %9794 = vmatpush3.bf16.msra.mxu0 %v7078_v44  ;;  %v6151_v56 = vpop.xlane.xlu1 %6150  ;;  %9795 = vmatprep.mubr.msk.bf16.mxu0 %vm10422_vm1, %v13181_v22 }
0x1543   :  { %10327 = vrcp.f32 %v6151_v56  ;;  %9805 = vmatprep.subr.bf16.mxu0 %v13181_v22 }
0x1546   :  { %v6619_v48 = vpop.permute.xlu1 %6618 }
0x154a   :  { %v6721_v9 = vpop.permute.xlu1 %6720 }
0x154b   :  { %v6726_v31 = vsel %vm698_vm2, %v6721_v9, 0 }
0x154d   :  { %v10328_v1 = vpop.eup %10327 }
0x154e   :  { %v6167_v54 = vmul.f32 %v10328_v1, %v12477_v8  ;;  %v6719_v62 = vpop.permute.xlu1 %6718 }
0x1550   :  { %v6175_v11 = vpack.c.bf16 %v6167_v54, %v6167_v54 }
0x1552   :  { %9742 = vmatmul.mubr.msk.bf16.vlgmr.msra.gmra.mrb[220].mxu1 %vm698_vm2, %v6175_v11  ;;  %v6821_v36 = vpop.permute.xlu1 %6820 }
0x1553   :  { %9752 = vmatpush3.bf16.xpose.msra.mxu1 %v6626_v5  ;;  %9753 = vmatprep.mubr.msk.bf16.mxu1 %vm10422_vm1, %v13181_v22  ;;  %v6826_v37 = vsel %vm698_vm2, %v6821_v36, 0 }
0x1554   :  { %9763 = vmatprep.subr.bf16.mxu1 %v13181_v22 }
0x1556   :  { %v6819_v8 = vpop.permute.xlu1 %6818 }
0x155a   :  { %9754 = vmatmul.mubr.msk.bf16.vlgmr.msra.gmra.mrb[224].mxu1 %vm698_vm2, %v6619_v48  ;;  %v6921_v63 = vpop.permute.xlu1 %6920 }
0x155b   :  { %9764 = vmatpush3.bf16.xpose.msra.mxu1 %v6726_v31  ;;  %9765 = vmatprep.mubr.msk.bf16.mxu1 %vm10422_vm1, %v13181_v22  ;;  %v6926_v21 = vsel %vm698_vm2, %v6921_v63, 0 }
0x155c   :  { %9775 = vmatprep.subr.bf16.mxu1 %v13181_v22 }
0x155e   :  { %v6919_v51 = vpop.permute.xlu1 %6918 }
0x1562   :  { %9766 = vmatmul.mubr.msk.bf16.vlgmr.msra.gmra.mrb[228].mxu1 %vm698_vm2, %v6719_v62  ;;  %v7121_v10 = vpop.permute.xlu1 %7120 }
0x1563   :  { %9776 = vmatpush3.bf16.xpose.msra.mxu1 %v6826_v37  ;;  %9777 = vmatprep.mubr.msk.bf16.mxu1 %vm10422_vm1, %v13181_v22  ;;  %v7126_v0 = vsel %vm1166_vm3, %v7121_v10, 0 }
0x1564   :  { %9787 = vmatprep.subr.bf16.mxu1 %v13181_v22 }
0x156a   :  { %9778 = vmatmul.mubr.msk.bf16.vlgmr.msra.gmra.mrb[232].mxu1 %vm698_vm2, %v6819_v8 }
0x156b   :  { %9788 = vmatpush3.bf16.xpose.msra.mxu1 %v6926_v21  ;;  %9789 = vmatprep.mubr.msk.bf16.mxu1 %vm10422_vm1, %v13181_v22 }
0x156c   :  { %9799 = vmatprep.subr.bf16.mxu1 %v13181_v22 }
0x1572   :  { %9790 = vmatmul.mubr.msk.bf16.vlgmr.msra.gmra.mrb[236].mxu1 %vm698_vm2, %v6919_v51 }
0x1573   :  { %9800 = vmatpush3.bf16.msra.mxu1 %v7126_v0  ;;  %9801 = vmatprep.mubr.msk.bf16.mxu1 %vm10422_vm1, %v13181_v22 }
0x1574   :  { %9811 = vmatprep.subr.bf16.mxu1 %v13181_v22 }
0x1581   :  { %v12592_v29 = vpop.f32.mrb[200].mxu0 }
0x1582   :  { %v9701_v3 = vpop.f32.mrb[201].mxu0 }
0x1583   :  { %v6222_v2 = vpop.f32.mrb[202].mxu0 }
0x1584   :  { %v9702_v30 = vpop.f32.mrb[203].mxu0 }
0x1589   :  { %v12594_v61 = vpop.f32.mrb[204].mxu0 }
0x158a   :  { %v9713_v44 = vpop.f32.mrb[205].mxu0 }
0x158b   :  { %v6320_v56 = vpop.f32.mrb[206].mxu0 }
0x158c   :  { %v9714_v48 = vpop.f32.mrb[207].mxu0 }
0x15b3   :  { %v12596_v9 = vpop.f32.mrb[208].mxu1 }
0x15b4   :  { %v9707_v54 = vpop.f32.mrb[209].mxu1 }
0x15b5   :  { %v6271_v11 = vpop.f32.mrb[210].mxu1 }
0x15b6   :  { %v9708_v62 = vpop.f32.mrb[211].mxu1 }
0x15bb   :  { %v12600_v5 = vpop.f32.mrb[212].mxu1 }
0x15bc   :  { %v9719_v31 = vpop.f32.mrb[213].mxu1 }
0x15bd   :  { %v6369_v8 = vpop.f32.mrb[214].mxu1 }
0x15be   :  { %v9720_v37 = vpop.f32.mrb[215].mxu1 }
0x15bf   :  { %v12604_v63 = vpop.f32.mrb[208].mxu0 }
0x15c0   :  { %v9725_v51 = vpop.f32.mrb[209].mxu0 }
0x15c1   :  { %v6418_v21 = vpop.f32.mrb[210].mxu0 }
0x15c2   :  { %v9726_v10 = vpop.f32.mrb[211].mxu0 }
0x15f0   :  { %v12606_v0 = vpop.f32.mrb[216].mxu1 }
0x15f1   :  { %v9731_v2 = vpop.f32.mrb[217].mxu1 }
0x15f2   :  { %v6467_v30 = vpop.f32.mrb[218].mxu1 }
0x15f3   :  { %v9732_v44 = vpop.f32.mrb[219].mxu1 }
0x15f4   :  { %v12610_v56 = vpop.f32.mrb[212].mxu0 }
0x15f5   :  { %v9737_v48 = vpop.f32.mrb[213].mxu0 }
0x15f6   :  { %v6516_v54 = vpop.f32.mrb[214].mxu0 }
0x15f7   :  { %v9738_v11 = vpop.f32.mrb[215].mxu0 }
0x15fc   :  { %v12612_v62 = vpop.f32.mrb[216].mxu0 }
0x15fd   :  { %v12616_v31 = vadd.f32 %v12612_v62, %v12372_v23  ;;  %v9749_v8 = vpop.f32.mrb[217].mxu0  ;;  %v6976_v37 = vsel %vm698_vm2, %v12612_v62, -inf }
0x15fe   :  { %6977 = vmax.xlane.f32.xlu0 %v6976_v37  ;;  %v6615_v51 = vpop.f32.mrb[218].mxu0 }
0x15ff   :  { %v9750_v21 = vpop.f32.mrb[219].mxu0 }
0x1604   :  { %v6712_v10 = vpop.f32.mrb[220].mxu0 }
0x1605   :  { %v12621_v2 = vadd.f32 %v6712_v10, %v12377_v49  ;;  %v9761_v30 = vpop.f32.mrb[221].mxu0  ;;  %v6982_v44 = vsel %vm698_vm2, %v6712_v10, -inf }
0x1606   :  { %6983 = vmax.xlane.f32.xlu0 %v6982_v44  ;;  %v6715_v48 = vpop.f32.mrb[222].mxu0 }
0x1607   :  { %v9762_v54 = vpop.f32.mrb[223].mxu0 }
0x160c   :  { %v12624_v11 = vpop.f32.mrb[224].mxu0 }
0x160d   :  { %v12628_v23 = vadd.f32 %v12624_v11, %v12384_v46  ;;  %v9773_v8 = vpop.f32.mrb[225].mxu0 }
0x160e   :  { %v6815_v37 = vpop.f32.mrb[226].mxu0 }
0x160f   :  { %v9774_v51 = vpop.f32.mrb[227].mxu0 }
0x1614   :  { %v12630_v21 = vpop.f32.mrb[228].mxu0 }
0x1615   :  { %v12634_v49 = vadd.f32 %v12630_v21, %v12390_v53  ;;  %v9785_v30 = vpop.f32.mrb[229].mxu0 }
0x1616   :  { %v6915_v36 = vpop.f32.mrb[230].mxu0 }
0x1617   :  { %v9786_v44 = vpop.f32.mrb[231].mxu0 }
0x1625   :  { %v12636_v48 = vpop.f32.mrb[220].mxu1 }
0x1626   :  { %v9743_v3 = vpop.f32.mrb[221].mxu1 }
0x1627   :  { %v6565_v46 = vpop.f32.mrb[222].mxu1 }
0x1628   :  { %v9744_v1 = vpop.f32.mrb[223].mxu1 }
0x162d   :  { %v6662_v8 = vpop.f32.mrb[224].mxu1 }
0x162e   :  { %v12641_v37 = vadd.f32 %v6662_v8, %v12395_v6  ;;  %v9755_v51 = vpop.f32.mrb[225].mxu1  ;;  %v6979_v19 = vsel %vm698_vm2, %v6662_v8, -inf  ;;  %v6988_v6 = vsel %vm698_vm2, %v12624_v11, -inf }
0x162f   :  { %6980 = vmax.xlane.f32.xlu1 %v6979_v19  ;;  %v6665_v53 = vpop.f32.mrb[226].mxu1 }
0x1630   :  { %v9756_v30 = vpop.f32.mrb[227].mxu1 }
0x1635   :  { %v6762_v36 = vpop.f32.mrb[228].mxu1 }
0x1636   :  { %v12645_v44 = vadd.f32 %v6762_v36, %v12399_v27  ;;  %v9767_v18 = vpop.f32.mrb[229].mxu1  ;;  %v6985_v54 = vsel %vm698_vm2, %v6762_v36, -inf  ;;  %v6994_v27 = vsel %vm698_vm2, %v12630_v21, -inf }
0x1637   :  { %v6765_v3 = vpop.f32.mrb[230].mxu1  ;;  %6986 = vmax.xlane.f32.xlu0 %v6985_v54 }
0x1638   :  { %v9768_v1 = vpop.f32.mrb[231].mxu1 }
0x163b   :  { %6989 = vmax.xlane.f32.xlu0 %v6988_v6 }
0x163d   :  { %v6862_v46 = vpop.f32.mrb[232].mxu1 }
0x163e   :  { %v12651_v51 = vadd.f32 %v6862_v46, %v12405_v52  ;;  %v9779_v19 = vpop.f32.mrb[233].mxu1  ;;  %v6991_v53 = vsel %vm698_vm2, %v6862_v46, -inf }
0x163f   :  { %6992 = vmax.xlane.f32.xlu1 %v6991_v53  ;;  %v6865_v18 = vpop.f32.mrb[234].mxu1  ;;  %6995 = vmax.xlane.f32.xlu0 %v6994_v27 }
0x1640   :  { %v9780_v30 = vpop.f32.mrb[235].mxu1 }
0x1645   :  { %v12656_v54 = vpop.f32.mrb[236].mxu1 }
0x1646   :  { %v12660_v3 = vadd.f32 %v12656_v54, %v12414_v35  ;;  %v9791_v1 = vpop.f32.mrb[237].mxu1  ;;  %v6997_v19 = vsel %vm698_vm2, %v12656_v54, -inf }
0x1647   :  { %v6965_v6 = vpop.f32.mrb[238].mxu1 }
0x1648   :  { %v9792_v52 = vpop.f32.mrb[239].mxu1 }
0x1650   :  { %7312 = vrot.lane.b32.xlu1 %v12265_v55, %s10424_s18 }
0x1655   :  { %7264 = vrot.lane.b32.xlu0 %v12261_v13, %s10424_s18 }
0x1674   :  { %6998 = vmax.xlane.f32.xlu1 %v6997_v19  ;;  %v7169_v19 = vpop.permute.xlu1 %7168 }
0x1678   :  { %v12674_v28 = vpop.permute.xlu1 %7216 }
0x168b   :  { %v6978_v53 = vpop.xlane.xlu0 %6977 }
0x168c   :  { %v7000_v27 = vsub.f32 %v12612_v62, %v6978_v53 }
0x168e   :  { %v7008_v18 = vmul.f32 1.442695, %v7000_v27 }
0x1690   :  { %10329 = vpow2.f32 %v7008_v18 }
0x1693   :  { %v6984_v35 = vpop.xlane.xlu0 %6983 }
0x1694   :  { %v7002_v30 = vsub.f32 %v6712_v10, %v6984_v35 }
0x1696   :  { %v7012_v1 = vmul.f32 1.442695, %v7002_v30 }
0x1698   :  { %10331 = vpow2.f32 %v7012_v1 }
0x169a   :  { %v10330_v6 = vpop.eup %10329 }
0x169b   :  { %v7024_v52 = vsel %vm698_vm2, %v10330_v6, 0.0 }
0x169c   :  { %7025 = vadd.xlane.f32.xlu0 %v7024_v52 }
0x16a2   :  { %v12670_v17 = vpop.eup %10331 }
0x16a3   :  { %v7030_v32 = vsel %vm698_vm2, %v12670_v17, 0.0 }
0x16a4   :  { %7031 = vadd.xlane.f32.xlu0 %v7030_v32 }
0x16bc   :  { %v6981_v62 = vpop.xlane.xlu1 %6980 }
0x16bd   :  { %v7001_v53 = vsub.f32 %v6662_v8, %v6981_v62 }
0x16bf   :  { %v7010_v27 = vmul.f32 1.442695, %v7001_v53 }
0x16c1   :  { %10333 = vpow2.f32 %v7010_v27 }
0x16c4   :  { %v6987_v10 = vpop.xlane.xlu0 %6986 }
0x16c5   :  { %v7003_v18 = vsub.f32 %v6762_v36, %v6987_v10 }
0x16c7   :  { %v7014_v35 = vmul.f32 1.442695, %v7003_v18 }
0x16c8   :  { %v6990_v30 = vpop.xlane.xlu0 %6989 }
0x16c9   :  { %10335 = vpow2.f32 %v7014_v35  ;;  %v7004_v1 = vsub.f32 %v12624_v11, %v6990_v30 }
0x16cb   :  { %v12677_v52 = vpop.eup %10333  ;;  %v7016_v41 = vmul.f32 1.442695, %v7004_v1 }
0x16cc   :  { %v7027_v32 = vsel %vm698_vm2, %v12677_v52, 0.0  ;;  %v6996_v53 = vpop.xlane.xlu0 %6995 }
0x16cd   :  { %10337 = vpow2.f32 %v7016_v41  ;;  %7028 = vadd.xlane.f32.xlu1 %v7027_v32  ;;  %v6993_v41 = vpop.xlane.xlu1 %6992  ;;  %v7006_v10 = vsub.f32 %v12630_v21, %v6996_v53 }
0x16ce   :  { %v7005_v11 = vsub.f32 %v6862_v46, %v6993_v41 }
0x16cf   :  { %v7020_v18 = vmul.f32 1.442695, %v7006_v10 }
0x16d0   :  { %v7018_v27 = vmul.f32 1.442695, %v7005_v11  ;;  %v7265_v21 = vpop.permute.xlu0 %7264 }
0x16d1   :  { %v7313_v46 = vpop.permute.xlu1 %7312 }
0x16d2   :  { %10339 = vpow2.f32 %v7018_v27  ;;  %v7318_v10 = vsel %vm1166_vm3, %v7313_v46, 0 }
0x16d3   :  { %v12681_v34 = vpop.eup %10335  ;;  %10341 = vpow2.f32 %v7020_v18 }
0x16d4   :  { %v7033_v8 = vsel %vm698_vm2, %v12681_v34, 0.0 }
0x16d5   :  { %7034 = vadd.xlane.f32.xlu1 %v7033_v8 }
0x16d7   :  { %v12685_v36 = vpop.eup %10337 }
0x16d8   :  { %v7036_v62 = vsel %vm698_vm2, %v12685_v36, 0.0 }
0x16d9   :  { %7037 = vadd.xlane.f32.xlu0 %v7036_v62 }
0x16dc   :  { %v12694_v35 = vpop.eup %10339 }
0x16dd   :  { %v7039_v30 = vsel %vm698_vm2, %v12694_v35, 0.0  ;;  %v12698_v1 = vpop.eup %10341 }
0x16de   :  { %v7042_v32 = vsel %vm698_vm2, %v12698_v1, 0.0 }
0x16e6   :  { %7408 = vrot.lane.b32.xlu1 %v12287_v43, %s10424_s18 }
0x16ef   :  { %7360 = vrot.lane.b32.xlu0 %v12284_v12, %s10424_s18 }
0x1701   :  { %v6999_v8 = vpop.xlane.xlu1 %6998 }
0x1702   :  { %v7007_v62 = vsub.f32 %v12656_v54, %v6999_v8  ;;  %v7174_v54 = vsel %vm1166_vm3, %v7169_v19, 0  ;;  %v7270_v19 = vsel %vm1166_vm3, %v7265_v21, 0 }
0x1704   :  { %v7022_v11 = vmul.f32 1.442695, %v7007_v62 }
0x170a   :  { %7040 = vadd.xlane.f32.xlu1 %v7039_v30 }
0x170e   :  { %7043 = vadd.xlane.f32.xlu0 %v7042_v32 }
0x171b   :  { %7508 = vrot.lane.b32.xlu1 %v11990_v20, %s10425_s19 }
0x1724   :  { %7458 = vrot.lane.b32.xlu0 %v11988_v26, %s10425_s19 }
0x1728   :  { %7456 = vrot.lane.b32.xlu0 %v12009_v47, %s10425_s19 }
0x1729   :  { %v7026_v41 = vpop.xlane.xlu0 %7025 }
0x172a   :  { %10343 = vrcp.f32 %v7026_v41 }
0x172b   :  { %10345 = vpow2.f32 %v7022_v11 }
0x172c   :  { %7558 = vrot.lane.b32.xlu0 %v12006_v59, %s10425_s19 }
0x1730   :  { %7556 = vrot.lane.b32.xlu0 %v12037_v14, %s10425_s19 }
0x1731   :  { %v7032_v20 = vpop.xlane.xlu0 %7031 }
0x1732   :  { %10347 = vrcp.f32 %v7032_v20 }
0x1734   :  { %v10344_v26 = vpop.eup %10343  ;;  %7658 = vrot.lane.b32.xlu0 %v12045_v58, %s10425_s19 }
0x1735   :  { %v7056_v53 = vmul.f32 %v10344_v26, %v10330_v6  ;;  %v12721_v59 = vpop.eup %10345 }
0x1737   :  { %v7064_v47 = vpack.c.bf16 %v7056_v53, %v7056_v53 }
0x1738   :  { %7656 = vrot.lane.b32.xlu0 %v12069_v24, %s10425_s19  ;;  %v7045_v24 = vsel %vm698_vm2, %v12721_v59, 0.0 }
0x1739   :  { %9796 = vmatmul.mubr.msk.bf16.vlgmr.msra.gmra.mrb[232].mxu0 %vm698_vm2, %v7064_v47 }
0x173a   :  { %9806 = vmatpush3.bf16.msra.mxu0 %v7174_v54  ;;  %9807 = vmatprep.mubr.msk.bf16.mxu0 %vm10422_vm1, %v13181_v22 }
0x173b   :  { %9817 = vmatprep.subr.bf16.mxu0 %v13181_v22 }
0x173c   :  { %v10348_v14 = vpop.eup %10347  ;;  %7758 = vrot.lane.b32.xlu0 %v12066_v39, %s10425_s19 }
0x173d   :  { %v7058_v58 = vmul.f32 %v10348_v14, %v12670_v17 }
0x173f   :  { %7046 = vadd.xlane.f32.xlu1 %v7045_v24  ;;  %v7066_v6 = vpack.c.bf16 %v7058_v58, %v7058_v58 }
0x1740   :  { %7756 = vrot.lane.b32.xlu0 %v12104_v45, %s10425_s19 }
0x1741   :  { %9808 = vmatmul.mubr.msk.bf16.vlgmr.msra.gmra.mrb[236].mxu0 %vm698_vm2, %v7066_v6 }
0x1742   :  { %9818 = vmatpush3.bf16.msra.mxu0 %v7270_v19  ;;  %9819 = vmatprep.mubr.msk.bf16.mxu0 %vm10422_vm1, %v13181_v22 }
0x1743   :  { %9829 = vmatprep.subr.bf16.mxu0 %v13181_v22 }
0x1750   :  { %7506 = vrot.lane.b32.xlu1 %v12013_v38, %s10425_s19 }
0x1754   :  { %7608 = vrot.lane.b32.xlu1 %v12011_v42, %s10425_s19 }
0x1758   :  { %7606 = vrot.lane.b32.xlu1 %v12043_v57, %s10425_s19 }
0x175a   :  { %v7029_v39 = vpop.xlane.xlu1 %7028 }
0x175b   :  { %10349 = vrcp.f32 %v7029_v39 }
0x175c   :  { %7708 = vrot.lane.b32.xlu1 %v12051_v4, %s10425_s19  ;;  %v7222_v4 = vsel %vm1166_vm3, %v12674_v28, 0 }
0x1760   :  { %7706 = vrot.lane.b32.xlu1 %v12073_v50, %s10425_s19 }
0x1762   :  { %v7035_v45 = vpop.xlane.xlu1 %7034 }
0x1763   :  { %10351 = vrcp.f32 %v7035_v45 }
0x1764   :  { %7808 = vrot.lane.b32.xlu1 %v12071_v60, %s10425_s19 }
0x1765   :  { %v10350_v38 = vpop.eup %10349 }
0x1766   :  { %v7057_v17 = vmul.f32 %v10350_v38, %v12677_v52  ;;  %v7038_v42 = vpop.xlane.xlu0 %7037 }
0x1767   :  { %10353 = vrcp.f32 %v7038_v42 }
0x1768   :  { %7806 = vrot.lane.b32.xlu1 %v12108_v15, %s10425_s19  ;;  %v7065_v57 = vpack.c.bf16 %v7057_v17, %v7057_v17 }
0x176a   :  { %9802 = vmatmul.mubr.msk.bf16.vlgmr.msra.gmra.mrb[240].mxu1 %vm698_vm2, %v7065_v57  ;;  %v7361_v28 = vpop.permute.xlu0 %7360 }
0x176b   :  { %9812 = vmatpush3.bf16.msra.mxu1 %v7222_v4  ;;  %9813 = vmatprep.mubr.msk.bf16.mxu1 %vm10422_vm1, %v13181_v22  ;;  %v7366_v30 = vsel %vm1166_vm3, %v7361_v28, 0 }
0x176c   :  { %9823 = vmatprep.subr.bf16.mxu1 %v13181_v22 }
0x176d   :  { %v10352_v60 = vpop.eup %10351 }
0x176e   :  { %v7059_v50 = vmul.f32 %v10352_v60, %v12681_v34  ;;  %v7409_v34 = vpop.permute.xlu1 %7408 }
0x176f   :  { %v7414_v20 = vsel %vm1166_vm3, %v7409_v34, 0 }
0x1770   :  { %v7067_v52 = vpack.c.bf16 %v7059_v50, %v7059_v50 }
0x1771   :  { %v10354_v27 = vpop.eup %10353 }
0x1772   :  { %v7060_v15 = vmul.f32 %v10354_v27, %v12685_v36  ;;  %9814 = vmatmul.mubr.msk.bf16.vlgmr.msra.gmra.mrb[244].mxu1 %vm698_vm2, %v7067_v52 }
0x1773   :  { %9824 = vmatpush3.bf16.msra.mxu1 %v7318_v10  ;;  %9825 = vmatprep.mubr.msk.bf16.mxu1 %vm10422_vm1, %v13181_v22 }
0x1774   :  { %v7068_v18 = vpack.c.bf16 %v7060_v15, %v7060_v15  ;;  %9835 = vmatprep.subr.bf16.mxu1 %v13181_v22 }
0x1776   :  { %9820 = vmatmul.mubr.msk.bf16.vlgmr.msra.gmra.mrb[240].mxu0 %vm698_vm2, %v7068_v18 }
0x1777   :  { %9830 = vmatpush3.bf16.msra.mxu0 %v7366_v30  ;;  %9831 = vmatprep.mubr.msk.bf16.mxu0 %vm10422_vm1, %v13181_v22 }
0x1778   :  { %9841 = vmatprep.subr.bf16.mxu0 %v13181_v22 }
0x1797   :  { %v7041_v36 = vpop.xlane.xlu1 %7040 }
0x1798   :  { %10355 = vrcp.f32 %v7041_v36 }
0x179b   :  { %v7044_v32 = vpop.xlane.xlu0 %7043  ;;  %v7509_v39 = vpop.permute.xlu1 %7508 }
0x179c   :  { %10357 = vrcp.f32 %v7044_v32  ;;  %v7514_v50 = vsel %vm698_vm2, %v7509_v39, 0 }
0x179f   :  { %v7459_v46 = vpop.permute.xlu0 %7458 }
0x17a0   :  { %v7464_v54 = vsel %vm698_vm2, %v7459_v46, 0 }
0x17a2   :  { %v10356_v21 = vpop.eup %10355 }
0x17a3   :  { %v7061_v8 = vmul.f32 %v10356_v21, %v12694_v35  ;;  %v7457_v62 = vpop.permute.xlu0 %7456 }
0x17a5   :  { %v7069_v41 = vpack.c.bf16 %v7061_v8, %v7061_v8 }
0x17a6   :  { %v10358_v11 = vpop.eup %10357 }
0x17a7   :  { %v7062_v26 = vmul.f32 %v10358_v11, %v12698_v1  ;;  %9826 = vmatmul.mubr.msk.bf16.vlgmr.msra.gmra.mrb[248].mxu1 %vm698_vm2, %v7069_v41  ;;  %v7559_v53 = vpop.permute.xlu0 %7558 }
0x17a8   :  { %9836 = vmatpush3.bf16.msra.mxu1 %v7414_v20  ;;  %9837 = vmatprep.mubr.msk.bf16.mxu1 %vm10422_vm1, %v13181_v22  ;;  %v7564_v1 = vsel %vm698_vm2, %v7559_v53, 0 }
0x17a9   :  { %v7070_v47 = vpack.c.bf16 %v7062_v26, %v7062_v26  ;;  %9847 = vmatprep.subr.bf16.mxu1 %v13181_v22 }
0x17ab   :  { %9832 = vmatmul.mubr.msk.bf16.vlgmr.msra.gmra.mrb[244].mxu0 %vm698_vm2, %v7070_v47  ;;  %v7557_v35 = vpop.permute.xlu0 %7556 }
0x17ac   :  { %9842 = vmatpush3.bf16.xpose.msra.mxu0 %v7464_v54  ;;  %9843 = vmatprep.mubr.msk.bf16.mxu0 %vm10422_vm1, %v13181_v22 }
0x17ad   :  { %9853 = vmatprep.subr.bf16.mxu0 %v13181_v22 }
0x17af   :  { %v7659_v14 = vpop.permute.xlu0 %7658 }
0x17b0   :  { %v7664_v24 = vsel %vm698_vm2, %v7659_v14, 0 }
0x17b3   :  { %9844 = vmatmul.mubr.msk.bf16.vlgmr.msra.gmra.mrb[248].mxu0 %vm698_vm2, %v7457_v62  ;;  %v7657_v58 = vpop.permute.xlu0 %7656 }
0x17b4   :  { %9854 = vmatpush3.bf16.xpose.msra.mxu0 %v7564_v1  ;;  %9855 = vmatprep.mubr.msk.bf16.mxu0 %vm10422_vm1, %v13181_v22 }
0x17b5   :  { %9865 = vmatprep.subr.bf16.mxu0 %v13181_v22 }
0x17b7   :  { %v7759_v6 = vpop.permute.xlu0 %7758 }
0x17b8   :  { %v7764_v19 = vsel %vm698_vm2, %v7759_v6, 0 }
0x17bb   :  { %9856 = vmatmul.mubr.msk.bf16.vlgmr.msra.gmra.mrb[252].mxu0 %vm698_vm2, %v7557_v35  ;;  %v7757_v45 = vpop.permute.xlu0 %7756 }
0x17bc   :  { %9866 = vmatpush3.bf16.xpose.msra.mxu0 %v7664_v24  ;;  %9867 = vmatprep.mubr.msk.bf16.mxu0 %vm10422_vm1, %v13181_v22 }
0x17bd   :  { %9877 = vmatprep.subr.bf16.mxu0 %v13181_v22 }
0x17c3   :  { %9868 = vmatmul.mubr.msk.bf16.vlgmr.msra.gmra.mrb[0].mxu0 %vm698_vm2, %v7657_v58 }
0x17c4   :  { %9878 = vmatpush3.bf16.xpose.msra.mxu0 %v7764_v19  ;;  %9879 = vmatprep.mubr.msk.bf16.mxu0 %vm10422_vm1, %v13181_v22 }
0x17c5   :  { %9889 = vmatprep.subr.bf16.mxu0 %v13181_v22 }
0x17cb   :  { %9880 = vmatmul.mubr.msk.bf16.vlgmr.msra.gmra.mrb[4].mxu0 %vm698_vm2, %v7757_v45 }
0x17cc   :  { %v7047_v38 = vpop.xlane.xlu1 %7046  ;;  %9891 = vmatprep.mubr.msk.bf16.mxu0 %vm10422_vm1, %v13181_v22 }
0x17cd   :  { %10359 = vrcp.f32 %v7047_v38 }
0x17d0   :  { %v7507_v17 = vpop.permute.xlu1 %7506 }
0x17d4   :  { %v7609_v4 = vpop.permute.xlu1 %7608 }
0x17d5   :  { %v7614_v27 = vsel %vm698_vm2, %v7609_v4, 0 }
0x17d7   :  { %v10360_v42 = vpop.eup %10359 }
0x17d8   :  { %v7063_v57 = vmul.f32 %v10360_v42, %v12721_v59  ;;  %v7607_v52 = vpop.permute.xlu1 %7606 }
0x17da   :  { %v7071_v60 = vpack.c.bf16 %v7063_v57, %v7063_v57 }
0x17dc   :  { %9838 = vmatmul.mubr.msk.bf16.vlgmr.msra.gmra.mrb[252].mxu1 %vm698_vm2, %v7071_v60  ;;  %v7709_v10 = vpop.permute.xlu1 %7708 }
0x17dd   :  { %9848 = vmatpush3.bf16.xpose.msra.mxu1 %v7514_v50  ;;  %9849 = vmatprep.mubr.msk.bf16.mxu1 %vm10422_vm1, %v13181_v22  ;;  %v7714_v15 = vsel %vm698_vm2, %v7709_v10, 0 }
0x17de   :  { %9859 = vmatprep.subr.bf16.mxu1 %v13181_v22 }
0x17e0   :  { %v7707_v59 = vpop.permute.xlu1 %7706 }
0x17e4   :  { %9850 = vmatmul.mubr.msk.bf16.vlgmr.msra.gmra.mrb[0].mxu1 %vm698_vm2, %v7507_v17  ;;  %v7809_v28 = vpop.permute.xlu1 %7808 }
0x17e5   :  { %9860 = vmatpush3.bf16.xpose.msra.mxu1 %v7614_v27  ;;  %9861 = vmatprep.mubr.msk.bf16.mxu1 %vm10422_vm1, %v13181_v22  ;;  %v7814_v18 = vsel %vm698_vm2, %v7809_v28, 0 }
0x17e6   :  { %9871 = vmatprep.subr.bf16.mxu1 %v13181_v22 }
0x17e8   :  { %v7807_v30 = vpop.permute.xlu1 %7806 }
0x17ec   :  { %9862 = vmatmul.mubr.msk.bf16.vlgmr.msra.gmra.mrb[4].mxu1 %vm698_vm2, %v7607_v52 }
0x17ed   :  { %9872 = vmatpush3.bf16.xpose.msra.mxu1 %v7714_v15  ;;  %9873 = vmatprep.mubr.msk.bf16.mxu1 %vm10422_vm1, %v13181_v22 }
0x17ee   :  { %9883 = vmatprep.subr.bf16.mxu1 %v13181_v22 }
0x17f4   :  { %9874 = vmatmul.mubr.msk.bf16.vlgmr.msra.gmra.mrb[8].mxu1 %vm698_vm2, %v7707_v59 }
0x17f5   :  { %9884 = vmatpush3.bf16.xpose.msra.mxu1 %v7814_v18  ;;  %9885 = vmatprep.mubr.msk.bf16.mxu1 %vm10422_vm1, %v13181_v22 }
0x17f6   :  { %9895 = vmatprep.subr.bf16.mxu1 %v13181_v22 }
0x17fc   :  { %9886 = vmatmul.mubr.msk.bf16.vlgmr.msra.gmra.mrb[12].mxu1 %vm698_vm2, %v7807_v30 }
0x17fd   :  { %9897 = vmatprep.mubr.msk.bf16.mxu1 %vm10422_vm1, %v13181_v22 }
0x180c   :  { %v12823_v34 = vpop.f32.mrb[232].mxu0 }
0x180d   :  { %v9797_v36 = vpop.f32.mrb[233].mxu0 }
0x180e   :  { %v7117_v32 = vpop.f32.mrb[234].mxu0 }
0x180f   :  { %v9798_v46 = vpop.f32.mrb[235].mxu0 }
0x1814   :  { %v12825_v21 = vpop.f32.mrb[236].mxu0 }
0x1815   :  { %v9809_v8 = vpop.f32.mrb[237].mxu0 }
0x1816   :  { %v7213_v62 = vpop.f32.mrb[238].mxu0 }
0x1817   :  { %v9810_v41 = vpop.f32.mrb[239].mxu0 }
0x183d   :  { %v12827_v11 = vpop.f32.mrb[240].mxu1 }
0x183e   :  { %v10031_v20 = vpack.i.bf16 %v12827_v11, %v12823_v34  ;;  %v9803_v26 = vpop.f32.mrb[241].mxu1 }
0x183f   :  { %v7165_v53 = vpop.f32.mrb[242].mxu1 }
0x1840   :  { %v9804_v47 = vpop.f32.mrb[243].mxu1 }
0x1845   :  { %v12831_v54 = vpop.f32.mrb[244].mxu1 }
0x1846   :  { %v10036_v35 = vpack.i.bf16 %v12831_v54, %v12825_v21  ;;  %v9815_v1 = vpop.f32.mrb[245].mxu1 }
0x1847   :  { %v7261_v14 = vpop.f32.mrb[246].mxu1 }
0x1848   :  { %v9816_v58 = vpop.f32.mrb[247].mxu1 }
0x1849   :  { %v12835_v24 = vpop.f32.mrb[240].mxu0 }
0x184a   :  { %v9821_v6 = vpop.f32.mrb[241].mxu0 }
0x184b   :  { %v7309_v19 = vpop.f32.mrb[242].mxu0 }
0x184c   :  { %v9822_v39 = vpop.f32.mrb[243].mxu0 }
0x187a   :  { %v12837_v45 = vpop.f32.mrb[248].mxu1 }
0x187b   :  { %v10056_v38 = vpack.i.bf16 %v12837_v45, %v12835_v24  ;;  %v9827_v17 = vpop.f32.mrb[249].mxu1 }
0x187c   :  { %v7357_v42 = vpop.f32.mrb[250].mxu1 }
0x187d   :  { %v9828_v57 = vpop.f32.mrb[251].mxu1 }
0x187e   :  { %v12841_v4 = vpop.f32.mrb[244].mxu0 }
0x187f   :  { %v9833_v60 = vpop.f32.mrb[245].mxu0 }
0x1880   :  { %v7405_v50 = vpop.f32.mrb[246].mxu0 }
0x1881   :  { %v9834_v52 = vpop.f32.mrb[247].mxu0 }
0x1886   :  { %v12843_v27 = vpop.f32.mrb[248].mxu0 }
0x1887   :  { %v7856_v10 = vadd.f32 %v12843_v27, %v12616_v31  ;;  %v9845_v59 = vpop.f32.mrb[249].mxu0  ;;  %v7864_v15 = vsel %vm698_vm2, %v12843_v27, -inf }
0x1888   :  { %7865 = vmax.xlane.f32.xlu0 %v7864_v15  ;;  %v7503_v28 = vpop.f32.mrb[250].mxu0 }
0x1889   :  { %8561 = vst.msk [vmem:[%s13172_s16] sm:$0xff] %vm698_vm2, %v7856_v10  ;;  %v9846_v18 = vpop.f32.mrb[251].mxu0 }
0x188e   :  { %v12853_v30 = vpop.f32.mrb[252].mxu0 }
0x188f   :  { %v7858_v36 = vadd.f32 %v12853_v30, %v12621_v2  ;;  %v9857_v32 = vpop.f32.mrb[253].mxu0  ;;  %v7870_v31 = vsel %vm698_vm2, %v12853_v30, -inf }
0x1890   :  { %7871 = vmax.xlane.f32.xlu0 %v7870_v31  ;;  %v7603_v46 = vpop.f32.mrb[254].mxu0 }
0x1891   :  { %8563 = vst.msk [vmem:[%s13172_s16 + $0x10] sm:$0xff] %vm698_vm2, %v7858_v36  ;;  %v9858_v8 = vpop.f32.mrb[255].mxu0 }
0x1896   :  { %v12863_v62 = vpop.f32.mrb[0].mxu0 }
0x1897   :  { %v7860_v41 = vadd.f32 %v12863_v62, %v12628_v23  ;;  %v9869_v26 = vpop.f32.mrb[1].mxu0  ;;  %v7876_v32 = vsel %vm698_vm2, %v12863_v62, -inf }
0x1898   :  { %v7703_v53 = vpop.f32.mrb[2].mxu0 }
0x1899   :  { %8565 = vst.msk [vmem:[%s13172_s16 + $0x20] sm:$0xff] %vm698_vm2, %v7860_v41  ;;  %v9870_v2 = vpop.f32.mrb[3].mxu0 }
0x189e   :  { %v12871_v47 = vpop.f32.mrb[4].mxu0 }
0x189f   :  { %v7862_v1 = vadd.f32 %v12871_v47, %v12634_v49  ;;  %v9881_v14 = vpop.f32.mrb[5].mxu0  ;;  %v7882_v41 = vsel %vm698_vm2, %v12871_v47, -inf }
0x18a0   :  { %v7803_v58 = vpop.f32.mrb[6].mxu0 }
0x18a1   :  { %8567 = vst.msk [vmem:[%s13172_s16 + $0x30] sm:$0xff] %vm698_vm2, %v7862_v1  ;;  %v9882_v23 = vpop.f32.mrb[7].mxu0 }
0x18af   :  { %v12879_v6 = vpop.f32.mrb[252].mxu1 }
0x18b0   :  { %v10066_v19 = vpack.i.bf16 %v12879_v6, %v12841_v4  ;;  %v9839_v39 = vpop.f32.mrb[253].mxu1 }
0x18b1   :  { %v7453_v17 = vpop.f32.mrb[254].mxu1 }
0x18b2   :  { %v9840_v42 = vpop.f32.mrb[255].mxu1 }
0x18b7   :  { %v7550_v57 = vpop.f32.mrb[0].mxu1 }
0x18b8   :  { %v7857_v60 = vadd.f32 %v7550_v57, %v12641_v37  ;;  %v9851_v49 = vpop.f32.mrb[1].mxu1  ;;  %v7867_v50 = vsel %vm698_vm2, %v7550_v57, -inf }
0x18b9   :  { %7868 = vmax.xlane.f32.xlu1 %v7867_v50  ;;  %v7553_v52 = vpop.f32.mrb[2].mxu1 }
0x18ba   :  { %8562 = vst.msk [vmem:[%s13172_s16 + $0x8] sm:$0xff] %vm698_vm2, %v7857_v60  ;;  %v9852_v10 = vpop.f32.mrb[3].mxu1 }
0x18bf   :  { %v12889_v59 = vpop.f32.mrb[4].mxu1 }
0x18c0   :  { %v7859_v15 = vadd.f32 %v12889_v59, %v12645_v44  ;;  %v9863_v28 = vpop.f32.mrb[5].mxu1  ;;  %v7873_v37 = vsel %vm698_vm2, %v12889_v59, -inf }
0x18c1   :  { %v7653_v18 = vpop.f32.mrb[6].mxu1  ;;  %7874 = vmax.xlane.f32.xlu0 %v7873_v37 }
0x18c2   :  { %8564 = vst.msk [vmem:[%s13172_s16 + $0x18] sm:$0xff] %vm698_vm2, %v7859_v15  ;;  %v9864_v36 = vpop.f32.mrb[7].mxu1 }
0x18c5   :  { %7877 = vmax.xlane.f32.xlu0 %v7876_v32 }
0x18c7   :  { %v12901_v31 = vpop.f32.mrb[8].mxu1 }
0x18c8   :  { %v7861_v44 = vadd.f32 %v12901_v31, %v12651_v51  ;;  %v9875_v46 = vpop.f32.mrb[9].mxu1  ;;  %v7879_v8 = vsel %vm698_vm2, %v12901_v31, -inf }
0x18c9   :  { %7880 = vmax.xlane.f32.xlu1 %v7879_v8  ;;  %v7753_v26 = vpop.f32.mrb[10].mxu1  ;;  %7883 = vmax.xlane.f32.xlu0 %v7882_v41 }
0x18ca   :  { %8566 = vst.msk [vmem:[%s13172_s16 + $0x28] sm:$0xff] %vm698_vm2, %v7861_v44  ;;  %v9876_v53 = vpop.f32.mrb[11].mxu1 }
0x18cf   :  { %v12913_v2 = vpop.f32.mrb[12].mxu1 }
0x18d0   :  { %v7863_v51 = vadd.f32 %v12913_v2, %v12660_v3  ;;  %v9887_v1 = vpop.f32.mrb[13].mxu1  ;;  %v7885_v3 = vsel %vm698_vm2, %v12913_v2, -inf }
0x18d1   :  { %v7853_v14 = vpop.f32.mrb[14].mxu1 }
0x18d2   :  { %8568 = vst.msk [vmem:[%s13172_s16 + $0x38] sm:$0xff] %vm698_vm2, %v7863_v51  ;;  %v9888_v58 = vpop.f32.mrb[15].mxu1 }
0x18da   :  { %8008 = vrot.lane.b32.xlu1 %v12106_v25, %s10425_s19 }
0x18de   :  { %8056 = vrot.lane.b32.xlu1 %v12234_v33, %s10425_s19 }
0x18df   :  { %7960 = vrot.lane.b32.xlu0 %v12101_v16, %s10425_s19 }
0x1902   :  { %7886 = vmax.xlane.f32.xlu1 %v7885_v3  ;;  %v13195_v3 = vpack.i.bf16 %v12596_v9, %v12592_v29 }
0x1913   :  { %8104 = vrot.lane.b32.xlu1 %v12240_v7, %s10425_s19 }
0x1915   :  { %v7866_v23 = vpop.xlane.xlu0 %7865 }
0x1916   :  { %v7888_v39 = vsub.f32 %v12843_v27, %v7866_v23 }
0x1918   :  { %v7896_v17 = vmul.f32 1.442695, %v7888_v39  ;;  %v13197_v39 = vpack.i.bf16 %v12600_v5, %v12594_v61 }
0x191a   :  { %10361 = vpow2.f32 %v7896_v17  ;;  %v13198_v17 = vpack.i.bf16 %v12636_v48, %v12610_v56 }
0x191d   :  { %v7872_v42 = vpop.xlane.xlu0 %7871 }
0x191e   :  { %v7890_v25 = vsub.f32 %v12853_v30, %v7872_v42 }
0x1920   :  { %v7900_v60 = vmul.f32 1.442695, %v7890_v25 }
0x1922   :  { %10363 = vpow2.f32 %v7900_v60 }
0x1924   :  { %v12933_v33 = vpop.eup %10361 }
0x1925   :  { %v7912_v16 = vsel %vm698_vm2, %v12933_v33, 0.0 }
0x1926   :  { %7913 = vadd.xlane.f32.xlu0 %v7912_v16 }
0x192c   :  { %v12937_v49 = vpop.eup %10363 }
0x192d   :  { %v7918_v7 = vsel %vm698_vm2, %v12937_v49, 0.0 }
0x192e   :  { %7919 = vadd.xlane.f32.xlu0 %v7918_v7 }
0x1944   :  { %8152 = vrot.lane.b32.xlu0 %v12261_v13, %s10425_s19 }
0x1946   :  { %v7869_v27 = vpop.xlane.xlu1 %7868 }
0x1947   :  { %v7889_v50 = vsub.f32 %v7550_v57, %v7869_v27 }
0x1949   :  { %v7898_v30 = vmul.f32 1.442695, %v7889_v50 }
0x194b   :  { %10365 = vpow2.f32 %v7898_v30 }
0x194e   :  { %v7875_v52 = vpop.xlane.xlu0 %7874 }
0x194f   :  { %v7891_v51 = vsub.f32 %v12889_v59, %v7875_v52  ;;  %v13196_v59 = vpack.i.bf16 %v12606_v0, %v12604_v63 }
0x1951   :  { %v7902_v1 = vmul.f32 1.442695, %v7891_v51 }
0x1952   :  { %v7878_v10 = vpop.xlane.xlu0 %7877 }
0x1953   :  { %v7892_v15 = vsub.f32 %v12863_v62, %v7878_v10 }
0x1955   :  { %v12944_v28 = vpop.eup %10365  ;;  %v7904_v37 = vmul.f32 1.442695, %v7892_v15 }
0x1956   :  { %v7881_v18 = vpop.xlane.xlu1 %7880  ;;  %v7884_v36 = vpop.xlane.xlu0 %7883  ;;  %v7915_v32 = vsel %vm698_vm2, %v12944_v28, 0.0 }
0x1957   :  { %10367 = vpow2.f32 %v7904_v37  ;;  %v7894_v44 = vsub.f32 %v12871_v47, %v7884_v36  ;;  %7916 = vadd.xlane.f32.xlu1 %v7915_v32  ;;  %v7893_v14 = vsub.f32 %v12901_v31, %v7881_v18  ;;  %v10410_v36 = vld [vmem:[%s13167_s12] sm:$0xff]  }
0x1959   :  { %v7908_v13 = vmul.f32 1.442695, %v7894_v44  ;;  %v7906_v58 = vmul.f32 1.442695, %v7893_v14  ;;  %v10411_v44 = vld [vmem:[%s13167_s12 + $0x8] sm:$0xff]  }
0x195a   :  { %v8009_v57 = vpop.permute.xlu1 %8008  ;;  %v7961_v46 = vpop.permute.xlu0 %7960 }
0x195b   :  { %v8014_v8 = vsel %vm1166_vm3, %v8009_v57, 0  ;;  %v7966_v41 = vsel %vm1166_vm3, %v7961_v46, 0  ;;  %10369 = vpow2.f32 %v7908_v13 }
0x195c   :  { %9890 = vmatpush3.bf16.msra.mxu0 %v7966_v41  ;;  %9896 = vmatpush3.bf16.msra.mxu1 %v8014_v8  ;;  %10371 = vpow2.f32 %v7902_v1 }
0x195d   :  { %9901 = vmatprep.subr.bf16.mxu0 %v13181_v22  ;;  %9907 = vmatprep.subr.bf16.mxu1 %v13181_v22  ;;  %10373 = vpow2.f32 %v7906_v58 }
0x195e   :  { %v8057_v31 = vpop.permute.xlu1 %8056 }
0x195f   :  { %v8062_v60 = vsel %vm1166_vm3, %v8057_v31, 0 }
0x1961   :  { %v12953_v62 = vpop.eup %10367 }
0x1962   :  { %v7924_v47 = vsel %vm698_vm2, %v12953_v62, 0.0 }
0x1963   :  { %7925 = vadd.xlane.f32.xlu0 %v7924_v47 }
0x1965   :  { %v12957_v26 = vpop.eup %10369 }
0x1966   :  { %v7930_v53 = vsel %vm698_vm2, %v12957_v26, 0.0 }
0x1967   :  { %7931 = vadd.xlane.f32.xlu0 %v7930_v53 }
0x1968   :  { %8200 = vrot.lane.b32.xlu1 %v12265_v55, %s10425_s19  ;;  %v12975_v55 = vpop.eup %10371 }
0x1969   :  { %v12983_v23 = vpop.eup %10373 }
0x196a   :  { %v7927_v9 = vsel %vm698_vm2, %v12983_v23, 0.0 }
0x197d   :  { %8248 = vrot.lane.b32.xlu0 %v12284_v12, %s10425_s19  ;;  %v7921_v12 = vsel %vm698_vm2, %v12975_v55, 0.0 }
0x1981   :  { %10022 = vrot.lane.b32.xlu0 %v13195_v3, %s10426_s20 }
0x1985   :  { %10032 = vrot.lane.b32.xlu0 %v10031_v20, %s10427_s21 }
0x1989   :  { %10042 = vrot.lane.b32.xlu0 %v13196_v59, %s10426_s20 }
0x198c   :  { %7922 = vadd.xlane.f32.xlu1 %v7921_v12 }
0x198f   :  { %v7887_v29 = vpop.xlane.xlu1 %7886 }
0x1990   :  { %v7895_v34 = vsub.f32 %v12913_v2, %v7887_v29  ;;  %7928 = vadd.xlane.f32.xlu1 %v7927_v9 }
0x1992   :  { %v7910_v11 = vmul.f32 1.442695, %v7895_v34 }
0x1993   :  { %v8105_v54 = vpop.permute.xlu1 %8104 }
0x1994   :  { %10375 = vpow2.f32 %v7910_v11  ;;  %v8110_v27 = vsel %vm1166_vm3, %v8105_v54, 0 }
0x199e   :  { %v12988_v20 = vpop.eup %10375 }
0x199f   :  { %v7933_v63 = vsel %vm698_vm2, %v12988_v20, 0.0 }
0x19a0   :  { %7934 = vadd.xlane.f32.xlu1 %v7933_v63 }
0x19b1   :  { %8296 = vrot.lane.b32.xlu1 %v12287_v43, %s10425_s19 }
0x19b3   :  { %v7914_v0 = vpop.xlane.xlu0 %7913 }
0x19b4   :  { %10377 = vrcp.f32 %v7914_v0 }
0x19b5   :  { %10027 = vrot.lane.b32.xlu1 %v13197_v39, %s10426_s20 }
0x19b9   :  { %10037 = vrot.lane.b32.xlu1 %v10036_v35, %s10427_s21 }
0x19bb   :  { %v7920_v2 = vpop.xlane.xlu0 %7919 }
0x19bc   :  { %10379 = vrcp.f32 %v7920_v2 }
0x19bd   :  { %10047 = vrot.lane.b32.xlu1 %v13198_v17, %s10426_s20 }
0x19be   :  { %v10378_v43 = vpop.eup %10377 }
0x19bf   :  { %v7944_v42 = vmul.f32 %v10378_v43, %v12933_v33  ;;  %v8153_v21 = vpop.permute.xlu0 %8152 }
0x19c0   :  { %v8158_v48 = vsel %vm1166_vm3, %v8153_v21, 0 }
0x19c1   :  { %v7952_v25 = vpack.c.bf16 %v7944_v42, %v7944_v42 }
0x19c3   :  { %9892 = vmatmul.mubr.msk.bf16.vlgmr.msra.gmra.mrb[8].mxu0 %vm698_vm2, %v7952_v25 }
0x19c4   :  { %9902 = vmatpush3.bf16.msra.mxu0 %v8062_v60  ;;  %9903 = vmatprep.mubr.msk.bf16.mxu0 %vm10422_vm1, %v13181_v22 }
0x19c5   :  { %9913 = vmatprep.subr.bf16.mxu0 %v13181_v22 }
0x19c6   :  { %v10380_v61 = vpop.eup %10379 }
0x19c7   :  { %v7946_v5 = vmul.f32 %v10380_v61, %v12937_v49 }
0x19c9   :  { %v7954_v56 = vpack.c.bf16 %v7946_v5, %v7946_v5 }
0x19cb   :  { %9904 = vmatmul.mubr.msk.bf16.vlgmr.msra.gmra.mrb[12].mxu0 %vm698_vm2, %v7954_v56 }
0x19cc   :  { %9914 = vmatpush3.bf16.msra.mxu0 %v8158_v48  ;;  %9915 = vmatprep.mubr.msk.bf16.mxu0 %vm10422_vm1, %v13181_v22 }
0x19cd   :  { %9925 = vmatprep.subr.bf16.mxu0 %v13181_v22 }
0x19e4   :  { %v7917_v35 = vpop.xlane.xlu1 %7916 }
0x19e5   :  { %10381 = vrcp.f32 %v7917_v35 }
0x19e8   :  { %v8201_v13 = vpop.permute.xlu1 %8200 }
0x19ef   :  { %v10382_v33 = vpop.eup %10381 }
0x19f0   :  { %v7945_v16 = vmul.f32 %v10382_v33, %v12944_v28  ;;  %v7926_v7 = vpop.xlane.xlu0 %7925 }
0x19f1   :  { %10383 = vrcp.f32 %v7926_v7 }
0x19f2   :  { %v7953_v49 = vpack.c.bf16 %v7945_v16, %v7945_v16 }
0x19f4   :  { %9898 = vmatmul.mubr.msk.bf16.vlgmr.msra.gmra.mrb[16].mxu1 %vm698_vm2, %v7953_v49  ;;  %v7932_v50 = vpop.xlane.xlu0 %7931 }
0x19f5   :  { %9908 = vmatpush3.bf16.msra.mxu1 %v8110_v27  ;;  %9909 = vmatprep.mubr.msk.bf16.mxu1 %vm10422_vm1, %v13181_v22  ;;  %10385 = vrcp.f32 %v7932_v50 }
0x19f6   :  { %9919 = vmatprep.subr.bf16.mxu1 %v13181_v22 }
0x19f8   :  { %v8249_v10 = vpop.permute.xlu0 %8248 }
0x19f9   :  { %v8254_v37 = vsel %vm1166_vm3, %v8249_v10, 0 }
0x19fb   :  { %v10384_v30 = vpop.eup %10383 }
0x19fc   :  { %v7948_v52 = vmul.f32 %v10384_v30, %v12953_v62  ;;  %v10023_v10 = vpop.permute.xlu0 %10022 }
0x19fd   :  { %v10024_v4 = vunpack.i.l.bf16 %v10023_v10 }
0x19fe   :  { %v7956_v15 = vpack.c.bf16 %v7948_v52, %v7948_v52 }
0x19ff   :  { %v10386_v28 = vpop.eup %10385 }
0x1a00   :  { %9916 = vmatmul.mubr.msk.bf16.vlgmr.msra.gmra.mrb[16].mxu0 %vm698_vm2, %v7956_v15  ;;  %v7950_v18 = vmul.f32 %v10386_v28, %v12957_v26  ;;  %v8206_v26 = vsel %vm1166_vm3, %v8201_v13, 0  ;;  %v10033_v15 = vpop.permute.xlu0 %10032 }
0x1a01   :  { %9926 = vmatpush3.bf16.msra.mxu0 %v8254_v37  ;;  %9927 = vmatprep.mubr.msk.bf16.mxu0 %vm10422_vm1, %v13181_v22  ;;  %v10025_v37 = vunpack.i.h.bf16 %v10023_v10  ;;  %v10035_v6 = vunpack.i.h.bf16 %v10033_v15 }
0x1a02   :  { %9937 = vmatprep.subr.bf16.mxu0 %v10410_v36  ;;  %v7958_v32 = vpack.c.bf16 %v7950_v18, %v7950_v18 }
0x1a04   :  { %v10043_v28 = vpop.permute.xlu0 %10042 }
0x1a08   :  { %9928 = vmatmul.mubr.msk.bf16.vlgmr.msra.gmra.mrb[20].mxu0 %vm698_vm2, %v7958_v32  ;;  %v13199_v32 = vld [vmem:[#allocation3_spill] sm:$0xff] }
0x1a09   :  { %9938 = vmatpush3.bf16.msra.mxu0 %v10410_v36  ;;  %v8441_v36 = vsel %vm698_vm2, %v12356_v40, %v10025_v37 }
0x1a0a   :  { %9939 = vmatprep.subr.bf16.mxu0 %v10411_v44 }
0x1a0d   :  { %9940 = vmatpush3.bf16.msra.mxu0 %v10411_v44  ;;  %v8440_v44 = vsel %vm698_vm2, %v13199_v32, %v10024_v4 }
0x1a19   :  { %v7923_v57 = vpop.xlane.xlu1 %7922 }
0x1a1a   :  { %10387 = vrcp.f32 %v7923_v57 }
0x1a1d   :  { %v7929_v46 = vpop.xlane.xlu1 %7928 }
0x1a1e   :  { %10389 = vrcp.f32 %v7929_v46 }
0x1a24   :  { %v10388_v8 = vpop.eup %10387 }
0x1a25   :  { %v7947_v41 = vmul.f32 %v10388_v8, %v12975_v55  ;;  %v8449_v8 = vsel %vm4300_vm4, %v8441_v36, %v10035_v6  ;;  %v10412_v36 = vld [vmem:[%s13168_s13] ss:$0 sm:$0xff] }
0x1a27   :  { %v7955_v62 = vpack.c.bf16 %v7947_v41, %v7947_v41 }
0x1a28   :  { %v10390_v47 = vpop.eup %10389 }
0x1a29   :  { %9910 = vmatmul.mubr.msk.bf16.vlgmr.msra.gmra.mrb[20].mxu1 %vm698_vm2, %v7955_v62  ;;  %v7949_v53 = vmul.f32 %v10390_v47, %v12983_v23 }
0x1a2a   :  { %9920 = vmatpush3.bf16.msra.mxu1 %v8206_v26  ;;  %9921 = vmatprep.mubr.msk.bf16.mxu1 %vm10422_vm1, %v13181_v22 }
0x1a2b   :  { %9931 = vmatprep.subr.bf16.mxu1 %v13181_v22  ;;  %v7957_v1 = vpack.c.bf16 %v7949_v53, %v7949_v53 }
0x1a2d   :  { %v7935_v51 = vpop.xlane.xlu1 %7934 }
0x1a2e   :  { %10391 = vrcp.f32 %v7935_v51 }
0x1a31   :  { %9922 = vmatmul.mubr.msk.bf16.vlgmr.msra.gmra.mrb[24].mxu1 %vm698_vm2, %v7957_v1  ;;  %v8297_v14 = vpop.permute.xlu1 %8296 }
0x1a32   :  { %v8302_v58 = vsel %vm1166_vm3, %v8297_v14, 0  ;;  %9933 = vmatprep.mubr.msk.bf16.mxu1 %vm10422_vm1, %v13181_v22 }
0x1a33   :  { %9932 = vmatpush3.bf16.msra.mxu1 %v8302_v58 }
0x1a35   :  { %v10028_v26 = vpop.permute.xlu1 %10027 }
0x1a36   :  { %v10030_v40 = vunpack.i.h.bf16 %v10028_v26  ;;  %v10029_v1 = vunpack.i.l.bf16 %v10028_v26 }
0x1a38   :  { %v10392_v3 = vpop.eup %10391 }
0x1a39   :  { %v7951_v55 = vmul.f32 %v10392_v3, %v12988_v20  ;;  %v10038_v53 = vpop.permute.xlu1 %10037 }
0x1a3a   :  { %v10040_v14 = vunpack.i.h.bf16 %v10038_v53  ;;  %v10039_v58 = vunpack.i.l.bf16 %v10038_v53 }
0x1a3b   :  { %v7959_v59 = vpack.c.bf16 %v7951_v55, %v7951_v55  ;;  %v13200_v55 = vld [vmem:[#allocation4_spill] sm:$0xff] }
0x1a3d   :  { %9934 = vmatmul.mubr.msk.bf16.vlgmr.msra.gmra.mrb[28].mxu1 %vm698_vm2, %v7959_v59  ;;  %v10048_v51 = vpop.permute.xlu1 %10047  ;;  %v8443_v59 = vsel %vm698_vm2, %v13200_v55, %v10030_v40 }
0x1a96   :  { %v8002_v31 = vpop.f32.mrb[8].mxu0 }
0x1a97   :  { %v9893_v12 = vpop.f32.mrb[9].mxu0 }
0x1a98   :  { %v8005_v23 = vpop.f32.mrb[10].mxu0 }
0x1a99   :  { %v9894_v29 = vpop.f32.mrb[11].mxu0 }
0x1a9e   :  { %v8098_v9 = vpop.f32.mrb[12].mxu0 }
0x1a9f   :  { %v9905_v34 = vpop.f32.mrb[13].mxu0 }
0x1aa0   :  { %v8101_v11 = vpop.f32.mrb[14].mxu0  ;;  %v8451_v34 = vsel %vm4300_vm4, %v8443_v59, %v10040_v14 }
0x1aa1   :  { %v9906_v63 = vpop.f32.mrb[15].mxu0 }
0x1ac7   :  { %v8050_v0 = vpop.f32.mrb[16].mxu1 }
0x1ac8   :  { %v10051_v39 = vpack.i.bf16 %v8050_v0, %v8002_v31  ;;  %v9899_v2 = vpop.f32.mrb[17].mxu1  ;;  %v13201_v31 = vld [vmem:[#allocation2_spill] sm:$0xff] }
0x1ac9   :  { %v8053_v17 = vpop.f32.mrb[18].mxu1  ;;  %v8442_v12 = vsel %vm698_vm2, %v13201_v31, %v10029_v1  ;;  %v10045_v2 = vunpack.i.h.bf16 %v10043_v28  ;;  %v10416_v1 = vld [vmem:[%s13158_s0 + $0x8] sm:$0xff] }
0x1aca   :  { %v9900_v22 = vpop.f32.mrb[19].mxu1  ;;  %10052 = vrot.lane.b32.xlu0 %v10051_v39, %s10428_s29  ;;  %v10044_v17 = vunpack.i.l.bf16 %v10043_v28 }
0x1ace   :  { %10057 = vrot.lane.b32.xlu0 %v10056_v38, %s10427_s21 }
0x1ad3   :  { %v8194_v20 = vpop.f32.mrb[16].mxu0 }
0x1ad4   :  { %v9917_v43 = vpop.f32.mrb[17].mxu0 }
0x1ad5   :  { %v8197_v42 = vpop.f32.mrb[18].mxu0 }
0x1ad6   :  { %v9918_v25 = vpop.f32.mrb[19].mxu0  ;;  %v13202_v42 = vld [vmem:[#allocation6_spill] sm:$0xff] }
0x1ad7   :  { %v8445_v25 = vsel %vm698_vm2, %v13202_v42, %v10045_v2  ;;  %v10420_v2 = vld [vmem:[%s13158_s0 + $0x28] sm:$0xff] }
0x1adb   :  { %v8290_v60 = vpop.f32.mrb[20].mxu0 }
0x1adc   :  { %v9929_v61 = vpop.f32.mrb[21].mxu0 }
0x1add   :  { %v8293_v5 = vpop.f32.mrb[22].mxu0 }
0x1ade   :  { %v9930_v21 = vpop.f32.mrb[23].mxu0 }
0x1afc   :  { %v8146_v56 = vpop.f32.mrb[20].mxu1 }
0x1afd   :  { %v10061_v48 = vpack.i.bf16 %v8146_v56, %v8098_v9  ;;  %v9911_v54 = vpop.f32.mrb[21].mxu1  ;;  %v8450_v9 = vsel %vm4300_vm4, %v8442_v12, %v10039_v58  ;;  %v10417_v12 = vld [vmem:[%s13158_s0 + $0x30] sm:$0xff] }
0x1afe   :  { %v8149_v35 = vpop.f32.mrb[22].mxu1 }
0x1aff   :  { %v9912_v33 = vpop.f32.mrb[23].mxu1  ;;  %10062 = vrot.lane.b32.xlu1 %v10061_v48, %s10428_s29 }
0x1b03   :  { %10067 = vrot.lane.b32.xlu1 %v10066_v19, %s10427_s21  ;;  %v10034_v19 = vunpack.i.l.bf16 %v10033_v15 }
0x1b04   :  { %v8242_v24 = vpop.f32.mrb[24].mxu1 }
0x1b05   :  { %v10071_v45 = vpack.i.bf16 %v8242_v24, %v8194_v20  ;;  %v9923_v38 = vpop.f32.mrb[25].mxu1  ;;  %v8448_v46 = vsel %vm4300_vm4, %v8440_v44, %v10034_v19 }
0x1b06   :  { %v8245_v16 = vpop.f32.mrb[26].mxu1  ;;  %v10049_v38 = vunpack.i.l.bf16 %v10048_v51 }
0x1b07   :  { %v9924_v7 = vpop.f32.mrb[27].mxu1  ;;  %10072 = vrot.lane.b32.xlu0 %v10071_v45, %s10428_s29  ;;  %v10050_v45 = vunpack.i.h.bf16 %v10048_v51  ;;  %v10415_v51 = vld [vmem:[%s13158_s0 + $0x18] sm:$0xff] }
0x1b10   :  { %v8338_v49 = vpop.f32.mrb[28].mxu1 }
0x1b11   :  { %v10076_v27 = vpack.i.bf16 %v8338_v49, %v8290_v60  ;;  %v9935_v50 = vpop.f32.mrb[29].mxu1  ;;  %v13203_v60 = vld [vmem:[#allocation5_spill] sm:$0xff] }
0x1b12   :  { %v8341_v30 = vpop.f32.mrb[30].mxu1  ;;  %v8444_v61 = vsel %vm698_vm2, %v13203_v60, %v10044_v17 }
0x1b13   :  { %v9936_v52 = vpop.f32.mrb[31].mxu1  ;;  %10077 = vrot.lane.b32.xlu1 %v10076_v27, %s10428_s29  ;;  %v13204_v27 = vld [vmem:[#allocation8_spill] sm:$0xff]  ;;  %v13205_v30 = vld [vmem:[#allocation7_spill] sm:$0xff] }
0x1b14   :  { %v8447_v50 = vsel %vm698_vm2, %v13204_v27, %v10050_v45  ;;  %v8446_v52 = vsel %vm698_vm2, %v13205_v30, %v10049_v38 }
0x1b3c   :  { %v10053_v18 = vpop.permute.xlu0 %10052 }
0x1b3d   :  { %v10055_v13 = vunpack.i.h.bf16 %v10053_v18  ;;  %v10054_v57 = vunpack.i.l.bf16 %v10053_v18 }
0x1b3f   :  { %v8457_v41 = vsel %vm4309_vm5, %v8449_v8, %v10055_v13  ;;  %v8456_v62 = vsel %vm4309_vm5, %v8448_v46, %v10054_v57  ;;  %v10413_v46 = vld [vmem:[%s13158_s0 + $0x10] sm:$0xff] }
0x1b40   :  { %v8464_v47 = vpack.c.bf16 %v8457_v41, %v8456_v62  ;;  %v10058_v11 = vpop.permute.xlu0 %10057 }
0x1b41   :  { %v10060_v22 = vunpack.i.h.bf16 %v10058_v11  ;;  %v10059_v20 = vunpack.i.l.bf16 %v10058_v11 }
0x1b42   :  { %9941 = vmatprep.mubr.msk.bf16.mxu0 %vm91_vm0, %v8464_v47  ;;  %v10414_v47 = vld [vmem:[%s13158_s0] sm:$0xff] }
0x1b43   :  { %v8453_v56 = vsel %vm4300_vm4, %v8445_v25, %v10060_v22  ;;  %v8452_v48 = vsel %vm4300_vm4, %v8444_v61, %v10059_v20 }
0x1b71   :  { %v10063_v3 = vpop.permute.xlu1 %10062 }
0x1b72   :  { %v10065_v23 = vunpack.i.h.bf16 %v10063_v3  ;;  %v10064_v29 = vunpack.i.l.bf16 %v10063_v3 }
0x1b74   :  { %v8459_v63 = vsel %vm4309_vm5, %v8451_v34, %v10065_v23  ;;  %v8458_v0 = vsel %vm4309_vm5, %v8450_v9, %v10064_v29  ;;  %v10418_v34 = vld [vmem:[%s13158_s0 + $0x20] sm:$0xff] }
0x1b75   :  { %v8465_v39 = vpack.c.bf16 %v8459_v63, %v8458_v0  ;;  %v10068_v24 = vpop.permute.xlu1 %10067  ;;  %v10419_v0 = vld [vmem:[%s13158_s0 + $0x38] sm:$0xff] }
0x1b76   :  { %v10070_v16 = vunpack.i.h.bf16 %v10068_v24  ;;  %v10069_v7 = vunpack.i.l.bf16 %v10068_v24 }
0x1b77   :  { %9942 = vmatmul.mubr.msk.bf16.vlgmr.msra.gmra.mrb[24].mxu0 %vm91_vm0, %v8465_v39 }
0x1b78   :  { %v8455_v28 = vsel %vm4300_vm4, %v8447_v50, %v10070_v16  ;;  %v8454_v37 = vsel %vm4300_vm4, %v8446_v52, %v10069_v7 }
0x1b79   :  { %v10073_v43 = vpop.permute.xlu0 %10072 }
0x1b7a   :  { %v10075_v5 = vunpack.i.h.bf16 %v10073_v43  ;;  %v10074_v21 = vunpack.i.l.bf16 %v10073_v43 }
0x1b7c   :  { %v8461_v54 = vsel %vm4309_vm5, %v8453_v56, %v10075_v5  ;;  %v8460_v35 = vsel %vm4309_vm5, %v8452_v48, %v10074_v21 }
0x1b7d   :  { %v8466_v33 = vpack.c.bf16 %v8461_v54, %v8460_v35 }
0x1b7f   :  { %9945 = vmatprep.mubr.msk.bf16.mxu0 %vm91_vm0, %v8466_v33 }
0x1b85   :  { %v10078_v49 = vpop.permute.xlu1 %10077 }
0x1b86   :  { %v10080_v10 = vunpack.i.h.bf16 %v10078_v49  ;;  %v10079_v15 = vunpack.i.l.bf16 %v10078_v49 }
0x1b88   :  { %v8463_v4 = vsel %vm4309_vm5, %v8455_v28, %v10080_v10  ;;  %v8462_v6 = vsel %vm4309_vm5, %v8454_v37, %v10079_v15 }
0x1b89   :  { %v8467_v19 = vpack.c.bf16 %v8463_v4, %v8462_v6 }
0x1b8b   :  { %9946 = vmatmul.mubr.msk.bf16.gmra.mrb[28].mxu0 %vm91_vm0, %v8467_v19 }
0x1c4a   :  { %v9943_v18 = vpop.f32.mrb[24].mxu0 }
0x1c4b   :  { %v8523_v32 = vadd.f32 %v10412_v36, %v9943_v18  ;;  %v8514_v44 = vpop.f32.mrb[25].mxu0 }
0x1c4c   :  { %v8515_v13 = vadd.f32 %v10412_v36, %v8514_v44  ;;  %v9944_v57 = vpop.f32.mrb[26].mxu0 }
0x1c4d   :  { %v8547_v8 = vadd.f32 %v10413_v46, %v8523_v32  ;;  %v8526_v41 = vadd.f32 %v10412_v36, %v9944_v57  ;;  %v8517_v62 = vpop.f32.mrb[27].mxu0 }
0x1c4e   :  { %v8545_v26 = vadd.f32 %v10414_v47, %v8515_v13  ;;  %v8518_v53 = vadd.f32 %v10412_v36, %v8517_v62 }
0x1c4f   :  { %8555 = vst.msk [vmem:[%s13173_s14 + $0x10] sm:$0xff] %vm91_vm0, %v8547_v8  ;;  %v8548_v40 = vadd.f32 %v10415_v51, %v8526_v41 }
0x1c50   :  { %8553 = vst.msk [vmem:[%s13173_s14] sm:$0xff] %vm91_vm0, %v8545_v26  ;;  %v8546_v14 = vadd.f32 %v10416_v1, %v8518_v53 }
0x1c51   :  { %8556 = vst.msk [vmem:[%s13173_s14 + $0x18] sm:$0xff] %vm91_vm0, %v8548_v40 }
0x1c52   :  { %8554 = vst.msk [vmem:[%s13173_s14 + $0x8] sm:$0xff] %vm91_vm0, %v8546_v14 }
0x1c5e   :  { %v9947_v58 = vpop.f32.mrb[28].mxu0 }
0x1c5f   :  { %v8539_v3 = vadd.f32 %v10412_v36, %v9947_v58  ;;  %v8530_v55 = vpop.f32.mrb[29].mxu0 }
0x1c60   :  { %v8531_v59 = vadd.f32 %v10412_v36, %v8530_v55  ;;  %v9948_v31 = vpop.f32.mrb[30].mxu0 }
0x1c61   :  { %v8551_v23 = vadd.f32 %v10417_v12, %v8539_v3  ;;  %v8542_v29 = vadd.f32 %v10412_v36, %v9948_v31  ;;  %v8533_v9 = vpop.f32.mrb[31].mxu0 }
0x1c62   :  { %v8549_v11 = vadd.f32 %v10418_v34, %v8531_v59  ;;  %v8534_v63 = vadd.f32 %v10412_v36, %v8533_v9 }
0x1c63   :  { %8559 = vst.msk [vmem:[%s13173_s14 + $0x30] sm:$0xff] %vm91_vm0, %v8551_v23  ;;  %v8552_v39 = vadd.f32 %v10419_v0, %v8542_v29 }
0x1c64   :  { %8557 = vst.msk [vmem:[%s13173_s14 + $0x20] sm:$0xff] %vm91_vm0, %v8549_v11  ;;  %v8550_v17 = vadd.f32 %v10420_v2, %v8534_v63 }
0x1c65   :  { %8560 = vst.msk [vmem:[%s13173_s14 + $0x38] sm:$0xff] %vm91_vm0, %v8552_v39 }
0x1c66   :  { %8558 = vst.msk [vmem:[%s13173_s14 + $0x28] sm:$0xff] %vm91_vm0, %v8550_v17 }

</bundles_post_ra>
